<compile_context>
chip_gen: v5e
topology: v5e:2x2
jax: 0.10.0
libtpu: 0.0.40
codegen_flags: <defaults>
</compile_context>

<pallas_src>
import numpy as np

import jax
import jax.numpy as jnp
from jax import lax
from jax.experimental import pallas as pl
from jax.experimental.pallas import tpu as pltpu

# ----------------------------- problem sizes --------------------------------
N_I = 16            # image ('i_nd') nodes per graph
N_D = 8             # dot ('d_nd') nodes per graph
F = 32              # out_feats
N_LAYERS = 2        # n_layers
NEG_SLOPE = 0.01    # nn.LeakyReLU default

B = 64              # number of graphs (batch)
TB = 16             # graphs per grid step
F_PAD = 128         # feature dim padded to full lane width (compute only)
TBNI = TB * N_I     # 256 image nodes per block
TBND = TB * N_D     # 128 dot nodes per block  (== lane-dense score row)
BIAS_ROWS = 16      # bias row stride, aligned to the bf16 (16,128) sublane tile


# ------------------------- packed parameter layout ---------------------------
def _build_param_layout():
    layout, off = {}, 0

    def add(name, rows):
        nonlocal off
        layout[name] = off
        off += rows

    add("w_r2r", N_LAYERS * F_PAD)        # layer l at +l*F_PAD
    add("b_r2r", N_LAYERS * BIAS_ROWS)    # layer l at +l*BIAS_ROWS
    add("w_i2i", N_LAYERS * F_PAD)
    add("b_i2i", N_LAYERS * BIAS_ROWS)
    add("w1", F_PAD)
    add("b1", BIAS_ROWS)
    add("w2", F_PAD)
    add("b2", BIAS_ROWS)
    add("w3", BIAS_ROWS)                  # stored as a (1, F_PAD) row
    add("b3", BIAS_ROWS)                  # scalar replicated across 128 lanes
    return layout, off


PARAM_LAYOUT, PARAM_ROWS_TOTAL = _build_param_layout()   # 896 rows x 128 lanes (bf16)


# --------------------------------- kernel ------------------------------------
def gc_kernel(adj_ref, nodes_ref, params_ref, out_ref, pad_ref):
    """One grid step = TB graphs, fully resident in VMEM.  All HBM inputs bf16."""
    L = PARAM_LAYOUT

    a_ii = adj_ref[0:TBNI, :]                    # (256, 256) bf16 block-diag i2i
    a_di = adj_ref[TBNI:TBNI + TBND, :]          # (128, 256) bf16 block-diag i2d

    # Lane-pad the compact (512, 32) node block to 128 lanes once, in VMEM.
    # Padded lanes stay exactly zero; all downstream padded W columns are zero
    # too, so the rest of the kernel needs no masking.
    pad_ref[...] = jnp.zeros_like(pad_ref)
    pad_ref[:, 0:F] = nodes_ref[...]
    r = pad_ref[0:TBNI, :]                       # (256, 128) bf16
    h_i = pad_ref[TBNI:2 * TBNI, :].astype(jnp.float32)   # (256, 128) f32

    def wslice(off, rows):
        return params_ref[off:off + rows, :]     # bf16 slab slices

    def mxu(a, b):
        # bf16 operands (the astype is a no-op when the operand is already
        # bf16, e.g. adjacency / weights straight from HBM; intermediates are
        # f32 and get one cast per use), f32 accumulation on the MXU.
        return jnp.dot(a.astype(jnp.bfloat16), b.astype(jnp.bfloat16),
                       preferred_element_type=jnp.float32)

    def leaky(x):
        return jnp.maximum(x, NEG_SLOPE * x)

    for l in range(N_LAYERS):                    # static unrolled layer loop
        # r2r GCN layer: relu((A_ii @ r) @ W + b)
        w = wslice(L["w_r2r"] + l * F_PAD, F_PAD)
        b = wslice(L["b_r2r"] + l * BIAS_ROWS, 1).astype(jnp.float32)
        r = jnp.maximum(mxu(mxu(a_ii, r), w) + b, 0.0)
        # r2i: i + r   (elementwise math stays f32)
        h_i = h_i + r
        # i2i GCN layer
        w = wslice(L["w_i2i"] + l * F_PAD, F_PAD)
        b = wslice(L["b_i2i"] + l * BIAS_ROWS, 1).astype(jnp.float32)
        h_i = jnp.maximum(mxu(mxu(a_ii, h_i), w) + b, 0.0)

    # i2s_layer: unweighted sum over i2d edges.
    d = mxu(a_di, h_i)                           # (128, 128) f32

    # d2score MLP (padded to 128 lanes; padded columns stay exactly zero).
    h = leaky(mxu(d, wslice(L["w1"], F_PAD)) + wslice(L["b1"], 1).astype(jnp.float32))
    h = leaky(mxu(h, wslice(L["w2"], F_PAD)) + wslice(L["b2"], 1).astype(jnp.float32))

    # Final Linear(1): contract on the feature axis of h (trans-B matmul) so the
    # score comes out as a lane-dense (1, 128) row -> unmasked full-width store.
    w3 = wslice(L["w3"], 1)                      # (1, F_PAD) bf16
    score = lax.dot_general(
        w3, h.astype(jnp.bfloat16),
        dimension_numbers=(((1,), (1,)), ((), ())),
        preferred_element_type=jnp.float32)      # (1, TBND)
    out_ref[...] = score + params_ref[L["b3"]:L["b3"] + 1, :].astype(jnp.float32)


# --------------------------------- wrapper ------------------------------------
@jax.jit
def gcconvolution2_forward(adj_blocks, node_blocks, param_slab):
    nb = adj_blocks.shape[0]
    out = pl.pallas_call(
        gc_kernel,
        out_shape=jax.ShapeDtypeStruct((nb, 1, TBND), jnp.float32),
        grid=(nb,),
        in_specs=[
            pl.BlockSpec((None, TBNI + TBND, TBNI), lambda b: (b, 0, 0)),
            pl.BlockSpec((None, 2 * TBNI, F), lambda b: (b, 0, 0)),
            # Single coalesced bf16 parameter slab; constant index -> resident.
            pl.BlockSpec((PARAM_ROWS_TOTAL, F_PAD), lambda b: (0, 0)),
        ],
        out_specs=pl.BlockSpec((None, 1, TBND), lambda b: (b, 0, 0)),
        scratch_shapes=[pltpu.VMEM((2 * TBNI, F_PAD), jnp.bfloat16)],
        # Megacore sharding only applies on v7x (2 TC/chip); no-op on v5e/v6e.
        compiler_params=pltpu.CompilerParams(dimension_semantics=("parallel",)),
    )(adj_blocks, node_blocks, param_slab)
    return out.reshape(-1, 1)                    # (B * N_D, 1), graph-major


# ----------------------------- host-side packing ------------------------------
def pack_params(p):
    pn = {k: np.asarray(v) for k, v in p.items()}
    slab = np.zeros((PARAM_ROWS_TOTAL, F_PAD), np.float32)
    L = PARAM_LAYOUT
    for l in range(N_LAYERS):
        slab[L["w_r2r"] + l * F_PAD: L["w_r2r"] + l * F_PAD + F, 0:F] = pn["w_r2r"][l]
        slab[L["b_r2r"] + l * BIAS_ROWS, 0:F] = pn["b_r2r"][l]
        slab[L["w_i2i"] + l * F_PAD: L["w_i2i"] + l * F_PAD + F, 0:F] = pn["w_i2i"][l]
        slab[L["b_i2i"] + l * BIAS_ROWS, 0:F] = pn["b_i2i"][l]
    slab[L["w1"]:L["w1"] + F, 0:F // 2] = pn["w1"]
    slab[L["b1"], 0:F // 2] = pn["b1"]
    slab[L["w2"]:L["w2"] + F // 2, 0:F // 4] = pn["w2"]
    slab[L["b2"], 0:F // 4] = pn["b2"]
    slab[L["w3"], 0:F // 4] = pn["w3"][:, 0]
    slab[L["b3"], :] = pn["b3"]                  # scalar replicated on all lanes
    return jnp.asarray(slab).astype(jnp.bfloat16)


def pack_graph_blocks(a_ii, a_di, r_node, i_node):
    """Pack TB graphs per block: block-diagonal bf16 adjacency + compact
    sublane-stacked bf16 node features (r rows 0:TBNI, i rows TBNI:2*TBNI)."""
    a_ii, a_di = np.asarray(a_ii), np.asarray(a_di)
    r_node, i_node = np.asarray(r_node), np.asarray(i_node)
    nb = a_ii.shape[0] // TB
    adj = np.zeros((nb, TBNI + TBND, TBNI), np.float32)
    nodes = np.zeros((nb, 2 * TBNI, F), np.float32)
    for blk in range(nb):
        for g in range(TB):
            gb = blk * TB + g
            r0 = g * N_I
            adj[blk, r0:r0 + N_I, r0:r0 + N_I] = a_ii[gb]
            d0 = TBNI + g * N_D
            adj[blk, d0:d0 + N_D, r0:r0 + N_I] = a_di[gb]
            nodes[blk, r0:r0 + N_I, :] = r_node[gb]
            nodes[blk, TBNI + r0:TBNI + r0 + N_I, :] = i_node[gb]
    return (jnp.asarray(adj).astype(jnp.bfloat16),
            jnp.asarray(nodes).astype(jnp.bfloat16))


# --------------------------------- reference ----------------------------------
@jax.jit
def reference_forward(a_ii, a_di, r_node, i_node, params):
    def bdot(x, w):
        return jnp.dot(x.astype(jnp.bfloat16), w.astype(jnp.bfloat16),
                       preferred_element_type=jnp.float32)

    def leaky(x):
        return jnp.where(x > 0, x, NEG_SLOPE * x)

    def one(a_ii_g, a_di_g, r_g, i_g):
        for l in range(N_LAYERS):
            r_g = jnp.maximum(bdot(bdot(a_ii_g, r_g), params["w_r2r"][l])
                              + params["b_r2r"][l], 0.0)
            i_g = i_g + r_g
            i_g = jnp.maximum(bdot(bdot(a_ii_g, i_g), params["w_i2i"][l])
                              + params["b_i2i"][l], 0.0)
        d = bdot(a_di_g, i_g)
        h = leaky(bdot(d, params["w1"]) + params["b1"])
        h = leaky(bdot(h, params["w2"]) + params["b2"])
        return bdot(h, params["w3"]) + params["b3"]

    out = jax.vmap(one)(a_ii, a_di, r_node, i_node)   # (B, N_D, 1)
    return out.reshape(-1, 1)


# --------------------------------- init ---------------------------------------
def init_params(key):
    def glorot(k, shape):
        fan_in, fan_out = shape[-2], shape[-1]
        lim = (6.0 / (fan_in + fan_out)) ** 0.5
        return jax.random.uniform(k, shape, jnp.float32, -lim, lim)

    ks = jax.random.split(key, 10)
    return {
        "w_r2r": glorot(ks[0], (N_LAYERS, F, F)),
        "b_r2r": 0.1 * jax.random.normal(ks[1], (N_LAYERS, F), jnp.float32),
        "w_i2i": glorot(ks[2], (N_LAYERS, F, F)),
        "b_i2i": 0.1 * jax.random.normal(ks[3], (N_LAYERS, F), jnp.float32),
        "w1": glorot(ks[4], (F, F // 2)),
        "b1": 0.1 * jax.random.normal(ks[5], (F // 2,), jnp.float32),
        "w2": glorot(ks[6], (F // 2, F // 4)),
        "b2": 0.1 * jax.random.normal(ks[7], (F // 4,), jnp.float32),
        "w3": glorot(ks[8], (F // 4, 1)),
        "b3": 0.1 * jax.random.normal(ks[9], (), jnp.float32),
    }


def _round_bf16(x):
    return x.astype(jnp.bfloat16).astype(jnp.float32)


if __name__ == "__main__":
    key = jax.random.PRNGKey(0)
    k_params, k_a, k_d, k_r, k_i = jax.random.split(key, 5)

    # Model bf16 HBM storage: round params / graph data to bf16 once so kernel
    # and reference consume bit-identical values (reference stays f32-typed).
    params = jax.tree_util.tree_map(_round_bf16, init_params(k_params))

    # Per-graph dense i2i adjacency: symmetric, self loops, row-normalized.
    mask = jax.random.bernoulli(k_a, 0.3, (B, N_I, N_I)).astype(jnp.float32)
    a = jnp.clip(jnp.maximum(mask, jnp.swapaxes(mask, 1, 2))
                 + jnp.eye(N_I, dtype=jnp.float32)[None], 0.0, 1.0)
    a_ii = _round_bf16(a / a.sum(axis=2, keepdims=True))
    # Per-graph binary i2d incidence (dgl copy_u + sum); values bf16-exact.
    a_di = jax.random.bernoulli(k_d, 0.4, (B, N_D, N_I)).astype(jnp.float32)

    r_node = _round_bf16(jax.random.normal(k_r, (B, N_I, F), jnp.float32))
    i_node = _round_bf16(jax.random.normal(k_i, (B, N_I, F), jnp.float32))

    adj_blocks, node_blocks = pack_graph_blocks(a_ii, a_di, r_node, i_node)
    param_slab = pack_params(params)

    score = gcconvolution2_forward(adj_blocks, node_blocks, param_slab)
    score = jax.block_until_ready(score)
    assert score.shape == (B * N_D, 1) and score.dtype == jnp.float32

    ref = jax.block_until_ready(reference_forward(a_ii, a_di, r_node, i_node, params))
    np.testing.assert_allclose(np.asarray(score), np.asarray(ref),
                               rtol=1e-2, atol=1e-2)

    print("KERNEL_OK")
</pallas_src>

<mosaic_0001>
module attributes {stable_mosaic.version = 11 : i64} {
  func.func @gc_kernel(%arg0: i32, %arg1: memref<1x384x256xbf16, #tpu.memory_space<vmem>>, %arg2: memref<1x512x32xbf16, #tpu.memory_space<vmem>>, %arg3: memref<896x128xbf16, #tpu.memory_space<vmem>>, %arg4: memref<1x1x128xf32, #tpu.memory_space<vmem>>, %arg5: memref<512x128xbf16, #tpu.memory_space<vmem>>) attributes {dimension_semantics = [#tpu.dimension_semantics<parallel>], iteration_bounds = array<i64: 4>, scalar_prefetch = 0 : i64, scratch_operands = 1 : i64, tpu.core_type = #tpu.core_type<tc>, window_params = [{transform_indices = @transform_0, window_bounds = array<i64: 1, 384, 256>}, {transform_indices = @transform_1, window_bounds = array<i64: 1, 512, 32>}, {pipeline_mode = #tpu.pipeline_mode<synchronous>, transform_indices = @transform_2, window_bounds = array<i64: 896, 128>}, {transform_indices = @transform_3, window_bounds = array<i64: 1, 1, 128>}]} {
    %c0 = arith.constant 0 : index
    %c0_0 = arith.constant 0 : index
    %c0_1 = arith.constant 0 : index
    %0 = vector.load %arg1[%c0, %c0_0, %c0_1] : memref<1x384x256xbf16, #tpu.memory_space<vmem>>, vector<1x256x256xbf16>
    %1 = vector.shape_cast %0 : vector<1x256x256xbf16> to vector<256x256xbf16>
    %c0_2 = arith.constant 0 : index
    %c256 = arith.constant 256 : index
    %c0_3 = arith.constant 0 : index
    %2 = vector.load %arg1[%c0_2, %c256, %c0_3] : memref<1x384x256xbf16, #tpu.memory_space<vmem>>, vector<1x128x256xbf16>
    %3 = vector.shape_cast %2 : vector<1x128x256xbf16> to vector<128x256xbf16>
    %cst = arith.constant 0.000000e+00 : bf16
    %4 = vector.broadcast %cst : bf16 to vector<512x128xbf16>
    %c0_4 = arith.constant 0 : index
    %c0_5 = arith.constant 0 : index
    %5 = vector.load %arg5[%c0_4, %c0_5] : memref<512x128xbf16, #tpu.memory_space<vmem>>, vector<512x128xbf16>
    tpu.vector_store %arg5[%c0_4, %c0_5], %4 {strides = array<i32>} : memref<512x128xbf16, #tpu.memory_space<vmem>>, vector<512x128xbf16>,
    %c0_6 = arith.constant 0 : index
    %c0_7 = arith.constant 0 : index
    %c0_8 = arith.constant 0 : index
    %6 = vector.load %arg2[%c0_6, %c0_7, %c0_8] : memref<1x512x32xbf16, #tpu.memory_space<vmem>>, vector<1x512x32xbf16>
    %7 = vector.shape_cast %6 : vector<1x512x32xbf16> to vector<512x32xbf16>
    %c0_9 = arith.constant 0 : index
    %c0_10 = arith.constant 0 : index
    %8 = vector.load %arg5[%c0_9, %c0_10] : memref<512x128xbf16, #tpu.memory_space<vmem>>, vector<512x32xbf16>
    tpu.vector_store %arg5[%c0_9, %c0_10], %7 {strides = array<i32>} : memref<512x128xbf16, #tpu.memory_space<vmem>>, vector<512x32xbf16>,
    %c0_11 = arith.constant 0 : index
    %c0_12 = arith.constant 0 : index
    %9 = vector.load %arg5[%c0_11, %c0_12] : memref<512x128xbf16, #tpu.memory_space<vmem>>, vector<256x128xbf16>
    %c256_13 = arith.constant 256 : index
    %c0_14 = arith.constant 0 : index
    %10 = vector.load %arg5[%c256_13, %c0_14] : memref<512x128xbf16, #tpu.memory_space<vmem>>, vector<256x128xbf16>
    %11 = arith.extf %10 : vector<256x128xbf16> to vector<256x128xf32>
    %c0_15 = arith.constant 0 : index
    %c0_16 = arith.constant 0 : index
    %12 = vector.load %arg3[%c0_15, %c0_16] : memref<896x128xbf16, #tpu.memory_space<vmem>>, vector<128x128xbf16>
    %c256_17 = arith.constant 256 : index
    %c0_18 = arith.constant 0 : index
    %13 = vector.load %arg3[%c256_17, %c0_18] : memref<896x128xbf16, #tpu.memory_space<vmem>>, vector<1x128xbf16>
    %14 = arith.extf %13 : vector<1x128xbf16> to vector<1x128xf32>
    %cst_19 = arith.constant dense<0.000000e+00> : vector<256x128xf32>
    %15 = tpu.matmul %1, %9, %cst_19 {dimension_numbers = #tpu.dot_dimension_numbers<[1], [0], [0], [1], [0, 0, 1, 1], [], []>} : vector<256x256xbf16>, vector<256x128xbf16>, vector<256x128xf32> -> vector<256x128xf32>
    %16 = arith.truncf %15 : vector<256x128xf32> to vector<256x128xbf16>
    %cst_20 = arith.constant dense<0.000000e+00> : vector<256x128xf32>
    %17 = tpu.matmul %16, %12, %cst_20 {dimension_numbers = #tpu.dot_dimension_numbers<[1], [0], [0], [1], [0, 0, 1, 1], [], []>} : vector<256x128xbf16>, vector<128x128xbf16>, vector<256x128xf32> -> vector<256x128xf32>
    %18 = vector.broadcast %14 : vector<1x128xf32> to vector<256x128xf32>
    %19 = arith.addf %17, %18 : vector<256x128xf32>
    %cst_21 = arith.constant 0.000000e+00 : f32
    %20 = vector.broadcast %cst_21 : f32 to vector<256x128xf32>
    %21 = arith.maximumf %19, %20 : vector<256x128xf32>
    %22 = arith.addf %11, %21 : vector<256x128xf32>
    %c288 = arith.constant 288 : index
    %c0_22 = arith.constant 0 : index
    %23 = vector.load %arg3[%c288, %c0_22] : memref<896x128xbf16, #tpu.memory_space<vmem>>, vector<128x128xbf16>
    %c544 = arith.constant 544 : index
    %c0_23 = arith.constant 0 : index
    %24 = vector.load %arg3[%c544, %c0_23] : memref<896x128xbf16, #tpu.memory_space<vmem>>, vector<1x128xbf16>
    %25 = arith.extf %24 : vector<1x128xbf16> to vector<1x128xf32>
    %26 = arith.truncf %22 : vector<256x128xf32> to vector<256x128xbf16>
    %cst_24 = arith.constant dense<0.000000e+00> : vector<256x128xf32>
    %27 = tpu.matmul %1, %26, %cst_24 {dimension_numbers = #tpu.dot_dimension_numbers<[1], [0], [0], [1], [0, 0, 1, 1], [], []>} : vector<256x256xbf16>, vector<256x128xbf16>, vector<256x128xf32> -> vector<256x128xf32>
    %28 = arith.truncf %27 : vector<256x128xf32> to vector<256x128xbf16>
    %cst_25 = arith.constant dense<0.000000e+00> : vector<256x128xf32>
    %29 = tpu.matmul %28, %23, %cst_25 {dimension_numbers = #tpu.dot_dimension_numbers<[1], [0], [0], [1], [0, 0, 1, 1], [], []>} : vector<256x128xbf16>, vector<128x128xbf16>, vector<256x128xf32> -> vector<256x128xf32>
    %30 = vector.broadcast %25 : vector<1x128xf32> to vector<256x128xf32>
    %31 = arith.addf %29, %30 : vector<256x128xf32>
    %cst_26 = arith.constant 0.000000e+00 : f32
    %32 = vector.broadcast %cst_26 : f32 to vector<256x128xf32>
    %33 = arith.maximumf %31, %32 : vector<256x128xf32>
    %c128 = arith.constant 128 : index
    %c0_27 = arith.constant 0 : index
    %34 = vector.load %arg3[%c128, %c0_27] : memref<896x128xbf16, #tpu.memory_space<vmem>>, vector<128x128xbf16>
    %c272 = arith.constant 272 : index
    %c0_28 = arith.constant 0 : index
    %35 = vector.load %arg3[%c272, %c0_28] : memref<896x128xbf16, #tpu.memory_space<vmem>>, vector<1x128xbf16>
    %36 = arith.extf %35 : vector<1x128xbf16> to vector<1x128xf32>
    %37 = arith.truncf %21 : vector<256x128xf32> to vector<256x128xbf16>
    %cst_29 = arith.constant dense<0.000000e+00> : vector<256x128xf32>
    %38 = tpu.matmul %1, %37, %cst_29 {dimension_numbers = #tpu.dot_dimension_numbers<[1], [0], [0], [1], [0, 0, 1, 1], [], []>} : vector<256x256xbf16>, vector<256x128xbf16>, vector<256x128xf32> -> vector<256x128xf32>
    %39 = arith.truncf %38 : vector<256x128xf32> to vector<256x128xbf16>
    %cst_30 = arith.constant dense<0.000000e+00> : vector<256x128xf32>
    %40 = tpu.matmul %39, %34, %cst_30 {dimension_numbers = #tpu.dot_dimension_numbers<[1], [0], [0], [1], [0, 0, 1, 1], [], []>} : vector<256x128xbf16>, vector<128x128xbf16>, vector<256x128xf32> -> vector<256x128xf32>
    %41 = vector.broadcast %36 : vector<1x128xf32> to vector<256x128xf32>
    %42 = arith.addf %40, %41 : vector<256x128xf32>
    %cst_31 = arith.constant 0.000000e+00 : f32
    %43 = vector.broadcast %cst_31 : f32 to vector<256x128xf32>
    %44 = arith.maximumf %42, %43 : vector<256x128xf32>
    %45 = arith.addf %33, %44 : vector<256x128xf32>
    %c416 = arith.constant 416 : index
    %c0_32 = arith.constant 0 : index
    %46 = vector.load %arg3[%c416, %c0_32] : memref<896x128xbf16, #tpu.memory_space<vmem>>, vector<128x128xbf16>
    %c560 = arith.constant 560 : index
    %c0_33 = arith.constant 0 : index
    %47 = vector.load %arg3[%c560, %c0_33] : memref<896x128xbf16, #tpu.memory_space<vmem>>, vector<1x128xbf16>
    %48 = arith.extf %47 : vector<1x128xbf16> to vector<1x128xf32>
    %49 = arith.truncf %45 : vector<256x128xf32> to vector<256x128xbf16>
    %cst_34 = arith.constant dense<0.000000e+00> : vector<256x128xf32>
    %50 = tpu.matmul %1, %49, %cst_34 {dimension_numbers = #tpu.dot_dimension_numbers<[1], [0], [0], [1], [0, 0, 1, 1], [], []>} : vector<256x256xbf16>, vector<256x128xbf16>, vector<256x128xf32> -> vector<256x128xf32>
    %51 = arith.truncf %50 : vector<256x128xf32> to vector<256x128xbf16>
    %cst_35 = arith.constant dense<0.000000e+00> : vector<256x128xf32>
    %52 = tpu.matmul %51, %46, %cst_35 {dimension_numbers = #tpu.dot_dimension_numbers<[1], [0], [0], [1], [0, 0, 1, 1], [], []>} : vector<256x128xbf16>, vector<128x128xbf16>, vector<256x128xf32> -> vector<256x128xf32>
    %53 = vector.broadcast %48 : vector<1x128xf32> to vector<256x128xf32>
    %54 = arith.addf %52, %53 : vector<256x128xf32>
    %cst_36 = arith.constant 0.000000e+00 : f32
    %55 = vector.broadcast %cst_36 : f32 to vector<256x128xf32>
    %56 = arith.maximumf %54, %55 : vector<256x128xf32>
    %57 = arith.truncf %56 : vector<256x128xf32> to vector<256x128xbf16>
    %cst_37 = arith.constant dense<0.000000e+00> : vector<128x128xf32>
    %58 = tpu.matmul %3, %57, %cst_37 {dimension_numbers = #tpu.dot_dimension_numbers<[1], [0], [0], [1], [0, 0, 1, 1], [], []>} : vector<128x256xbf16>, vector<256x128xbf16>, vector<128x128xf32> -> vector<128x128xf32>
    %c576 = arith.constant 576 : index
    %c0_38 = arith.constant 0 : index
    %59 = vector.load %arg3[%c576, %c0_38] : memref<896x128xbf16, #tpu.memory_space<vmem>>, vector<128x128xbf16>
    %60 = arith.truncf %58 : vector<128x128xf32> to vector<128x128xbf16>
    %cst_39 = arith.constant dense<0.000000e+00> : vector<128x128xf32>
    %61 = tpu.matmul %60, %59, %cst_39 {dimension_numbers = #tpu.dot_dimension_numbers<[1], [0], [0], [1], [0, 0, 1, 1], [], []>} : vector<128x128xbf16>, vector<128x128xbf16>, vector<128x128xf32> -> vector<128x128xf32>
    %c704 = arith.constant 704 : index
    %c0_40 = arith.constant 0 : index
    %62 = vector.load %arg3[%c704, %c0_40] : memref<896x128xbf16, #tpu.memory_space<vmem>>, vector<1x128xbf16>
    %63 = arith.extf %62 : vector<1x128xbf16> to vector<1x128xf32>
    %64 = vector.broadcast %63 : vector<1x128xf32> to vector<128x128xf32>
    %65 = arith.addf %61, %64 : vector<128x128xf32>
    %cst_41 = arith.constant 0.00999999977 : f32
    %66 = vector.broadcast %cst_41 : f32 to vector<128x128xf32>
    %67 = arith.mulf %66, %65 : vector<128x128xf32>
    %68 = arith.maximumf %65, %67 : vector<128x128xf32>
    %c720 = arith.constant 720 : index
    %c0_42 = arith.constant 0 : index
    %69 = vector.load %arg3[%c720, %c0_42] : memref<896x128xbf16, #tpu.memory_space<vmem>>, vector<128x128xbf16>
    %70 = arith.truncf %68 : vector<128x128xf32> to vector<128x128xbf16>
    %cst_43 = arith.constant dense<0.000000e+00> : vector<128x128xf32>
    %71 = tpu.matmul %70, %69, %cst_43 {dimension_numbers = #tpu.dot_dimension_numbers<[1], [0], [0], [1], [0, 0, 1, 1], [], []>} : vector<128x128xbf16>, vector<128x128xbf16>, vector<128x128xf32> -> vector<128x128xf32>
    %c848 = arith.constant 848 : index
    %c0_44 = arith.constant 0 : index
    %72 = vector.load %arg3[%c848, %c0_44] : memref<896x128xbf16, #tpu.memory_space<vmem>>, vector<1x128xbf16>
    %73 = arith.extf %72 : vector<1x128xbf16> to vector<1x128xf32>
    %74 = vector.broadcast %73 : vector<1x128xf32> to vector<128x128xf32>
    %75 = arith.addf %71, %74 : vector<128x128xf32>
    %cst_45 = arith.constant 0.00999999977 : f32
    %76 = vector.broadcast %cst_45 : f32 to vector<128x128xf32>
    %77 = arith.mulf %76, %75 : vector<128x128xf32>
    %78 = arith.maximumf %75, %77 : vector<128x128xf32>
    %c864 = arith.constant 864 : index
    %c0_46 = arith.constant 0 : index
    %79 = vector.load %arg3[%c864, %c0_46] : memref<896x128xbf16, #tpu.memory_space<vmem>>, vector<1x128xbf16>
    %80 = arith.truncf %78 : vector<128x128xf32> to vector<128x128xbf16>
    %cst_47 = arith.constant dense<0.000000e+00> : vector<1x128xf32>
    %81 = tpu.matmul %79, %80, %cst_47 {dimension_numbers = #tpu.dot_dimension_numbers<[1], [1], [0], [0], [0, 0, 1, 0], [], []>} : vector<1x128xbf16>, vector<128x128xbf16>, vector<1x128xf32> -> vector<1x128xf32>
    %c880 = arith.constant 880 : index
    %c0_48 = arith.constant 0 : index
    %82 = vector.load %arg3[%c880, %c0_48] : memref<896x128xbf16, #tpu.memory_space<vmem>>, vector<1x128xbf16>
    %83 = arith.extf %82 : vector<1x128xbf16> to vector<1x128xf32>
    %84 = arith.addf %81, %83 : vector<1x128xf32>
    %c0_49 = arith.constant 0 : index
    %c0_50 = arith.constant 0 : index
    %c0_51 = arith.constant 0 : index
    %85 = vector.load %arg4[%c0_49, %c0_50, %c0_51] : memref<1x1x128xf32, #tpu.memory_space<vmem>>, vector<1x1x128xf32>
    %86 = vector.shape_cast %85 : vector<1x1x128xf32> to vector<1x128xf32>
    %87 = vector.shape_cast %84 : vector<1x128xf32> to vector<1x1x128xf32>
    tpu.vector_store %arg4[%c0_49, %c0_50, %c0_51], %87 {strides = array<i32>} : memref<1x1x128xf32, #tpu.memory_space<vmem>>, vector<1x1x128xf32>,
    return
  }
  func.func @transform_0(%arg0: i32) -> (i32, i32, i32) {
    %c0_i32 = arith.constant 0 : i32
    %c0_i32_0 = arith.constant 0 : i32
    %c0_i32_1 = arith.constant 0 : i32
    return %arg0, %c0_i32, %c0_i32_0 : i32, i32, i32
  }
  func.func @transform_1(%arg0: i32) -> (i32, i32, i32) {
    %c0_i32 = arith.constant 0 : i32
    %c0_i32_0 = arith.constant 0 : i32
    %c0_i32_1 = arith.constant 0 : i32
    return %arg0, %c0_i32, %c0_i32_0 : i32, i32, i32
  }
  func.func @transform_2(%arg0: i32) -> (i32, i32) {
    %c0_i32 = arith.constant 0 : i32
    %c0_i32_0 = arith.constant 0 : i32
    %c0_i32_1 = arith.constant 0 : i32
    return %c0_i32, %c0_i32_0 : i32, i32
  }
  func.func @transform_3(%arg0: i32) -> (i32, i32, i32) {
    %c0_i32 = arith.constant 0 : i32
    %c0_i32_0 = arith.constant 0 : i32
    %c0_i32_1 = arith.constant 0 : i32
    return %arg0, %c0_i32, %c0_i32_0 : i32, i32, i32
  }
}

</mosaic_0001>

<bundles_post_ra>
// kernel: gcconvolution2_forward.1
= control target key start
LH: loop header
LB: loop body
LE: loop exit
PB: predicated region body
PF: predicated region fallthrough
CT: control target
= control target key end

     0   :  { %8 = vsyncpa [#allocation4], 0  ;;  %s5125_s0 = inlined_call_operand.hbm [shape: bf16[4,384,256], index: 0, kind: input, shape index: {}]   ;;  %s5126_s1 = inlined_call_operand.vmem [shape: bf16[4,512,32], index: 1, kind: input, shape index: {}]   ;;  %s5127_s2 = inlined_call_operand.vmem [shape: bf16[896,128], index: 2, kind: input, shape index: {}]   ;;  %s5128_s3 = inlined_call_operand.hbm [shape: f32[4,1,128], index: 3, kind: output, shape index: {}]  }
   0x1   :  { %10 = vsyncpa [#allocation4 + $0x1], 0 }
   0x2   :  { %11 = vsyncpa [#allocation5], 0 }
   0x3   :  { %13 = vsyncpa [#allocation5 + $0x1], 0  ;;  %s3889_s12 = smov 0   ;;  %s3891_s13 = smov 0  }
   0x4   :  { %s3893_s14 = smov 0   ;;  %s3895_s15 = smov 0  }
   0x5 LB: > { %s3910_s16 = sadd.s32 4294967295, %s3864_s15   ;;  %s3066_s17 = sadd.s32 4294967294, %s3864_s15   ;;  %s3864_s15 = sphi %s3895_s15, %s5205_s15   ;;  %s3860_s14 = sphi %s3893_s14, %s5204_s14   ;;  %s3856_s13 = sphi %s3891_s13, %s5203_s13   ;;  %s3852_s12 = sphi %s3889_s12, %s5202_s12  }
   0x6   : > { %s3914_s18 = sadd.s32 1, %s3864_s15   ;;  %s26_s19 = sadd.s32 1, %s3860_s14 }
   0x7   : > { %s23_s20 = ssub.s32 %s3864_s15, %s3914_s18  ;;  %p33_p0 = scmp.ne.s32.totalorder %s3860_s14, %s3856_s13 }
   0x8   : > { %p24_p1 = scmp.eq.s32.totalorder %s23_s20, 0  ;;  %p34_p2 = scmp.eq.s32.totalorder %s3864_s15, 0 }
   0x9   : > { %p39_p3 = scmp.ne.s32.totalorder %s3856_s13, %s3852_s12  ;;  %p40_p4 = scmp.eq.s32.totalorder %s3910_s16, 0 }
   0xa   : > { %s3926_s21 = scalar_select %p24_p1, %s3860_s14, %s26_s19  }
   0xb   : > { %p35_p5 = por %p34_p2, %p33_p0  ;;  %p3928_p6 = por %p40_p4, %p39_p3 }
   0xc   : > { %p110_p7 = scmp.eq.s32.totalorder %s3910_s16, 3  ;;  %p116_p8 = scmp.eq.s32.totalorder %s3066_s17, 3 }
   0xd   : > { %p3731_p9 = scmp.lt.s32.totalorder %s3864_s15, 4  ;;  %s139_s25 = sand.u32 1, %s3860_s14  }
   0xe   : > { %p3934_p10 = por %p110_p7, %p33_p0  ;;  %p3938_p11 = por %p116_p8, %p39_p3 }
   0xf   : > { %s3717_s26 = smul.u32 384, %s3864_s15  ;;  %p3947_p12 = pnand %p3731_p9, %p35_p5 }
  0x10   : > { %s3716_s27 = smul.u32 384, %s139_s25  ;;  %s140_s8 = scalar_lea.sflag [#allocation4], %s139_s25 }
  0x11   : > { %s148_s30 = scalar_lea.hbm %s5125_s0, %s3717_s26  ;;  %p3772_p0 = pneg %p3947_p12 }
  0x12   : > { %s149_s5 = sshll.u32 %s148_s30, 4  ;;  %s143_s6 = scalar_lea.vmem [#allocation3], %s3716_s27  ;;  %s150_s5 = int_to_ptr.hbm [resolvable:$true] %s149_s5 }
  0x13   : > { %s151_s7 = sshll.u32 %s143_s6, 4  ;;  %s3768_s9 = sshra.s32 %s150_s5, 4  ;;  %s152_s7 = int_to_ptr.vmem [resolvable:$true] %s151_s7  ;;  %s3769_s9 = int_to_ptr.hbm [resolvable:$true] %s3768_s9 }
  0x14   : > { %s3770_s10 = scalar_lea.hbm %s3769_s9, 384  ;;  %s3775_s19 = scalar_lea.hbm %s5125_s0, 1536 }
  0x15   : > { %p3771_p13 = scmp.ne.s32.totalorder %s3769_s9, %s3770_s10  ;;  %p3776_p3 = scmp.lt.s32.totalorder %s3769_s9, %s5125_s0 }
  0x16   : > { %p3777_p4 = scmp.lt.s32.totalorder %s3775_s19, %s3770_s10 }
  0x17   : > { %p3773_p1 = pnand %p3772_p0, %p3771_p13 }
  0x18   : > { %p3778_p5 = por %p3777_p4, %p3776_p3 }
  0x19   : > { %p3774_p2 = pneg %p3773_p1 }
  0x1b   : > { %p3779_p7 = pnand %p3778_p5, %p3774_p2 }
  0x1d   : > { %3782 = shalt.err (!%p3779_p7)
}
  0x1e   : > { %s3866_s25 = smov 128   ;;  %s3867_s27 = smov 8  }
  0x1f   : > { %3726 = dma.hbm_to_vmem [thread:$0]  (!%p3947_p12), %s150_s5, 6144, %s152_s7, %s140_s8, %s3866_s25, %s3866_s25, %s3867_s27  }
  0x20   : > { %p3070_p8 = scmp.ge.s32.totalorder %s3864_s15, 1  ;;  %p167_p9 = scmp.lt.s32.totalorder %s3864_s15, 5 }
  0x22   : > { %p168_p13 = pnand %p3070_p8, %p167_p9 }
  0x24   : > { %171 = sbr.rel (%p168_p13) target bundleno = 2699 (0xa8b), region = 32 }
  0x29   : > { %s3964_s28 = sand.u32 1, %s3856_s13  }
  0x2a   : > { %s3718_s29 = smul.u32 384, %s3964_s28  ;;  %s174_s30 = scalar_lea.sflag [#allocation4], %s3964_s28 }
  0x2c   : > { %s3968_s6 = scalar_lea.vmem [#allocation3], %s3718_s29 }
  0x2d   : > { %3843 = dma.done.wait (%p3928_p6), %s174_s30, 6144  }
  0x2e   : > { %3845 = vsyncadd (%p3928_p6), %s174_s30, 4294961152  ;;  %p205_p12 = scmp.lt.s32.totalorder %s3910_s16, 3  ;;  %v3868_v0 = vmov 0   ;;  %vm387_vm0 = vcmask 257024   ;;  %v3075_v47 = vld [vmem:[%s3968_s6] sm:$0xf]  ;;  %s2984_s10 = scalar_lea.hbm %s5128_s3, %s3910_s16 }
  0x2f   : > { %273 = vst [vmem:[#allocation2 + $0x38] sm:$0xf] %v3868_v0  ;;  %v3525_v48 = vld [vmem:[%s3968_s6 + $0x4] sm:$0xf0]  ;;  %v3524_v50 = vld [vmem:[%s3968_s6 + $0x4] sm:$0xf] }
  0x30   : > { %s206_s4 = scalar_select %p205_p12, %s3910_s16, 3  ;;  %274 = vst [vmem:[#allocation2 + $0x3c] sm:$0xf] %v3868_v0  ;;  %v3077_v51 = vld [vmem:[%s3968_s6 + $0x8] sm:$0xf0]  ;;  %v4113_v52 = vor.u32 %v3525_v48, %v3075_v47 }
  0x31   : > { %259 = vst [vmem:[#allocation2] sm:$0xf] %v3868_v0  ;;  %v4115_v54 = vor.u32 %v3524_v50, %v3077_v51  ;;  %v3083_v55 = vld [vmem:[%s3968_s6 + $0x10] sm:$0xf]  ;;  %v3527_v56 = vld [vmem:[%s3968_s6 + $0x14] sm:$0xf0] }
  0x32   : > { %s3523_s5 = sshll.u32 %s206_s4, 8  ;;  %260 = vst [vmem:[#allocation2 + $0x4] sm:$0xf] %v3868_v0  ;;  %v3526_v57 = vld [vmem:[%s3968_s6 + $0x14] sm:$0xf]  ;;  %v4123_v59 = vor.u32 %v3527_v56, %v3083_v55  ;;  %s204_s11 = scalar_lea.vmem [#allocation6], %s3964_s28 }
  0x33   : > { %s3983_s9 = scalar_lea.vmem %s5126_s1, %s3523_s5  ;;  %261 = vst [vmem:[#allocation2 + $0x8] sm:$0xf] %v3868_v0  ;;  %v3085_v58 = vld [vmem:[%s3968_s6 + $0x18] sm:$0xf0]  ;;  %v3091_v61 = vld [vmem:[%s3968_s6 + $0x20] sm:$0xf] }
  0x34   : > { %262 = vst [vmem:[#allocation2 + $0xc] sm:$0xf] %v3868_v0  ;;  %v337_v1 = vld [vmem:[%s3983_s9 + $0x38] sm:$0xf]  ;;  %v338_v2 = vld [vmem:[%s3983_s9 + $0x3c] sm:$0xf]  ;;  %v4125_v60 = vor.u32 %v3526_v57, %v3085_v58 }
  0x35   : > { %263 = vst [vmem:[#allocation2 + $0x10] sm:$0xf] %v3868_v0  ;;  %v353_v4 = vld [vmem:[%s3983_s9 + $0x78] sm:$0xf]  ;;  %v354_v5 = vld [vmem:[%s3983_s9 + $0x7c] sm:$0xf] }
  0x36   : > { %402 = vst.msk [vmem:[#allocation2 + $0x38] sm:$0xf] %vm387_vm0, %v337_v1  ;;  %v335_v6 = vld [vmem:[%s3983_s9 + $0x30] sm:$0xf]  ;;  %v336_v7 = vld [vmem:[%s3983_s9 + $0x34] sm:$0xf] }
  0x37   : > { %403 = vst.msk [vmem:[#allocation2 + $0x3c] sm:$0xf] %vm387_vm0, %v338_v2  ;;  %v351_v8 = vld [vmem:[%s3983_s9 + $0x70] sm:$0xf]  ;;  %v352_v9 = vld [vmem:[%s3983_s9 + $0x74] sm:$0xf] }
  0x38   : > { %264 = vst [vmem:[#allocation2 + $0x14] sm:$0xf] %v3868_v0  ;;  %v333_v10 = vld [vmem:[%s3983_s9 + $0x28] sm:$0xf]  ;;  %v334_v11 = vld [vmem:[%s3983_s9 + $0x2c] sm:$0xf] }
  0x39   : > { %265 = vst [vmem:[#allocation2 + $0x18] sm:$0xf] %v3868_v0  ;;  %v349_v12 = vld [vmem:[%s3983_s9 + $0x68] sm:$0xf]  ;;  %v350_v13 = vld [vmem:[%s3983_s9 + $0x6c] sm:$0xf] }
  0x3a   : > { %266 = vst [vmem:[#allocation2 + $0x1c] sm:$0xf] %v3868_v0  ;;  %v331_v14 = vld [vmem:[%s3983_s9 + $0x20] sm:$0xf]  ;;  %v332_v16 = vld [vmem:[%s3983_s9 + $0x24] sm:$0xf] }
  0x3b   : > { %267 = vst [vmem:[#allocation2 + $0x20] sm:$0xf] %v3868_v0  ;;  %v347_v17 = vld [vmem:[%s3983_s9 + $0x60] sm:$0xf]  ;;  %v348_v19 = vld [vmem:[%s3983_s9 + $0x64] sm:$0xf] }
  0x3c   : > { %268 = vst [vmem:[#allocation2 + $0x24] sm:$0xf] %v3868_v0  ;;  %v329_v20 = vld [vmem:[%s3983_s9 + $0x18] sm:$0xf]  ;;  %v330_v22 = vld [vmem:[%s3983_s9 + $0x1c] sm:$0xf] }
  0x3d   : > { %269 = vst [vmem:[#allocation2 + $0x28] sm:$0xf] %v3868_v0  ;;  %v345_v23 = vld [vmem:[%s3983_s9 + $0x58] sm:$0xf]  ;;  %v346_v25 = vld [vmem:[%s3983_s9 + $0x5c] sm:$0xf] }
  0x3e   : > { %v3579_v3 = vld [vmem:[#allocation2 + $0x38] sm:$0xff]  ;;  %270 = vst [vmem:[#allocation2 + $0x2c] sm:$0xf] %v3868_v0  ;;  %v327_v26 = vld [vmem:[%s3983_s9 + $0x10] sm:$0xf]  ;;  %s2988_s17 = sshll.u32 %s2984_s10, 4  ;;  %s2989_s17 = int_to_ptr.hbm [resolvable:$true] %s2988_s17 }
  0x3f   : > { %271 = vst [vmem:[#allocation2 + $0x30] sm:$0xf] %v3868_v0  ;;  %822 = vmatpush.bf16.msra.mxu0 %v3579_v3  ;;  %v328_v28 = vld [vmem:[%s3983_s9 + $0x14] sm:$0xf]  ;;  %v343_v29 = vld [vmem:[%s3983_s9 + $0x50] sm:$0xf] }
  0x40   : > { %272 = vst [vmem:[#allocation2 + $0x34] sm:$0xf] %v3868_v0  ;;  %v344_v31 = vld [vmem:[%s3983_s9 + $0x54] sm:$0xf]  ;;  %v325_v32 = vld [vmem:[%s3983_s9 + $0x8] sm:$0xf] }
  0x41   : > { %275 = vst [vmem:[#allocation2 + $0x40] sm:$0xf] %v3868_v0  ;;  %v326_v34 = vld [vmem:[%s3983_s9 + $0xc] sm:$0xf]  ;;  %v341_v35 = vld [vmem:[%s3983_s9 + $0x48] sm:$0xf] }
  0x42   : > { %276 = vst [vmem:[#allocation2 + $0x44] sm:$0xf] %v3868_v0  ;;  %v342_v37 = vld [vmem:[%s3983_s9 + $0x4c] sm:$0xf]  ;;  %v323_v38 = vld [vmem:[%s3983_s9] sm:$0xf] }
  0x43   : > { %277 = vst [vmem:[#allocation2 + $0x48] sm:$0xf] %v3868_v0  ;;  %v324_v40 = vld [vmem:[%s3983_s9 + $0x4] sm:$0xf]  ;;  %v339_v41 = vld [vmem:[%s3983_s9 + $0x40] sm:$0xf] }
  0x44   : > { %278 = vst [vmem:[#allocation2 + $0x4c] sm:$0xf] %v3868_v0  ;;  %v340_v43 = vld [vmem:[%s3983_s9 + $0x44] sm:$0xf]  ;;  %v3529_v62 = vld [vmem:[%s3968_s6 + $0x24] sm:$0xf0] }
  0x45   : > { %279 = vst [vmem:[#allocation2 + $0x50] sm:$0xf] %v3868_v0  ;;  %v3528_v63 = vld [vmem:[%s3968_s6 + $0x24] sm:$0xf]  ;;  %v4133_v1 = vor.u32 %v3529_v62, %v3091_v61  ;;  %v3099_v3 = vld [vmem:[%s3968_s6 + $0x30] sm:$0xf] }
  0x46   : > { %280 = vst [vmem:[#allocation2 + $0x54] sm:$0xf] %v3868_v0  ;;  %v3147_v55 = vld [vmem:[%s3968_s6 + $0x90] sm:$0xf]  ;;  %v3543_v56 = vld [vmem:[%s3968_s6 + $0x94] sm:$0xf0] }
  0x47   : > { %281 = vst [vmem:[#allocation2 + $0x58] sm:$0xf] %v3868_v0  ;;  %v3542_v58 = vld [vmem:[%s3968_s6 + $0x94] sm:$0xf]  ;;  %v3149_v61 = vld [vmem:[%s3968_s6 + $0x98] sm:$0xf0]  ;;  %v4227_v62 = vor.u32 %v3543_v56, %v3147_v55 }
  0x48   : > { %282 = vst [vmem:[#allocation2 + $0x5c] sm:$0xf] %v3868_v0  ;;  %s2976_s19 = scalar_lea.sflag [#allocation5], %s3964_s28  ;;  %s3812_s20 = sshra.s32 %s2989_s17, 4  ;;  %s3813_s20 = int_to_ptr.hbm [resolvable:$true] %s3812_s20 }
  0x49   : > { %283 = vst [vmem:[#allocation2 + $0x60] sm:$0xf] %v3868_v0  ;;  %s3814_s26 = scalar_lea.hbm %s3813_s20, 1  ;;  %s3818_s16 = scalar_lea.hbm %s5128_s3, 4 }
  0x4a   : > { %284 = vst [vmem:[#allocation2 + $0x64] sm:$0xf] %v3868_v0  ;;  %p3815_p6 = scmp.ne.s32.totalorder %s3813_s20, %s3814_s26  ;;  %p3819_p2 = scmp.lt.s32.totalorder %s3813_s20, %s5128_s3 }
  0x4b   : > { %285 = vst [vmem:[#allocation2 + $0x68] sm:$0xf] %v3868_v0  ;;  %p3820_p3 = scmp.lt.s32.totalorder %s3818_s16, %s3814_s26 }
  0x4c   : > { %286 = vst [vmem:[#allocation2 + $0x6c] sm:$0xf] %v3868_v0  ;;  %p3816_p0 = pnand %p3815_p6, %p3934_p10 }
  0x4d   : > { %287 = vst [vmem:[#allocation2 + $0x70] sm:$0xf] %v3868_v0  ;;  %p3821_p4 = por %p3820_p3, %p3819_p2 }
  0x4e   : > { %288 = vst [vmem:[#allocation2 + $0x74] sm:$0xf] %v3868_v0  ;;  %p3817_p1 = pneg %p3816_p0 }
  0x4f   : > { %289 = vst [vmem:[#allocation2 + $0x78] sm:$0xf] %v3868_v0 }
  0x50   : > { %290 = vst [vmem:[#allocation2 + $0x7c] sm:$0xf] %v3868_v0  ;;  %p3822_p5 = pnand %p3821_p4, %p3817_p1 }
  0x51   : > { %291 = vst [vmem:[#allocation2 + $0x80] sm:$0xf] %v3868_v0 }
  0x52   : > { %292 = vst [vmem:[#allocation2 + $0x84] sm:$0xf] %v3868_v0 }
  0x53   : > { %293 = vst [vmem:[#allocation2 + $0x88] sm:$0xf] %v3868_v0 }
  0x54   : > { %294 = vst [vmem:[#allocation2 + $0x8c] sm:$0xf] %v3868_v0 }
  0x55   : > { %295 = vst [vmem:[#allocation2 + $0x90] sm:$0xf] %v3868_v0 }
  0x56   : > { %296 = vst [vmem:[#allocation2 + $0x94] sm:$0xf] %v3868_v0 }
  0x57   : > { %297 = vst [vmem:[#allocation2 + $0x98] sm:$0xf] %v3868_v0 }
  0x58   : > { %298 = vst [vmem:[#allocation2 + $0x9c] sm:$0xf] %v3868_v0 }
  0x59   : > { %299 = vst [vmem:[#allocation2 + $0xa0] sm:$0xf] %v3868_v0 }
  0x5a   : > { %300 = vst [vmem:[#allocation2 + $0xa4] sm:$0xf] %v3868_v0 }
  0x5b   : > { %301 = vst [vmem:[#allocation2 + $0xa8] sm:$0xf] %v3868_v0 }
  0x5c   : > { %302 = vst [vmem:[#allocation2 + $0xac] sm:$0xf] %v3868_v0 }
  0x5d   : > { %303 = vst [vmem:[#allocation2 + $0xb0] sm:$0xf] %v3868_v0 }
  0x5e   : > { %304 = vst [vmem:[#allocation2 + $0xb4] sm:$0xf] %v3868_v0 }
  0x5f   : > { %305 = vst [vmem:[#allocation2 + $0xb8] sm:$0xf] %v3868_v0 }
  0x60   : > { %306 = vst [vmem:[#allocation2 + $0xbc] sm:$0xf] %v3868_v0 }
  0x61   : > { %307 = vst [vmem:[#allocation2 + $0xc0] sm:$0xf] %v3868_v0 }
  0x62   : > { %308 = vst [vmem:[#allocation2 + $0xc4] sm:$0xf] %v3868_v0 }
  0x63   : > { %309 = vst [vmem:[#allocation2 + $0xc8] sm:$0xf] %v3868_v0 }
  0x64   : > { %310 = vst [vmem:[#allocation2 + $0xcc] sm:$0xf] %v3868_v0 }
  0x65   : > { %311 = vst [vmem:[#allocation2 + $0xd0] sm:$0xf] %v3868_v0 }
  0x66   : > { %312 = vst [vmem:[#allocation2 + $0xd4] sm:$0xf] %v3868_v0 }
  0x67   : > { %313 = vst [vmem:[#allocation2 + $0xd8] sm:$0xf] %v3868_v0 }
  0x68   : > { %314 = vst [vmem:[#allocation2 + $0xdc] sm:$0xf] %v3868_v0 }
  0x69   : > { %315 = vst [vmem:[#allocation2 + $0xe0] sm:$0xf] %v3868_v0 }
  0x6a   : > { %316 = vst [vmem:[#allocation2 + $0xe4] sm:$0xf] %v3868_v0 }
  0x6b   : > { %317 = vst [vmem:[#allocation2 + $0xe8] sm:$0xf] %v3868_v0 }
  0x6c   : > { %318 = vst [vmem:[#allocation2 + $0xec] sm:$0xf] %v3868_v0 }
  0x6d   : > { %319 = vst [vmem:[#allocation2 + $0xf0] sm:$0xf] %v3868_v0 }
  0x6e   : > { %320 = vst [vmem:[#allocation2 + $0xf4] sm:$0xf] %v3868_v0 }
  0x6f   : > { %321 = vst [vmem:[#allocation2 + $0xf8] sm:$0xf] %v3868_v0 }
  0x70   : > { %322 = vst [vmem:[#allocation2 + $0xfc] sm:$0xf] %v3868_v0  ;;  %v3093_v0 = vld [vmem:[%s3968_s6 + $0x28] sm:$0xf0] }
  0x71   : > { %418 = vst.msk [vmem:[#allocation2 + $0x78] sm:$0xf] %vm387_vm0, %v353_v4  ;;  %v4135_v2 = vor.u32 %v3528_v63, %v3093_v0  ;;  %v3531_v4 = vld [vmem:[%s3968_s6 + $0x34] sm:$0xf0]  ;;  %v4229_v0 = vor.u32 %v3542_v58, %v3149_v61 }
  0x72   : > { %419 = vst.msk [vmem:[#allocation2 + $0x7c] sm:$0xf] %vm387_vm0, %v354_v5  ;;  %v3530_v5 = vld [vmem:[%s3968_s6 + $0x34] sm:$0xf] }
  0x73   : > { %400 = vst.msk [vmem:[#allocation2 + $0x30] sm:$0xf] %vm387_vm0, %v335_v6  ;;  %v3101_v6 = vld [vmem:[%s3968_s6 + $0x38] sm:$0xf0] }
  0x74   : > { %401 = vst.msk [vmem:[#allocation2 + $0x34] sm:$0xf] %vm387_vm0, %v336_v7  ;;  %v4143_v7 = vor.u32 %v3531_v4, %v3099_v3 }
  0x75   : > { %416 = vst.msk [vmem:[#allocation2 + $0x70] sm:$0xf] %vm387_vm0, %v351_v8  ;;  %v4145_v8 = vor.u32 %v3530_v5, %v3101_v6 }
  0x76   : > { %417 = vst.msk [vmem:[#allocation2 + $0x74] sm:$0xf] %vm387_vm0, %v352_v9  ;;  %v3107_v9 = vld [vmem:[%s3968_s6 + $0x40] sm:$0xf] }
  0x77   : > { %398 = vst.msk [vmem:[#allocation2 + $0x28] sm:$0xf] %vm387_vm0, %v333_v10  ;;  %v3533_v10 = vld [vmem:[%s3968_s6 + $0x44] sm:$0xf0] }
  0x78   : > { %399 = vst.msk [vmem:[#allocation2 + $0x2c] sm:$0xf] %vm387_vm0, %v334_v11  ;;  %v3532_v11 = vld [vmem:[%s3968_s6 + $0x44] sm:$0xf] }
  0x79   : > { %v3587_v15 = vld [vmem:[#allocation2 + $0x78] sm:$0xff]  ;;  %414 = vst.msk [vmem:[#allocation2 + $0x68] sm:$0xf] %vm387_vm0, %v349_v12  ;;  %v3109_v12 = vld [vmem:[%s3968_s6 + $0x48] sm:$0xf0] }
  0x7a   : > { %415 = vst.msk [vmem:[#allocation2 + $0x6c] sm:$0xf] %vm387_vm0, %v350_v13  ;;  %911 = vmatpush.bf16.msra.mxu1 %v3587_v15  ;;  %v4153_v13 = vor.u32 %v3533_v10, %v3107_v9  ;;  %v3595_v15 = vld [vmem:[%s5127_s2 + $0x38] sm:$0xff]  ;;  %v3155_v10 = vld [vmem:[%s3968_s6 + $0xa0] sm:$0xf] }
  0x7b   : > { %v3578_v18 = vld [vmem:[#allocation2 + $0x30] sm:$0xff]  ;;  %396 = vst.msk [vmem:[#allocation2 + $0x20] sm:$0xf] %vm387_vm0, %v331_v14  ;;  %v4155_v14 = vor.u32 %v3532_v11, %v3109_v12  ;;  %1065 = vmatpush.bf16.msra.mxu2 %v3595_v15  ;;  %v3545_v11 = vld [vmem:[%s3968_s6 + $0xa4] sm:$0xf0] }
  0x7c   : > { %397 = vst.msk [vmem:[#allocation2 + $0x24] sm:$0xf] %vm387_vm0, %v332_v16  ;;  %823 = vmatpush.bf16.msra.mxu0 %v3578_v18  ;;  %v3594_v16 = vld [vmem:[%s5127_s2 + $0x30] sm:$0xff]  ;;  %v3535_v18 = vld [vmem:[%s3968_s6 + $0x54] sm:$0xf0] }
  0x7d   : > { %v3586_v21 = vld [vmem:[#allocation2 + $0x70] sm:$0xff]  ;;  %412 = vst.msk [vmem:[#allocation2 + $0x60] sm:$0xf] %vm387_vm0, %v347_v17  ;;  %v3544_v15 = vld [vmem:[%s3968_s6 + $0xa4] sm:$0xf] }
  0x7e   : > { %413 = vst.msk [vmem:[#allocation2 + $0x64] sm:$0xf] %vm387_vm0, %v348_v19  ;;  %912 = vmatpush.bf16.msra.mxu1 %v3586_v21  ;;  %v3115_v17 = vld [vmem:[%s3968_s6 + $0x50] sm:$0xf]  ;;  %v3534_v19 = vld [vmem:[%s3968_s6 + $0x54] sm:$0xf] }
  0x7f   : > { %v3577_v24 = vld [vmem:[#allocation2 + $0x28] sm:$0xff]  ;;  %394 = vst.msk [vmem:[#allocation2 + $0x18] sm:$0xf] %vm387_vm0, %v329_v20  ;;  %1066 = vmatpush.bf16.msra.mxu2 %v3594_v16  ;;  %v3117_v20 = vld [vmem:[%s3968_s6 + $0x58] sm:$0xf0]  ;;  %v4169_v21 = vor.u32 %v3535_v18, %v3115_v17  ;;  %v4237_v17 = vor.u32 %v3545_v11, %v3155_v10 }
  0x80   : > { %395 = vst.msk [vmem:[#allocation2 + $0x1c] sm:$0xf] %vm387_vm0, %v330_v22  ;;  %824 = vmatpush.bf16.msra.mxu0 %v3577_v24  ;;  %v4171_v22 = vor.u32 %v3534_v19, %v3117_v20  ;;  %v3592_v24 = vld [vmem:[%s5127_s2 + $0x20] sm:$0xff]  ;;  %v3157_v16 = vld [vmem:[%s3968_s6 + $0xa8] sm:$0xf0] }
  0x81   : > { %v3585_v27 = vld [vmem:[#allocation2 + $0x68] sm:$0xff]  ;;  %410 = vst.msk [vmem:[#allocation2 + $0x58] sm:$0xf] %vm387_vm0, %v345_v23  ;;  %v4239_v19 = vor.u32 %v3544_v15, %v3157_v16 }
  0x82   : > { %411 = vst.msk [vmem:[#allocation2 + $0x5c] sm:$0xf] %vm387_vm0, %v346_v25  ;;  %913 = vmatpush.bf16.msra.mxu1 %v3585_v27  ;;  %v3593_v23 = vld [vmem:[%s5127_s2 + $0x28] sm:$0xff]  ;;  %v3591_v25 = vld [vmem:[%s5127_s2 + $0x18] sm:$0xff] }
  0x83   : > { %v3576_v30 = vld [vmem:[#allocation2 + $0x20] sm:$0xff]  ;;  %392 = vst.msk [vmem:[#allocation2 + $0x10] sm:$0xf] %vm387_vm0, %v327_v26  ;;  %1067 = vmatpush.bf16.msra.mxu2 %v3593_v23  ;;  %v3537_v27 = vld [vmem:[%s3968_s6 + $0x64] sm:$0xf0] }
  0x84   : > { %393 = vst.msk [vmem:[#allocation2 + $0x14] sm:$0xf] %vm387_vm0, %v328_v28  ;;  %825 = vmatpush.bf16.msra.mxu0 %v3576_v30  ;;  %v3123_v26 = vld [vmem:[%s3968_s6 + $0x60] sm:$0xf]  ;;  %v3536_v28 = vld [vmem:[%s3968_s6 + $0x64] sm:$0xf] }
  0x85   : > { %v3584_v33 = vld [vmem:[#allocation2 + $0x60] sm:$0xff]  ;;  %408 = vst.msk [vmem:[#allocation2 + $0x50] sm:$0xf] %vm387_vm0, %v343_v29  ;;  %v3125_v29 = vld [vmem:[%s3968_s6 + $0x68] sm:$0xf0]  ;;  %v4188_v30 = vor.u32 %v3537_v27, %v3123_v26 }
  0x86   : > { %409 = vst.msk [vmem:[#allocation2 + $0x54] sm:$0xf] %vm387_vm0, %v344_v31  ;;  %914 = vmatpush.bf16.msra.mxu1 %v3584_v33  ;;  %v4190_v31 = vor.u32 %v3536_v28, %v3125_v29  ;;  %v3589_v33 = vld [vmem:[%s5127_s2 + $0x8] sm:$0xff]  ;;  %v3163_v27 = vld [vmem:[%s3968_s6 + $0xb0] sm:$0xf] }
  0x87   : > { %v3575_v36 = vld [vmem:[#allocation2 + $0x18] sm:$0xff]  ;;  %390 = vst.msk [vmem:[#allocation2 + $0x8] sm:$0xf] %vm387_vm0, %v325_v32  ;;  %1068 = vmatpush.bf16.msra.mxu2 %v3592_v24  ;;  %v3590_v32 = vld [vmem:[%s5127_s2 + $0x10] sm:$0xff] }
  0x88   : > { %391 = vst.msk [vmem:[#allocation2 + $0xc] sm:$0xf] %vm387_vm0, %v326_v34  ;;  %826 = vmatpush.bf16.msra.mxu0 %v3575_v36  ;;  %v3588_v34 = vld [vmem:[%s5127_s2] sm:$0xff]  ;;  %v3539_v36 = vld [vmem:[%s3968_s6 + $0x74] sm:$0xf0] }
  0x89   : > { %v3583_v39 = vld [vmem:[#allocation2 + $0x58] sm:$0xff]  ;;  %406 = vst.msk [vmem:[#allocation2 + $0x48] sm:$0xf] %vm387_vm0, %v341_v35  ;;  %v3131_v35 = vld [vmem:[%s3968_s6 + $0x70] sm:$0xf] }
  0x8a   : > { %407 = vst.msk [vmem:[#allocation2 + $0x4c] sm:$0xf] %vm387_vm0, %v342_v37  ;;  %915 = vmatpush.bf16.msra.mxu1 %v3583_v39  ;;  %v3538_v37 = vld [vmem:[%s3968_s6 + $0x74] sm:$0xf]  ;;  %v4207_v39 = vor.u32 %v3539_v36, %v3131_v35  ;;  %v3547_v28 = vld [vmem:[%s3968_s6 + $0xb4] sm:$0xf0] }
  0x8b   : > { %v3574_v42 = vld [vmem:[#allocation2 + $0x10] sm:$0xff]  ;;  %388 = vst.msk [vmem:[#allocation2] sm:$0xf] %vm387_vm0, %v323_v38  ;;  %1069 = vmatpush.bf16.msra.mxu2 %v3591_v25  ;;  %v3133_v38 = vld [vmem:[%s3968_s6 + $0x78] sm:$0xf0] }
  0x8c   : > { %389 = vst.msk [vmem:[#allocation2 + $0x4] sm:$0xf] %vm387_vm0, %v324_v40  ;;  %827 = vmatpush.bf16.msra.mxu0 %v3574_v42  ;;  %v4209_v40 = vor.u32 %v3538_v37, %v3133_v38  ;;  %v3541_v42 = vld [vmem:[%s3968_s6 + $0x84] sm:$0xf0] }
  0x8d   : > { %v3582_v44 = vld [vmem:[#allocation2 + $0x50] sm:$0xff]  ;;  %404 = vst.msk [vmem:[#allocation2 + $0x40] sm:$0xf] %vm387_vm0, %v339_v41  ;;  %v3139_v41 = vld [vmem:[%s3968_s6 + $0x80] sm:$0xf] }
  0x8e   : > { %405 = vst.msk [vmem:[#allocation2 + $0x44] sm:$0xf] %vm387_vm0, %v340_v43  ;;  %916 = vmatpush.bf16.msra.mxu1 %v3582_v44  ;;  %v3540_v43 = vld [vmem:[%s3968_s6 + $0x84] sm:$0xf]  ;;  %v3141_v44 = vld [vmem:[%s3968_s6 + $0x88] sm:$0xf0] }
  0x8f   : > { %v3573_v45 = vld [vmem:[#allocation2 + $0x8] sm:$0xff]  ;;  %1070 = vmatpush.bf16.msra.mxu2 %v3590_v32  ;;  %5162 = vst [vmem:[#allocation9_spill] sm:$0xff] %v4209_v40  ;;  %v4219_v47 = vor.u32 %v3540_v43, %v3141_v44  ;;  %v3546_v32 = vld [vmem:[%s3968_s6 + $0xb4] sm:$0xf]  ;;  %v3171_v44 = vld [vmem:[%s3968_s6 + $0xc0] sm:$0xf] }
  0x90   : > { %828 = vmatpush.bf16.msra.mxu0 %v3573_v45  ;;  %v4217_v45 = vor.u32 %v3541_v42, %v3139_v41  ;;  %5164 = vst [vmem:[#allocation11_spill] sm:$0xff] %v4229_v0 }
  0x91   : > { %v3581_v46 = vld [vmem:[#allocation2 + $0x48] sm:$0xff]  ;;  %5163 = vst [vmem:[#allocation10_spill] sm:$0xff] %v4219_v47 }
  0x92   : > { %917 = vmatpush.bf16.msra.mxu1 %v3581_v46  ;;  %5165 = vst [vmem:[#allocation12_spill] sm:$0xff] %v4239_v19 }
  0x93   : > { %v3572_v49 = vld [vmem:[#allocation2] sm:$0xff]  ;;  %1071 = vmatpush.bf16.msra.mxu2 %v3589_v33  ;;  %v3165_v33 = vld [vmem:[%s3968_s6 + $0xb8] sm:$0xf0] }
  0x94   : > { %829 = vmatpush.bf16.msra.mxu0 %v3572_v49  ;;  %v4249_v36 = vor.u32 %v3546_v32, %v3165_v33 }
  0x95   : > { %v3580_v53 = vld [vmem:[#allocation2 + $0x40] sm:$0xff] }
  0x96   : > { %918 = vmatpush.bf16.msra.mxu1 %v3580_v53  ;;  %5166 = vst [vmem:[#allocation13_spill] sm:$0xff] %v4249_v36 }
  0x97   : > { %830 = vmatmul.bf16.vlgmr.msra.gmra.mxu0 %v4113_v52  ;;  %1072 = vmatpush.bf16.msra.mxu2 %v3588_v34  ;;  %v4247_v34 = vor.u32 %v3547_v28, %v3163_v27  ;;  %v3552_v27 = vld [vmem:[%s3968_s6 + $0xe4] sm:$0xf]  ;;  %v3189_v28 = vld [vmem:[%s3968_s6 + $0xe8] sm:$0xf0] }
  0x98   : > { %v4279_v33 = vor.u32 %v3552_v27, %v3189_v28  ;;  %v360_v27 = vld [vmem:[%s3983_s9 + $0x94] sm:$0xf] }
  0x99   : > { %919 = vmatmul.bf16.vlgmr.msra.gmra.mxu1 %v4115_v54  ;;  %425 = vst.msk [vmem:[#allocation2 + $0x94] sm:$0xf] %vm387_vm0, %v360_v27 }
  0x9a   : > { %5172 = vst [vmem:[#allocation19_spill] sm:$0xff] %v4279_v33 }
  0xa7   : > { %835 = vmatmul.bf16.gmra.mxu0 %v4123_v59 }
  0xa9   : > { %924 = vmatmul.bf16.gmra.mxu1 %v4125_v60 }
  0xb7   : > { %840 = vmatmul.bf16.gmra.mxu0 %v4133_v1 }
  0xb9   : > { %929 = vmatmul.bf16.gmra.mxu1 %v4135_v2 }
  0xc7   : > { %845 = vmatmul.bf16.gmra.mxu0 %v4143_v7 }
  0xc9   : > { %934 = vmatmul.bf16.gmra.mxu1 %v4145_v8 }
  0xd7   : > { %850 = vmatmul.bf16.gmra.mxu0 %v4153_v13 }
  0xd9   : > { %939 = vmatmul.bf16.gmra.mxu1 %v4155_v14 }
  0xe7   : > { %855 = vmatmul.bf16.gmra.mxu0 %v4169_v21 }
  0xe9   : > { %944 = vmatmul.bf16.gmra.mxu1 %v4171_v22 }
  0xf7   : > { %860 = vmatmul.bf16.gmra.mxu0 %v4188_v30 }
  0xf9   : > { %949 = vmatmul.bf16.gmra.mxu1 %v4190_v31 }
 0x107   : > { %865 = vmatmul.bf16.gmra.mxu0 %v4207_v39 }
 0x109   : > { %954 = vmatmul.bf16.gmra.mxu1 %v4209_v40 }
 0x114   : > { %v831_v46 = vpop.f32.mrf.mxu0 }
 0x116   : > { %v920_v48 = vpop.f32.mrf.mxu1 }
 0x117   : > { %870 = vmatmul.bf16.gmra.mxu0 %v4217_v45  ;;  %v921_v51 = vadd.f32 %v920_v48, %v831_v46  ;;  %v3549_v46 = vld [vmem:[%s3968_s6 + $0xc4] sm:$0xf0] }
 0x119   : > { %959 = vmatmul.bf16.gmra.mxu1 %v4219_v47  ;;  %v375_v47 = vld [vmem:[%s3983_s9 + $0xd0] sm:$0xf] }
 0x11a   : > { %440 = vst.msk [vmem:[#allocation2 + $0xd0] sm:$0xf] %vm387_vm0, %v375_v47 }
 0x11c   : > { %v833_v49 = vpop.f32.mrf.mxu0 }
 0x11e   : > { %v922_v50 = vpop.f32.mrf.mxu1 }
 0x11f   : > { %v923_v53 = vadd.f32 %v922_v50, %v833_v49  ;;  %v3548_v49 = vld [vmem:[%s3968_s6 + $0xc4] sm:$0xf]  ;;  %v3173_v50 = vld [vmem:[%s3968_s6 + $0xc8] sm:$0xf0] }
 0x120   : > { %v4259_v55 = vor.u32 %v3548_v49, %v3173_v50  ;;  %v3554_v50 = vld [vmem:[%s3968_s6 + $0xf4] sm:$0xf] }
 0x121   : > { %v1000_v57 = vpack.c.bf16 %v923_v53, %v921_v51  ;;  %v4257_v51 = vor.u32 %v3549_v46, %v3171_v44  ;;  %v3555_v44 = vld [vmem:[%s3968_s6 + $0xf4] sm:$0xf0]  ;;  %v355_v46 = vld [vmem:[%s3983_s9 + $0x80] sm:$0xf] }
 0x122   : > { %5168 = vst [vmem:[#allocation15_spill] sm:$0xff] %v4259_v55 }
 0x123   : > { %1073 = vmatmul.bf16.vlgmr.msra.gmra.mxu2 %v1000_v57  ;;  %5167 = vst [vmem:[#allocation14_spill] sm:$0xff] %v4257_v51 }
 0x124   : > { %v836_v63 = vpop.f32.mrf.mxu0  ;;  %420 = vst.msk [vmem:[#allocation2 + $0x80] sm:$0xf] %vm387_vm0, %v355_v46 }
 0x126   : > { %v925_v3 = vpop.f32.mrf.mxu1 }
 0x127   : > { %875 = vmatmul.bf16.gmra.mxu0 %v4227_v62  ;;  %v926_v6 = vadd.f32 %v925_v3, %v836_v63  ;;  %v3179_v3 = vld [vmem:[%s3968_s6 + $0xd0] sm:$0xf] }
 0x129   : > { %964 = vmatmul.bf16.gmra.mxu1 %v4229_v0 }
 0x12c   : > { %v838_v4 = vpop.f32.mrf.mxu0 }
 0x12e   : > { %v927_v5 = vpop.f32.mrf.mxu1 }
 0x12f   : > { %v928_v9 = vadd.f32 %v927_v5, %v838_v4  ;;  %v3551_v4 = vld [vmem:[%s3968_s6 + $0xd4] sm:$0xf0] }
 0x130   : > { %v4267_v10 = vor.u32 %v3551_v4, %v3179_v3 }
 0x131   : > { %v1001_v12 = vpack.c.bf16 %v928_v9, %v926_v6  ;;  %v3550_v6 = vld [vmem:[%s3968_s6 + $0xd4] sm:$0xf]  ;;  %v3181_v9 = vld [vmem:[%s3968_s6 + $0xd8] sm:$0xf0] }
 0x132   : > { %5169 = vst [vmem:[#allocation16_spill] sm:$0xff] %v4267_v10 }
 0x133   : > { %1078 = vmatmul.bf16.gmra.mxu2 %v1001_v12  ;;  %v4269_v12 = vor.u32 %v3550_v6, %v3181_v9  ;;  %v357_v6 = vld [vmem:[%s3983_s9 + $0x88] sm:$0xf]  ;;  %v358_v9 = vld [vmem:[%s3983_s9 + $0x8c] sm:$0xf] }
 0x134   : > { %v841_v18 = vpop.f32.mrf.mxu0  ;;  %422 = vst.msk [vmem:[#allocation2 + $0x88] sm:$0xf] %vm387_vm0, %v357_v6 }
 0x135   : > { %5170 = vst [vmem:[#allocation17_spill] sm:$0xff] %v4269_v12 }
 0x136   : > { %v930_v20 = vpop.f32.mrf.mxu1  ;;  %423 = vst.msk [vmem:[#allocation2 + $0x8c] sm:$0xf] %vm387_vm0, %v358_v9 }
 0x137   : > { %880 = vmatmul.bf16.gmra.mxu0 %v4237_v17  ;;  %v931_v25 = vadd.f32 %v930_v20, %v841_v18 }
 0x139   : > { %969 = vmatmul.bf16.gmra.mxu1 %v4239_v19 }
 0x13c   : > { %v843_v23 = vpop.f32.mrf.mxu0 }
 0x13e   : > { %v932_v24 = vpop.f32.mrf.mxu1 }
 0x13f   : > { %v933_v26 = vadd.f32 %v932_v24, %v843_v23  ;;  %v3187_v24 = vld [vmem:[%s3968_s6 + $0xe0] sm:$0xf] }
 0x141   : > { %v1002_v29 = vpack.c.bf16 %v933_v26, %v931_v25  ;;  %v3553_v25 = vld [vmem:[%s3968_s6 + $0xe4] sm:$0xf0] }
 0x143   : > { %1083 = vmatmul.bf16.gmra.mxu2 %v1002_v29  ;;  %v4277_v29 = vor.u32 %v3553_v25, %v3187_v24  ;;  %v564_v25 = vld [vmem:[%s5127_s2 + $0x80] sm:$0x1] }
 0x144   : > { %v846_v35 = vpop.f32.mrf.mxu0 }
 0x145   : > { %5171 = vst [vmem:[#allocation18_spill] sm:$0xff] %v4277_v29 }
 0x146   : > { %v935_v37 = vpop.f32.mrf.mxu1 }
 0x147   : > { %885 = vmatmul.bf16.gmra.mxu0 %v4247_v34  ;;  %v936_v42 = vadd.f32 %v935_v37, %v846_v35 }
 0x149   : > { %974 = vmatmul.bf16.gmra.mxu1 %v4249_v36 }
 0x14c   : > { %v848_v38 = vpop.f32.mrf.mxu0 }
 0x14e   : > { %v937_v41 = vpop.f32.mrf.mxu1 }
 0x14f   : > { %v938_v43 = vadd.f32 %v937_v41, %v848_v38 }
 0x151   : > { %v1003_v48 = vpack.c.bf16 %v938_v43, %v936_v42  ;;  %v3195_v43 = vld [vmem:[%s3968_s6 + $0xf0] sm:$0xf] }
 0x153   : > { %1088 = vmatmul.bf16.gmra.mxu2 %v1003_v48  ;;  %v356_v48 = vld [vmem:[%s3983_s9 + $0x84] sm:$0xf] }
 0x154   : > { %v851_v53 = vpop.f32.mrf.mxu0  ;;  %421 = vst.msk [vmem:[#allocation2 + $0x84] sm:$0xf] %vm387_vm0, %v356_v48 }
 0x156   : > { %v940_v56 = vpop.f32.mrf.mxu1 }
 0x157   : > { %890 = vmatmul.bf16.gmra.mxu0 %v4257_v51  ;;  %v941_v61 = vadd.f32 %v940_v56, %v851_v53  ;;  %v3197_v53 = vld [vmem:[%s3968_s6 + $0xf8] sm:$0xf0]  ;;  %v4291_v56 = vor.u32 %v3555_v44, %v3195_v43 }
 0x159   : > { %979 = vmatmul.bf16.gmra.mxu1 %v4259_v55 }
 0x15c   : > { %v853_v57 = vpop.f32.mrf.mxu0 }
 0x15e   : > { %v942_v58 = vpop.f32.mrf.mxu1 }
 0x15f   : > { %v943_v63 = vadd.f32 %v942_v58, %v853_v57  ;;  %v4293_v58 = vor.u32 %v3554_v50, %v3197_v53 }
 0x161   : > { %v1004_v5 = vpack.c.bf16 %v943_v63, %v941_v61  ;;  %5173 = vst [vmem:[#allocation20_spill] sm:$0xff] %v4293_v58 }
 0x163   : > { %1093 = vmatmul.bf16.gmra.mxu2 %v1004_v5 }
 0x164   : > { %v856_v11 = vpop.f32.mrf.mxu0 }
 0x166   : > { %v945_v15 = vpop.f32.mrf.mxu1 }
 0x167   : > { %895 = vmatmul.bf16.gmra.mxu0 %v4267_v10  ;;  %v946_v20 = vadd.f32 %v945_v15, %v856_v11 }
 0x169   : > { %984 = vmatmul.bf16.gmra.mxu1 %v4269_v12 }
 0x16c   : > { %v858_v16 = vpop.f32.mrf.mxu0 }
 0x16e   : > { %v947_v18 = vpop.f32.mrf.mxu1 }
 0x16f   : > { %v948_v23 = vadd.f32 %v947_v18, %v858_v16 }
 0x171   : > { %v1005_v26 = vpack.c.bf16 %v948_v23, %v946_v20 }
 0x173   : > { %1098 = vmatmul.bf16.gmra.mxu2 %v1005_v26  ;;  %v359_v26 = vld [vmem:[%s3983_s9 + $0x90] sm:$0xf] }
 0x174   : > { %v861_v32 = vpop.f32.mrf.mxu0  ;;  %424 = vst.msk [vmem:[#allocation2 + $0x90] sm:$0xf] %vm387_vm0, %v359_v26 }
 0x176   : > { %v950_v35 = vpop.f32.mrf.mxu1 }
 0x177   : > { %900 = vmatmul.bf16.gmra.mxu0 %v4277_v29  ;;  %v951_v41 = vadd.f32 %v950_v35, %v861_v32  ;;  %v565_v32 = vunpack.c.l.bf16 %v564_v25 }
 0x179   : > { %989 = vmatmul.bf16.gmra.mxu1 %v4279_v33 }
 0x17c   : > { %v863_v37 = vpop.f32.mrf.mxu0 }
 0x17e   : > { %v952_v38 = vpop.f32.mrf.mxu1 }
 0x17f   : > { %v953_v42 = vadd.f32 %v952_v38, %v863_v37 }
 0x181   : > { %v1006_v49 = vpack.c.bf16 %v953_v42, %v951_v41  ;;  %v4308_v41 = vperm.slane %v565_v32, 0  ;;  %v3700_v42 = vld [vmem:[#allocation2 + $0x80] sm:$0xff]  }
 0x182   : > { %v3638_v48 = vunpack.c.l.bf16 %v3700_v42 }
 0x183   : > { %1103 = vmatmul.bf16.gmra.mxu2 %v1006_v49 }
 0x184   : > { %v866_v57 = vpop.f32.mrf.mxu0 }
 0x186   : > { %v955_v61 = vpop.f32.mrf.mxu1 }
 0x187   : > { %905 = vmatmul.bf16.gmra.mxu0 %v4291_v56  ;;  %v956_v4 = vadd.f32 %v955_v61, %v866_v57 }
 0x189   : > { %994 = vmatmul.bf16.gmra.mxu1 %v4293_v58 }
 0x18c   : > { %v868_v63 = vpop.f32.mrf.mxu0 }
 0x18e   : > { %v957_v3 = vpop.f32.mrf.mxu1 }
 0x18f   : > { %v958_v5 = vadd.f32 %v957_v3, %v868_v63  ;;  %v3639_v63 = vunpack.c.h.bf16 %v3700_v42  ;;  %v361_v3 = vld [vmem:[%s3983_s9 + $0x98] sm:$0xf] }
 0x190   : > { %426 = vst.msk [vmem:[#allocation2 + $0x98] sm:$0xf] %vm387_vm0, %v361_v3 }
 0x191   : > { %v1007_v11 = vpack.c.bf16 %v958_v5, %v956_v4  ;;  %v362_v4 = vld [vmem:[%s3983_s9 + $0x9c] sm:$0xf] }
 0x192   : > { %427 = vst.msk [vmem:[#allocation2 + $0x9c] sm:$0xf] %vm387_vm0, %v362_v4 }
 0x193   : > { %1108 = vmatmul.bf16.gmra.mxu2 %v1007_v11 }
 0x194   : > { %v871_v15 = vpop.f32.mrf.mxu0 }
 0x196   : > { %v960_v16 = vpop.f32.mrf.mxu1 }
 0x197   : > { %v961_v20 = vadd.f32 %v960_v16, %v871_v15 }
 0x19c   : > { %v873_v18 = vpop.f32.mrf.mxu0 }
 0x19e   : > { %v962_v23 = vpop.f32.mrf.mxu1 }
 0x19f   : > { %v963_v24 = vadd.f32 %v962_v23, %v873_v18 }
 0x1a1   : > { %v1008_v28 = vpack.c.bf16 %v963_v24, %v961_v20  ;;  %v3701_v24 = vld [vmem:[#allocation2 + $0x88] sm:$0xff]  }
 0x1a3   : > { %1113 = vmatmul.bf16.gmra.mxu2 %v1008_v28  ;;  %v3642_v28 = vunpack.c.l.bf16 %v3701_v24 }
 0x1a4   : > { %v876_v35 = vpop.f32.mrf.mxu0 }
 0x1a6   : > { %v965_v37 = vpop.f32.mrf.mxu1  ;;  %v1074_v38 = vpop.f32.mrf.mxu2 }
 0x1a7   : > { %v1075_v43 = vadd.f32 %v1074_v38, %v4308_v41  ;;  %v966_v46 = vadd.f32 %v965_v37, %v876_v35 }
 0x1a9   : > { %v1154_v53 = vmax.f32 %v1075_v43, 0.0  ;;  %v3643_v43 = vunpack.c.h.bf16 %v3701_v24 }
 0x1ab   : > { %v4316_v9 = vadd.f32 %v3638_v48, %v1154_v53 }
 0x1ac   : > { %v878_v44 = vpop.f32.mrf.mxu0 }
 0x1ae   : > { %v967_v49 = vpop.f32.mrf.mxu1  ;;  %v1076_v50 = vpop.f32.mrf.mxu2 }
 0x1af   : > { %v968_v57 = vadd.f32 %v967_v49, %v878_v44  ;;  %v1077_v61 = vadd.f32 %v1076_v50, %v4308_v41  ;;  %v363_v44 = vld [vmem:[%s3983_s9 + $0xa0] sm:$0xf] }
 0x1b0   : > { %428 = vst.msk [vmem:[#allocation2 + $0xa0] sm:$0xf] %vm387_vm0, %v363_v44 }
 0x1b1   : > { %v1155_v5 = vmax.f32 %v1077_v61, 0.0  ;;  %v1009_v6 = vpack.c.bf16 %v968_v57, %v966_v46  ;;  %v364_v46 = vld [vmem:[%s3983_s9 + $0xa4] sm:$0xf] }
 0x1b2   : > { %429 = vst.msk [vmem:[#allocation2 + $0xa4] sm:$0xf] %vm387_vm0, %v364_v46 }
 0x1b3   : > { %1118 = vmatmul.bf16.gmra.mxu2 %v1009_v6  ;;  %v4318_v11 = vpack.c.bf16 %v1155_v5, %v1154_v53  ;;  %v4320_v15 = vadd.f32 %v3639_v63, %v1155_v5  ;;  %v3702_v5 = vld [vmem:[#allocation2 + $0x90] sm:$0xff]  }
 0x1b4   : > { %v881_v16 = vpop.f32.mrf.mxu0 }
 0x1b6   : > { %v970_v20 = vpop.f32.mrf.mxu1  ;;  %v1079_v23 = vpop.f32.mrf.mxu2 }
 0x1b7   : > { %v1080_v25 = vadd.f32 %v1079_v23, %v4308_v41  ;;  %v971_v27 = vadd.f32 %v970_v20, %v881_v16  ;;  %v3646_v23 = vunpack.c.l.bf16 %v3702_v5 }
 0x1b9   : > { %v1156_v37 = vmax.f32 %v1080_v25, 0.0 }
 0x1bb   : > { %v4330_v50 = vadd.f32 %v3642_v28, %v1156_v37 }
 0x1bc   : > { %v883_v26 = vpop.f32.mrf.mxu0 }
 0x1be   : > { %v972_v32 = vpop.f32.mrf.mxu1  ;;  %v1081_v35 = vpop.f32.mrf.mxu2 }
 0x1bf   : > { %v973_v38 = vadd.f32 %v972_v32, %v883_v26  ;;  %v1082_v42 = vadd.f32 %v1081_v35, %v4308_v41  ;;  %v3647_v32 = vunpack.c.h.bf16 %v3702_v5  ;;  %v365_v35 = vld [vmem:[%s3983_s9 + $0xa8] sm:$0xf] }
 0x1c0   : > { %430 = vst.msk [vmem:[#allocation2 + $0xa8] sm:$0xf] %vm387_vm0, %v365_v35  ;;  %v368_v35 = vld [vmem:[%s3983_s9 + $0xb4] sm:$0xf] }
 0x1c1   : > { %v1157_v48 = vmax.f32 %v1082_v42, 0.0  ;;  %v1010_v49 = vpack.c.bf16 %v973_v38, %v971_v27  ;;  %433 = vst.msk [vmem:[#allocation2 + $0xb4] sm:$0xf] %vm387_vm0, %v368_v35 }
 0x1c3   : > { %1123 = vmatmul.bf16.gmra.mxu2 %v1010_v49  ;;  %v4332_v53 = vpack.c.bf16 %v1157_v48, %v1156_v37  ;;  %v4334_v57 = vadd.f32 %v3643_v43, %v1157_v48  ;;  %v366_v37 = vld [vmem:[%s3983_s9 + $0xac] sm:$0xf] }
 0x1c4   : > { %v886_v61 = vpop.f32.mrf.mxu0  ;;  %431 = vst.msk [vmem:[#allocation2 + $0xac] sm:$0xf] %vm387_vm0, %v366_v37 }
 0x1c6   : > { %v975_v3 = vpop.f32.mrf.mxu1  ;;  %v1084_v4 = vpop.f32.mrf.mxu2 }
 0x1c7   : > { %v1085_v6 = vadd.f32 %v1084_v4, %v4308_v41  ;;  %v976_v20 = vadd.f32 %v975_v3, %v886_v61  ;;  %v3703_v4 = vld [vmem:[#allocation2 + $0x98] sm:$0xff]  }
 0x1c9   : > { %v1158_v26 = vmax.f32 %v1085_v6, 0.0 }
 0x1cb   : > { %v4344_v43 = vadd.f32 %v3646_v23, %v1158_v26 }
 0x1cc   : > { %v888_v16 = vpop.f32.mrf.mxu0 }
 0x1ce   : > { %v977_v24 = vpop.f32.mrf.mxu1  ;;  %v1086_v25 = vpop.f32.mrf.mxu2 }
 0x1cf   : > { %v978_v27 = vadd.f32 %v977_v24, %v888_v16  ;;  %v1087_v28 = vadd.f32 %v1086_v25, %v4308_v41 }
 0x1d1   : > { %v1159_v38 = vmax.f32 %v1087_v28, 0.0  ;;  %v1011_v42 = vpack.c.bf16 %v978_v27, %v976_v20  ;;  %v3650_v20 = vunpack.c.l.bf16 %v3703_v4  ;;  %v3651_v28 = vunpack.c.h.bf16 %v3703_v4 }
 0x1d3   : > { %1128 = vmatmul.bf16.gmra.mxu2 %v1011_v42  ;;  %v4346_v44 = vpack.c.bf16 %v1159_v38, %v1158_v26  ;;  %v4348_v46 = vadd.f32 %v3647_v32, %v1159_v38  ;;  %v367_v32 = vld [vmem:[%s3983_s9 + $0xb0] sm:$0xf] }
 0x1d4   : > { %v891_v48 = vpop.f32.mrf.mxu0  ;;  %432 = vst.msk [vmem:[#allocation2 + $0xb0] sm:$0xf] %vm387_vm0, %v367_v32  ;;  %v369_v32 = vld [vmem:[%s3983_s9 + $0xb8] sm:$0xf] }
 0x1d5   : > { %434 = vst.msk [vmem:[#allocation2 + $0xb8] sm:$0xf] %vm387_vm0, %v369_v32 }
 0x1d6   : > { %v980_v61 = vpop.f32.mrf.mxu1  ;;  %v1089_v3 = vpop.f32.mrf.mxu2 }
 0x1d7   : > { %v1090_v5 = vadd.f32 %v1089_v3, %v4308_v41  ;;  %v981_v16 = vadd.f32 %v980_v61, %v891_v48 }
 0x1d9   : > { %v1160_v25 = vmax.f32 %v1090_v5, 0.0 }
 0x1db   : > { %v4358_v42 = vadd.f32 %v3650_v20, %v1160_v25  ;;  %v370_v20 = vld [vmem:[%s3983_s9 + $0xbc] sm:$0xf] }
 0x1dc   : > { %v893_v6 = vpop.f32.mrf.mxu0  ;;  %435 = vst.msk [vmem:[#allocation2 + $0xbc] sm:$0xf] %vm387_vm0, %v370_v20 }
 0x1de   : > { %v982_v23 = vpop.f32.mrf.mxu1  ;;  %v1091_v24 = vpop.f32.mrf.mxu2 }
 0x1df   : > { %v983_v26 = vadd.f32 %v982_v23, %v893_v6  ;;  %v1092_v27 = vadd.f32 %v1091_v24, %v4308_v41 }
 0x1e1   : > { %v1012_v37 = vpack.c.bf16 %v983_v26, %v981_v16  ;;  %v1161_v38 = vmax.f32 %v1092_v27, 0.0 }
 0x1e3   : > { %1133 = vmatmul.bf16.gmra.mxu2 %v1012_v37  ;;  %v4360_v48 = vpack.c.bf16 %v1161_v38, %v1160_v25  ;;  %v4362_v61 = vadd.f32 %v3651_v28, %v1161_v38 }
 0x1e4   : > { %v896_v3 = vpop.f32.mrf.mxu0 }
 0x1e6   : > { %v985_v5 = vpop.f32.mrf.mxu1  ;;  %v4366_v6 = vpop.f32.mrf.mxu2 }
 0x1e7   : > { %v986_v23 = vadd.f32 %v985_v5, %v896_v3 }
 0x1ec   : > { %v898_v16 = vpop.f32.mrf.mxu0 }
 0x1ee   : > { %v987_v24 = vpop.f32.mrf.mxu1  ;;  %v1096_v26 = vpop.f32.mrf.mxu2 }
 0x1ef   : > { %v988_v27 = vadd.f32 %v987_v24, %v898_v16  ;;  %v372_v24 = vld [vmem:[%s3983_s9 + $0xc4] sm:$0xf] }
 0x1f0   : > { %437 = vst.msk [vmem:[#allocation2 + $0xc4] sm:$0xf] %vm387_vm0, %v372_v24 }
 0x1f1   : > { %v1013_v35 = vpack.c.bf16 %v988_v27, %v986_v23  ;;  %v371_v23 = vld [vmem:[%s3983_s9 + $0xc0] sm:$0xf] }
 0x1f2   : > { %436 = vst.msk [vmem:[#allocation2 + $0xc0] sm:$0xf] %vm387_vm0, %v371_v23 }
 0x1f3   : > { %1138 = vmatmul.bf16.gmra.mxu2 %v1013_v35 }
 0x1f4   : > { %v901_v25 = vpop.f32.mrf.mxu0 }
 0x1f6   : > { %v990_v28 = vpop.f32.mrf.mxu1  ;;  %v1099_v37 = vpop.f32.mrf.mxu2 }
 0x1f7   : > { %v991_v18 = vadd.f32 %v990_v28, %v901_v25 }
 0x1fc   : > { %v903_v38 = vpop.f32.mrf.mxu0 }
 0x1fe   : > { %v992_v63 = vpop.f32.mrf.mxu1  ;;  %v1101_v3 = vpop.f32.mrf.mxu2 }
 0x1ff   : > { %v993_v5 = vadd.f32 %v992_v63, %v903_v38  ;;  %v374_v63 = vld [vmem:[%s3983_s9 + $0xcc] sm:$0xf] }
 0x200   : > { %439 = vst.msk [vmem:[#allocation2 + $0xcc] sm:$0xf] %vm387_vm0, %v374_v63 }
 0x201   : > { %v1014_v49 = vpack.c.bf16 %v993_v5, %v991_v18  ;;  %v373_v18 = vld [vmem:[%s3983_s9 + $0xc8] sm:$0xf]  ;;  %v3707_v5 = vld [vmem:[#allocation2 + $0xb8] sm:$0xff]  }
 0x202   : > { %438 = vst.msk [vmem:[#allocation2 + $0xc8] sm:$0xf] %vm387_vm0, %v373_v18  ;;  %v3666_v33 = vunpack.c.l.bf16 %v3707_v5 }
 0x203   : > { %1143 = vmatmul.bf16.gmra.mxu2 %v1014_v49 }
 0x204   : > { %v906_v16 = vpop.f32.mrf.mxu0 }
 0x206   : > { %v995_v27 = vpop.f32.mrf.mxu1  ;;  %v1104_v32 = vpop.f32.mrf.mxu2 }
 0x207   : > { %v996_v35 = vadd.f32 %v995_v27, %v906_v16  ;;  %v3706_v16 = vld [vmem:[#allocation2 + $0xb0] sm:$0xff]  }
 0x208   : > { %v3663_v63 = vunpack.c.h.bf16 %v3706_v16  ;;  %v3662_v12 = vunpack.c.l.bf16 %v3706_v16 }
 0x20c   : > { %v908_v20 = vpop.f32.mrf.mxu0 }
 0x20e   : > { %v997_v4 = vpop.f32.mrf.mxu1  ;;  %v1106_v25 = vpop.f32.mrf.mxu2 }
 0x20f   : > { %v998_v28 = vadd.f32 %v997_v4, %v908_v20  ;;  %v1107_v23 = vadd.f32 %v1106_v25, %v4308_v41  ;;  %v1105_v4 = vadd.f32 %v1104_v32, %v4308_v41  ;;  %v3667_v20 = vunpack.c.h.bf16 %v3707_v5  ;;  %v3705_v25 = vld [vmem:[#allocation2 + $0xa8] sm:$0xff]   ;;  %v376_v32 = vld [vmem:[%s3983_s9 + $0xd4] sm:$0xf] }
 0x210   : > { %v3659_v40 = vunpack.c.h.bf16 %v3705_v25  ;;  %441 = vst.msk [vmem:[#allocation2 + $0xd4] sm:$0xf] %vm387_vm0, %v376_v32 }
 0x211   : > { %v1015_v58 = vpack.c.bf16 %v998_v28, %v996_v35  ;;  %v1102_v35 = vadd.f32 %v1101_v3, %v4308_v41  ;;  %v1167_v28 = vmax.f32 %v1107_v23, 0.0  ;;  %v1166_v55 = vmax.f32 %v1105_v4, 0.0 }
 0x213   : > { %1148 = vmatmul.bf16.gmra.mxu2 %v1015_v58  ;;  %v1165_v5 = vmax.f32 %v1102_v35, 0.0  ;;  %v1199_v23 = vadd.f32 %v3663_v63, %v1167_v28  ;;  %v1198_v4 = vadd.f32 %v3662_v12, %v1166_v55 }
 0x216   : > { %v1109_v49 = vpop.f32.mrf.mxu2 }
 0x217   : > { %v1110_v38 = vadd.f32 %v1109_v49, %v4308_v41  ;;  %v1100_v49 = vadd.f32 %v1099_v37, %v4308_v41  ;;  %v3658_v37 = vunpack.c.l.bf16 %v3705_v25  ;;  %v378_v25 = vld [vmem:[%s3983_s9 + $0xdc] sm:$0xf] }
 0x218   : > { %443 = vst.msk [vmem:[#allocation2 + $0xdc] sm:$0xf] %vm387_vm0, %v378_v25 }
 0x219   : > { %v1168_v58 = vmax.f32 %v1110_v38, 0.0  ;;  %v1097_v38 = vadd.f32 %v1096_v26, %v4308_v41  ;;  %v1164_v16 = vmax.f32 %v1100_v49, 0.0  ;;  %v1242_v26 = vpack.c.bf16 %v1199_v23, %v1198_v4 }
 0x21b   : > { %v1200_v19 = vadd.f32 %v3666_v33, %v1168_v58  ;;  %v1095_v33 = vadd.f32 %v4366_v6, %v4308_v41  ;;  %v1163_v47 = vmax.f32 %v1097_v38, 0.0  ;;  %v1196_v35 = vadd.f32 %v3658_v37, %v1164_v16 }
 0x21c   : > { %v5174_v38 = vpack.c.bf16 %v4362_v61, %v4358_v42  ;;  %v379_v42 = vld [vmem:[%s3983_s9 + $0xe0] sm:$0xf]  ;;  %v380_v61 = vld [vmem:[%s3983_s9 + $0xe4] sm:$0xf] }
 0x21d   : > { %444 = vst.msk [vmem:[#allocation2 + $0xe0] sm:$0xf] %vm387_vm0, %v379_v42 }
 0x21e   : > { %v1111_v24 = vpop.f32.mrf.mxu2  ;;  %445 = vst.msk [vmem:[#allocation2 + $0xe4] sm:$0xf] %vm387_vm0, %v380_v61 }
 0x21f   : > { %v1112_v27 = vadd.f32 %v1111_v24, %v4308_v41 }
 0x221   : > { %v1169_v18 = vmax.f32 %v1112_v27, 0.0  ;;  %v3704_v27 = vld [vmem:[#allocation2 + $0xa0] sm:$0xff]  }
 0x223   : > { %v1641_v36 = vpack.c.bf16 %v1169_v18, %v1168_v58  ;;  %v1201_v0 = vadd.f32 %v3667_v20, %v1169_v18  ;;  %v1640_v58 = vpack.c.bf16 %v1167_v28, %v1166_v55  ;;  %v1197_v20 = vadd.f32 %v3659_v40, %v1165_v5  ;;  %v377_v40 = vld [vmem:[%s3983_s9 + $0xd8] sm:$0xf] }
 0x224   : > { %v1639_v18 = vpack.c.bf16 %v1165_v5, %v1164_v16  ;;  %442 = vst.msk [vmem:[#allocation2 + $0xd8] sm:$0xf] %vm387_vm0, %v377_v40  ;;  %v5175_v5 = vpack.c.bf16 %v4348_v46, %v4344_v43  ;;  %v5177_v43 = vpack.c.bf16 %v4320_v15, %v4316_v9  ;;  %v384_v46 = vld [vmem:[%s3983_s9 + $0xf4] sm:$0xf]  ;;  %v386_v16 = vld [vmem:[%s3983_s9 + $0xfc] sm:$0xf] }
 0x225   : > { %1650 = vmatpush.bf16.msrb.mxu2 %v1641_v36  ;;  %v1243_v3 = vpack.c.bf16 %v1201_v0, %v1200_v19  ;;  %v3655_v0 = vunpack.c.h.bf16 %v3704_v27  ;;  %v3654_v19 = vunpack.c.l.bf16 %v3704_v27  ;;  %v1162_v36 = vmax.f32 %v1095_v33, 0.0  ;;  %449 = vst.msk [vmem:[#allocation2 + $0xf4] sm:$0xf] %vm387_vm0, %v384_v46  ;;  %v385_v33 = vld [vmem:[%s3983_s9 + $0xf8] sm:$0xf]  ;;  %v3712_v46 = vld [vmem:[#allocation2 + $0xe0] sm:$0xff]  }
 0x226   : > { %v4391_v24 = vpop.f32.mrf.mxu2  ;;  %v1241_v63 = vpack.c.bf16 %v1197_v20, %v1196_v35  ;;  %450 = vst.msk [vmem:[#allocation2 + $0xf8] sm:$0xf] %vm387_vm0, %v385_v33 }
 0x227   : > { %1252 = vmatpush.bf16.msra.mxu3 %v1243_v3  ;;  %v1195_v6 = vadd.f32 %v3655_v0, %v1163_v47  ;;  %v1194_v12 = vadd.f32 %v3654_v19, %v1162_v36  ;;  %v1638_v55 = vpack.c.bf16 %v1163_v47, %v1162_v36  ;;  %451 = vst.msk [vmem:[#allocation2 + $0xfc] sm:$0xf] %vm387_vm0, %v386_v16 }
 0x229   : > { %1651 = vmatpush.bf16.msrb.mxu2 %v1640_v58  ;;  %v1240_v28 = vpack.c.bf16 %v1195_v6, %v1194_v12 }
 0x22b   : > { %1253 = vmatpush.bf16.msra.mxu3 %v1242_v26 }
 0x22d   : > { %1652 = vmatpush.bf16.msrb.mxu2 %v1639_v18 }
 0x22e   : > { %v4395_v49 = vpop.f32.mrf.mxu2  ;;  %v3715_v0 = vld [vmem:[#allocation2 + $0xf8] sm:$0xff]  }
 0x22f   : > { %1254 = vmatpush.bf16.msra.mxu3 %v1241_v63  ;;  %v3698_v18 = vunpack.c.l.bf16 %v3715_v0 }
 0x231   : > { %1653 = vmatpush.bf16.msrb.mxu2 %v1638_v55  ;;  %v3699_v55 = vunpack.c.h.bf16 %v3715_v0  ;;  %v3686_v0 = vunpack.c.l.bf16 %v3712_v46 }
 0x233   : > { %1255 = vmatpush.bf16.msra.mxu3 %v1240_v28 }
 0x235   : > { %1654 = vmatpush.bf16.msrb.mxu2 %v4360_v48  ;;  %v5176_v48 = vpack.c.bf16 %v4334_v57, %v4330_v50  ;;  %v382_v57 = vld [vmem:[%s3983_s9 + $0xec] sm:$0xf] }
 0x236   : > { %v4402_v32 = vpop.f32.mrf.mxu2  ;;  %447 = vst.msk [vmem:[#allocation2 + $0xec] sm:$0xf] %vm387_vm0, %v382_v57 }
 0x237   : > { %1256 = vmatpush.bf16.msra.mxu3 %v5174_v38 }
 0x239   : > { %1655 = vmatpush.bf16.msrb.mxu2 %v4346_v44  ;;  %v383_v44 = vld [vmem:[%s3983_s9 + $0xf0] sm:$0xf] }
 0x23a   : > { %448 = vst.msk [vmem:[#allocation2 + $0xf0] sm:$0xf] %vm387_vm0, %v383_v44 }
 0x23b   : > { %1257 = vmatpush.bf16.msra.mxu3 %v5175_v5 }
 0x23d   : > { %1656 = vmatpush.bf16.msrb.mxu2 %v4332_v53 }
 0x23e   : > { %v4412_v3 = vpop.f32.mrf.mxu2 }
 0x23f   : > { %1258 = vmatpush.bf16.msra.mxu3 %v5176_v48 }
 0x241   : > { %1657 = vmatpush.bf16.msrb.mxu2 %v4318_v11  ;;  %v381_v11 = vld [vmem:[%s3983_s9 + $0xe8] sm:$0xf]  ;;  %v3714_v19 = vld [vmem:[#allocation2 + $0xf0] sm:$0xff]   ;;  %s2986_s9 = sshll.u32 %s204_s11, 4  ;;  %s2987_s9 = int_to_ptr.vmem [resolvable:$true] %s2986_s9 }
 0x242   : > { %446 = vst.msk [vmem:[#allocation2 + $0xe8] sm:$0xf] %vm387_vm0, %v381_v11  ;;  %v3694_v38 = vunpack.c.l.bf16 %v3714_v19  ;;  %v3695_v5 = vunpack.c.h.bf16 %v3714_v19 }
 0x243   : > { %1259 = vmatpush.bf16.msra.mxu3 %v5177_v43 }
 0x244   : > { %1658 = vmatmul.bf16.vlgmr.msrb.gmra.mxu2 %v4113_v52 }
 0x246   : > { %v4426_v53 = vpop.f32.mrf.mxu2  ;;  %1260 = vmatmul.bf16.vlgmr.msra.gmra.mxu3 %v4113_v52 }
 0x249   : > { %v3713_v28 = vld [vmem:[#allocation2 + $0xe8] sm:$0xff]  }
 0x24a   : > { %v3690_v11 = vunpack.c.l.bf16 %v3713_v28 }
 0x24e   : > { %v4429_v50 = vpop.f32.mrf.mxu2 }
 0x254   : > { %1663 = vmatmul.bf16.gmra.mxu2 %v4123_v59 }
 0x256   : > { %v4436_v9 = vpop.f32.mrf.mxu2  ;;  %1265 = vmatmul.bf16.gmra.mxu3 %v4123_v59 }
 0x25e   : > { %v4439_v15 = vpop.f32.mrf.mxu2 }
 0x264   : > { %1668 = vmatmul.bf16.gmra.mxu2 %v4133_v1 }
 0x266   : > { %v1134_v23 = vpop.f32.mrf.mxu2  ;;  %1270 = vmatmul.bf16.gmra.mxu3 %v4133_v1 }
 0x267   : > { %v1135_v33 = vadd.f32 %v1134_v23, %v4308_v41  ;;  %v1130_v23 = vadd.f32 %v4436_v9, %v4308_v41  ;;  %v1127_v9 = vadd.f32 %v4429_v50, %v4308_v41 }
 0x269   : > { %v1175_v50 = vmax.f32 %v1127_v9, 0.0 }
 0x26e   : > { %v1136_v37 = vpop.f32.mrf.mxu2 }
 0x26f   : > { %v1137_v16 = vadd.f32 %v1136_v37, %v4308_v41  ;;  %v1132_v37 = vadd.f32 %v4439_v15, %v4308_v41 }
 0x271   : > { %v1177_v15 = vmax.f32 %v1132_v37, 0.0 }
 0x274   : > { %1673 = vmatmul.bf16.gmra.mxu2 %v4143_v7 }
 0x276   : > { %v1139_v4 = vpop.f32.mrf.mxu2  ;;  %1275 = vmatmul.bf16.gmra.mxu3 %v4143_v7 }
 0x277   : > { %v1140_v40 = vadd.f32 %v1139_v4, %v4308_v41 }
 0x27e   : > { %v1141_v58 = vpop.f32.mrf.mxu2 }
 0x27f   : > { %v1142_v25 = vadd.f32 %v1141_v58, %v4308_v41 }
 0x281   : > { %v1181_v4 = vmax.f32 %v1142_v25, 0.0  ;;  %v3710_v25 = vld [vmem:[#allocation2 + $0xd0] sm:$0xff]  }
 0x284   : > { %1678 = vmatmul.bf16.gmra.mxu2 %v4153_v13 }
 0x286   : > { %v1144_v27 = vpop.f32.mrf.mxu2  ;;  %1280 = vmatmul.bf16.gmra.mxu3 %v4153_v13 }
 0x287   : > { %v1145_v36 = vadd.f32 %v1144_v27, %v4308_v41  ;;  %v1180_v27 = vmax.f32 %v1140_v40, 0.0 }
 0x289   : > { %v1182_v48 = vmax.f32 %v1145_v36, 0.0  ;;  %v3711_v36 = vld [vmem:[#allocation2 + $0xd8] sm:$0xff]   ;;  %v1647_v40 = vpack.c.bf16 %v1181_v4, %v1180_v27 }
 0x28b   : > { %v1214_v58 = vadd.f32 %v3694_v38, %v1182_v48  ;;  %v1125_v38 = vadd.f32 %v4426_v53, %v4308_v41  ;;  %v1122_v53 = vadd.f32 %v4412_v3, %v4308_v41  ;;  %v3708_v3 = vld [vmem:[#allocation2 + $0xc0] sm:$0xff]  }
 0x28e   : > { %v1146_v47 = vpop.f32.mrf.mxu2 }
 0x28f   : > { %v1147_v35 = vadd.f32 %v1146_v47, %v4308_v41  ;;  %v3691_v47 = vunpack.c.h.bf16 %v3713_v28  ;;  %v3682_v28 = vunpack.c.l.bf16 %v3711_v36 }
 0x291   : > { %v1183_v42 = vmax.f32 %v1147_v35, 0.0  ;;  %v1178_v35 = vmax.f32 %v1135_v33, 0.0  ;;  %v1174_v33 = vmax.f32 %v1125_v38, 0.0 }
 0x293   : > { %v1648_v19 = vpack.c.bf16 %v1183_v42, %v1182_v48  ;;  %v3683_v48 = vunpack.c.h.bf16 %v3711_v36  ;;  %v1173_v36 = vmax.f32 %v1122_v53, 0.0  ;;  %v3603_v53 = vld [vmem:[%s5127_s2 + $0xc8] sm:$0xff] }
 0x294   : > { %1683 = vmatmul.bf16.gmra.mxu2 %v4169_v21  ;;  %1495 = vmatpush.bf16.msrb.mxu1 %v3603_v53 }
 0x296   : > { %v1149_v26 = vpop.f32.mrf.mxu2  ;;  %1285 = vmatmul.bf16.gmra.mxu3 %v4169_v21 }
 0x297   : > { %v1150_v20 = vadd.f32 %v1149_v26, %v4308_v41 }
 0x299   : > { %v1184_v63 = vmax.f32 %v1150_v20, 0.0  ;;  %v1215_v20 = vadd.f32 %v3695_v5, %v1183_v42  ;;  %v1176_v5 = vmax.f32 %v1130_v23, 0.0  ;;  %v1210_v42 = vadd.f32 %v3686_v0, %v1178_v35 }
 0x29a   : > { %v1117_v0 = vadd.f32 %v4395_v49, %v4308_v41 }
 0x29b   : > { %v1216_v61 = vadd.f32 %v3698_v18, %v1184_v63  ;;  %v3687_v18 = vunpack.c.h.bf16 %v3712_v46  ;;  %v1120_v46 = vadd.f32 %v4402_v32, %v4308_v41 }
 0x29d   : > { %v1172_v32 = vmax.f32 %v1120_v46, 0.0 }
 0x29e   : > { %v1151_v6 = vpop.f32.mrf.mxu2 }
 0x29f   : > { %v1152_v12 = vadd.f32 %v1151_v6, %v4308_v41  ;;  %v1212_v6 = vadd.f32 %v3690_v11, %v1180_v27  ;;  %v3678_v11 = vunpack.c.l.bf16 %v3710_v25  ;;  %v1208_v27 = vadd.f32 %v3682_v28, %v1176_v5 }
 0x2a0   : > { %v1643_v28 = vpack.c.bf16 %v1173_v36, %v1172_v32 }
 0x2a1   : > { %v1185_v43 = vmax.f32 %v1152_v12, 0.0  ;;  %v1250_v12 = vpack.c.bf16 %v1215_v20, %v1214_v58  ;;  %v1115_v20 = vadd.f32 %v4391_v24, %v4308_v41  ;;  %v1206_v23 = vadd.f32 %v3678_v11, %v1174_v33 }
 0x2a2   : > { %v3671_v24 = vunpack.c.h.bf16 %v3708_v3 }
 0x2a3   : > { %v1649_v57 = vpack.c.bf16 %v1185_v43, %v1184_v63  ;;  %v1217_v44 = vadd.f32 %v3699_v55, %v1185_v43  ;;  %v1179_v63 = vmax.f32 %v1137_v16, 0.0  ;;  %v1213_v55 = vadd.f32 %v3691_v47, %v1181_v4 }
 0x2a4   : > { %1688 = vmatmul.bf16.gmra.mxu2 %v4188_v30  ;;  %v3679_v16 = vunpack.c.h.bf16 %v3710_v25  ;;  %v1209_v4 = vadd.f32 %v3683_v48, %v1177_v15 }
 0x2a5   : > { %1739 = vmatpush.bf16.msrb.mxu3 %v1649_v57  ;;  %v1251_v26 = vpack.c.bf16 %v1217_v44, %v1216_v61  ;;  %v1249_v61 = vpack.c.bf16 %v1213_v55, %v1212_v6  ;;  %v1211_v43 = vadd.f32 %v3687_v18, %v1179_v63  ;;  %v1646_v57 = vpack.c.bf16 %v1179_v63, %v1178_v35  ;;  %v3709_v44 = vld [vmem:[#allocation2 + $0xc8] sm:$0xff]  }
 0x2a6   : > { %1290 = vmatmul.bf16.gmra.mxu3 %v4188_v30  ;;  %v3674_v58 = vunpack.c.l.bf16 %v3709_v44  ;;  %v1247_v37 = vpack.c.bf16 %v1209_v4, %v1208_v27  ;;  %v1207_v35 = vadd.f32 %v3679_v16, %v1175_v50  ;;  %v1644_v18 = vpack.c.bf16 %v1175_v50, %v1174_v33  ;;  %v3602_v16 = vld [vmem:[%s5127_s2 + $0xc0] sm:$0xff]  ;;  %v3601_v50 = vld [vmem:[%s5127_s2 + $0xb8] sm:$0xff]  ;;  %v3599_v4 = vld [vmem:[%s5127_s2 + $0xa8] sm:$0xff] }
 0x2a7   : > { %1341 = vmatpush.bf16.msrb.mxu0 %v1251_v26  ;;  %v1248_v47 = vpack.c.bf16 %v1211_v43, %v1210_v42  ;;  %v1645_v26 = vpack.c.bf16 %v1177_v15, %v1176_v5  ;;  %v3670_v63 = vunpack.c.l.bf16 %v3708_v3  ;;  %v1170_v6 = vmax.f32 %v1115_v20, 0.0  ;;  %1496 = vmatpush.bf16.msrb.mxu1 %v3602_v16  ;;  %v3597_v20 = vld [vmem:[%s5127_s2 + $0x98] sm:$0xff]  ;;  %v5178_v3 = vld [vmem:[#allocation9_spill] sm:$0xff] }
 0x2a8   : > { %v1204_v55 = vadd.f32 %v3674_v58, %v1172_v32  ;;  %v1246_v41 = vpack.c.bf16 %v1207_v35, %v1206_v23  ;;  %v3596_v32 = vld [vmem:[%s5127_s2 + $0x90] sm:$0xff] }
 0x2a9   : > { %1740 = vmatpush.bf16.msrb.mxu3 %v1648_v19  ;;  %v3675_v19 = vunpack.c.h.bf16 %v3709_v44  ;;  %v5179_v35 = vld [vmem:[#allocation10_spill] sm:$0xff] }
 0x2ab   : > { %1342 = vmatpush.bf16.msrb.mxu0 %v1250_v12  ;;  %v1171_v12 = vmax.f32 %v1117_v0, 0.0  ;;  %v1205_v49 = vadd.f32 %v3675_v19, %v1173_v36  ;;  %1497 = vmatpush.bf16.msrb.mxu1 %v3601_v50 }
 0x2ad   : > { %1741 = vmatpush.bf16.msrb.mxu3 %v1647_v40  ;;  %v1202_v40 = vadd.f32 %v3670_v63, %v1170_v6  ;;  %v1245_v25 = vpack.c.bf16 %v1205_v49, %v1204_v55  ;;  %v1203_v38 = vadd.f32 %v3671_v24, %v1171_v12  ;;  %v1642_v9 = vpack.c.bf16 %v1171_v12, %v1170_v6  ;;  %v5180_v49 = vld [vmem:[#allocation11_spill] sm:$0xff] }
 0x2af   : > { %1343 = vmatpush.bf16.msrb.mxu0 %v1249_v61  ;;  %v1244_v5 = vpack.c.bf16 %v1203_v38, %v1202_v40 }
 0x2b1   : > { %1742 = vmatpush.bf16.msrb.mxu3 %v1646_v57 }
 0x2b3   : > { %1344 = vmatpush.bf16.msrb.mxu0 %v1248_v47  ;;  %v3600_v47 = vld [vmem:[%s5127_s2 + $0xb0] sm:$0xff] }
 0x2b4   : > { %1693 = vmatmul.bf16.gmra.mxu2 %v4207_v39  ;;  %1498 = vmatpush.bf16.msrb.mxu1 %v3600_v47 }
 0x2b5   : > { %1743 = vmatpush.bf16.msrb.mxu3 %v1645_v26  ;;  %v3598_v26 = vld [vmem:[%s5127_s2 + $0xa0] sm:$0xff] }
 0x2b6   : > { %1295 = vmatmul.bf16.gmra.mxu3 %v4207_v39 }
 0x2b7   : > { %1345 = vmatpush.bf16.msrb.mxu0 %v1247_v37 }
 0x2b8   : > { %1499 = vmatpush.bf16.msrb.mxu1 %v3599_v4 }
 0x2b9   : > { %1744 = vmatpush.bf16.msrb.mxu3 %v1644_v18 }
 0x2bb   : > { %1346 = vmatpush.bf16.msrb.mxu0 %v1246_v41 }
 0x2bc   : > { %1500 = vmatpush.bf16.msrb.mxu1 %v3598_v26  ;;  %v5182_v26 = vld [vmem:[#allocation13_spill] sm:$0xff] }
 0x2bd   : > { %1745 = vmatpush.bf16.msrb.mxu3 %v1643_v28 }
 0x2bf   : > { %1347 = vmatpush.bf16.msrb.mxu0 %v1245_v25 }
 0x2c0   : > { %1501 = vmatpush.bf16.msrb.mxu1 %v3597_v20 }
 0x2c1   : > { %1746 = vmatpush.bf16.msrb.mxu3 %v1642_v9 }
 0x2c3   : > { %1348 = vmatpush.bf16.msrb.mxu0 %v1244_v5 }
 0x2c4   : > { %1698 = vmatmul.bf16.gmra.mxu2 %v4217_v45  ;;  %1502 = vmatpush.bf16.msrb.mxu1 %v3596_v32 }
 0x2c6   : > { %1300 = vmatmul.bf16.gmra.mxu3 %v4217_v45  ;;  %1349 = vmatmul.bf16.vlgmr.msrb.gmra.mxu0 %v4115_v54 }
 0x2c9   : > { %v1261_v48 = vpop.f32.mrf.mxu3 }
 0x2d1   : > { %v1263_v15 = vpop.f32.mrf.mxu3 }
 0x2d4   : > { %1703 = vmatmul.bf16.gmra.mxu2 %v4227_v62 }
 0x2d6   : > { %1305 = vmatmul.bf16.gmra.mxu3 %v4227_v62  ;;  %1354 = vmatmul.bf16.gmra.mxu0 %v4125_v60 }
 0x2d9   : > { %v1266_v42 = vpop.f32.mrf.mxu3 }
 0x2e1   : > { %v1268_v61 = vpop.f32.mrf.mxu3 }
 0x2e4   : > { %1708 = vmatmul.bf16.gmra.mxu2 %v4237_v17 }
 0x2e6   : > { %1310 = vmatmul.bf16.gmra.mxu3 %v4237_v17  ;;  %1359 = vmatmul.bf16.gmra.mxu0 %v4135_v2 }
 0x2e9   : > { %v4494_v43 = vpop.f32.mrf.mxu3 }
 0x2f1   : > { %v4496_v11 = vpop.f32.mrf.mxu3 }
 0x2f4   : > { %1713 = vmatmul.bf16.gmra.mxu2 %v4247_v34 }
 0x2f6   : > { %1315 = vmatmul.bf16.gmra.mxu3 %v4247_v34  ;;  %1364 = vmatmul.bf16.gmra.mxu0 %v4145_v8 }
 0x2f9   : > { %v4501_v57 = vpop.f32.mrf.mxu3 }
 0x301   : > { %v4503_v44 = vpop.f32.mrf.mxu3 }
 0x306   : > { %1320 = vmatmul.bf16.gmra.mxu3 %v4257_v51  ;;  %1369 = vmatmul.bf16.gmra.mxu0 %v4155_v14 }
 0x309   : > { %v4507_v46 = vpop.f32.mrf.mxu3 }
 0x311   : > { %v4512_v33 = vpop.f32.mrf.mxu3 }
 0x316   : > { %1325 = vmatmul.bf16.gmra.mxu3 %v4267_v10  ;;  %1374 = vmatmul.bf16.gmra.mxu0 %v4171_v22 }
 0x319   : > { %v4522_v27 = vpop.f32.mrf.mxu3 }
 0x321   : > { %v4530_v58 = vpop.f32.mrf.mxu3 }
 0x326   : > { %1330 = vmatmul.bf16.gmra.mxu3 %v4277_v29  ;;  %1379 = vmatmul.bf16.gmra.mxu0 %v4190_v31 }
 0x329   : > { %v4540_v0 = vpop.f32.mrf.mxu3 }
 0x331   : > { %v4545_v19 = vpop.f32.mrf.mxu3 }
 0x336   : > { %1335 = vmatmul.bf16.gmra.mxu3 %v4291_v56  ;;  %1384 = vmatmul.bf16.gmra.mxu0 %v5178_v3 }
 0x339   : > { %v4549_v36 = vpop.f32.mrf.mxu3 }
 0x341   : > { %v4551_v23 = vpop.f32.mrf.mxu3 }
 0x343   : > { %v1350_v37 = vpop.f32.mrf.mxu0 }
 0x344   : > { %v1351_v6 = vadd.f32 %v1350_v37, %v1261_v48 }
 0x346   : > { %1389 = vmatmul.bf16.gmra.mxu0 %v5179_v35  ;;  %1747 = vmatmul.bf16.vlgmr.msrb.gmra.mxu3 %v4115_v54 }
 0x349   : > { %v4555_v18 = vpop.f32.mrf.mxu3 }
 0x34b   : > { %v1352_v63 = vpop.f32.mrf.mxu0 }
 0x34c   : > { %v1353_v24 = vadd.f32 %v1352_v63, %v1263_v15  ;;  %v5181_v15 = vld [vmem:[#allocation12_spill] sm:$0xff] }
 0x34e   : > { %v1430_v12 = vpack.c.bf16 %v1353_v24, %v1351_v6  ;;  %v5183_v24 = vld [vmem:[#allocation15_spill] sm:$0xff] }
 0x350   : > { %1503 = vmatmul.bf16.vlgmr.msrb.gmra.mxu1 %v1430_v12 }
 0x351   : > { %v4557_v55 = vpop.f32.mrf.mxu3 }
 0x353   : > { %v1355_v41 = vpop.f32.mrf.mxu0 }
 0x354   : > { %v1356_v25 = vadd.f32 %v1355_v41, %v1266_v42 }
 0x356   : > { %1394 = vmatmul.bf16.gmra.mxu0 %v5180_v49  ;;  %1752 = vmatmul.bf16.gmra.mxu3 %v4125_v60 }
 0x359   : > { %v4561_v28 = vpop.f32.mrf.mxu3 }
 0x35b   : > { %v1357_v40 = vpop.f32.mrf.mxu0 }
 0x35c   : > { %v1358_v38 = vadd.f32 %v1357_v40, %v1268_v61 }
 0x35e   : > { %v1431_v9 = vpack.c.bf16 %v1358_v38, %v1356_v25 }
 0x360   : > { %1508 = vmatmul.bf16.gmra.mxu1 %v1431_v9  ;;  %v3611_v9 = vld [vmem:[%s5127_s2 + $0x78] sm:$0xff] }
 0x361   : > { %v4563_v5 = vpop.f32.mrf.mxu3  ;;  %1893 = vmatpush.bf16.msra.mxu0 %v3611_v9  ;;  %v3605_v9 = vld [vmem:[%s5127_s2 + $0x48] sm:$0xff] }
 0x363   : > { %v1360_v48 = vpop.f32.mrf.mxu0 }
 0x364   : > { %v1361_v50 = vadd.f32 %v1360_v48, %v4494_v43  ;;  %v5184_v48 = vld [vmem:[#allocation17_spill] sm:$0xff] }
 0x366   : > { %1399 = vmatmul.bf16.gmra.mxu0 %v5181_v15  ;;  %1757 = vmatmul.bf16.gmra.mxu3 %v4135_v2 }
 0x369   : > { %v4567_v53 = vpop.f32.mrf.mxu3 }
 0x36b   : > { %v1362_v16 = vpop.f32.mrf.mxu0 }
 0x36c   : > { %v1363_v47 = vadd.f32 %v1362_v16, %v4496_v11 }
 0x36e   : > { %v1432_v4 = vpack.c.bf16 %v1363_v47, %v1361_v50 }
 0x370   : > { %1513 = vmatmul.bf16.gmra.mxu1 %v1432_v4  ;;  %v3609_v4 = vld [vmem:[%s5127_s2 + $0x68] sm:$0xff] }
 0x371   : > { %v4571_v42 = vpop.f32.mrf.mxu3 }
 0x373   : > { %v1365_v61 = vpop.f32.mrf.mxu0 }
 0x374   : > { %v1366_v37 = vadd.f32 %v1365_v61, %v4501_v57 }
 0x376   : > { %1404 = vmatmul.bf16.gmra.mxu0 %v5182_v26  ;;  %1762 = vmatmul.bf16.gmra.mxu3 %v4145_v8 }
 0x379   : > { %v4575_v20 = vpop.f32.mrf.mxu3 }
 0x37b   : > { %v1367_v32 = vpop.f32.mrf.mxu0 }
 0x37c   : > { %v1368_v63 = vadd.f32 %v1367_v32, %v4503_v44 }
 0x37e   : > { %v1433_v6 = vpack.c.bf16 %v1368_v63, %v1366_v37  ;;  %v1659_v37 = vpop.f32.mrf.mxu2  ;;  %v3608_v63 = vld [vmem:[%s5127_s2 + $0x60] sm:$0xff] }
 0x380   : > { %1518 = vmatmul.bf16.gmra.mxu1 %v1433_v6 }
 0x381   : > { %v4579_v43 = vpop.f32.mrf.mxu3 }
 0x383   : > { %v1370_v11 = vpop.f32.mrf.mxu0 }
 0x384   : > { %v1371_v40 = vadd.f32 %v1370_v11, %v4507_v46  ;;  %v3610_v46 = vld [vmem:[%s5127_s2 + $0x70] sm:$0xff] }
 0x385   : > { %1894 = vmatpush.bf16.msra.mxu0 %v3610_v46 }
 0x386   : > { %1409 = vmatmul.bf16.gmra.mxu0 %v5183_v24  ;;  %1767 = vmatmul.bf16.gmra.mxu3 %v4155_v14 }
 0x389   : > { %v4583_v12 = vpop.f32.mrf.mxu3  ;;  %1895 = vmatpush.bf16.msra.mxu0 %v3609_v4 }
 0x38b   : > { %v1372_v41 = vpop.f32.mrf.mxu0 }
 0x38c   : > { %v1373_v25 = vadd.f32 %v1372_v41, %v4512_v33  ;;  %v1661_v41 = vpop.f32.mrf.mxu2  ;;  %1718 = vmatmul.bf16.gmra.mxu2 %v4257_v51 }
 0x38d   : > { %1896 = vmatpush.bf16.msra.mxu0 %v3608_v63 }
 0x38e   : > { %v1434_v38 = vpack.c.bf16 %v1373_v25, %v1371_v40  ;;  %v3606_v40 = vld [vmem:[%s5127_s2 + $0x50] sm:$0xff] }
 0x390   : > { %1523 = vmatmul.bf16.gmra.mxu1 %v1434_v38 }
 0x391   : > { %v4587_v57 = vpop.f32.mrf.mxu3 }
 0x393   : > { %v1375_v44 = vpop.f32.mrf.mxu0 }
 0x394   : > { %v1376_v50 = vadd.f32 %v1375_v44, %v4522_v27  ;;  %v3607_v27 = vld [vmem:[%s5127_s2 + $0x58] sm:$0xff] }
 0x395   : > { %1897 = vmatpush.bf16.msra.mxu0 %v3607_v27 }
 0x396   : > { %1414 = vmatmul.bf16.gmra.mxu0 %v5184_v48  ;;  %1772 = vmatmul.bf16.gmra.mxu3 %v4171_v22 }
 0x399   : > { %v4594_v16 = vpop.f32.mrf.mxu3  ;;  %1898 = vmatpush.bf16.msra.mxu0 %v3606_v40 }
 0x39b   : > { %v1377_v33 = vpop.f32.mrf.mxu0 }
 0x39c   : > { %v1378_v47 = vadd.f32 %v1377_v33, %v4530_v58  ;;  %v5185_v58 = vld [vmem:[#allocation19_spill] sm:$0xff] }
 0x39d   : > { %1899 = vmatpush.bf16.msra.mxu0 %v3605_v9 }
 0x39e   : > { %v1435_v61 = vpack.c.bf16 %v1378_v47, %v1376_v50  ;;  %v1664_v50 = vpop.f32.mrf.mxu2  ;;  %v3604_v47 = vld [vmem:[%s5127_s2 + $0x40] sm:$0xff] }
 0x3a0   : > { %1528 = vmatmul.bf16.gmra.mxu1 %v1435_v61  ;;  %v5186_v61 = vld [vmem:[#allocation20_spill] sm:$0xff] }
 0x3a1   : > { %v4604_v32 = vpop.f32.mrf.mxu3  ;;  %1900 = vmatpush.bf16.msra.mxu0 %v3604_v47 }
 0x3a3   : > { %v1380_v6 = vpop.f32.mrf.mxu0 }
 0x3a4   : > { %v1381_v38 = vadd.f32 %v1380_v6, %v4540_v0 }
 0x3a6   : > { %1419 = vmatmul.bf16.gmra.mxu0 %v5185_v58  ;;  %1777 = vmatmul.bf16.gmra.mxu3 %v4190_v31 }
 0x3a9   : > { %v4614_v11 = vpop.f32.mrf.mxu3 }
 0x3ab   : > { %v1382_v25 = vpop.f32.mrf.mxu0 }
 0x3ac   : > { %v1383_v44 = vadd.f32 %v1382_v25, %v4545_v19  ;;  %v1666_v19 = vpop.f32.mrf.mxu2  ;;  %1723 = vmatmul.bf16.gmra.mxu2 %v4267_v10 }
 0x3ae   : > { %v1436_v46 = vpack.c.bf16 %v1383_v44, %v1381_v38 }
 0x3b0   : > { %1533 = vmatmul.bf16.gmra.mxu1 %v1436_v46 }
 0x3b1   : > { %v4625_v33 = vpop.f32.mrf.mxu3 }
 0x3b3   : > { %v1385_v4 = vpop.f32.mrf.mxu0 }
 0x3b4   : > { %v1386_v6 = vadd.f32 %v1385_v4, %v4549_v36  ;;  %v1669_v38 = vpop.f32.mrf.mxu2 }
 0x3b6   : > { %1424 = vmatmul.bf16.gmra.mxu0 %v5186_v61  ;;  %1782 = vmatmul.bf16.gmra.mxu3 %v5178_v3 }
 0x3b9   : > { %v4632_v0 = vpop.f32.mrf.mxu3 }
 0x3bb   : > { %v1387_v63 = vpop.f32.mrf.mxu0 }
 0x3bc   : > { %v1388_v27 = vadd.f32 %v1387_v63, %v4551_v23  ;;  %v1671_v46 = vpop.f32.mrf.mxu2  ;;  %1728 = vmatmul.bf16.gmra.mxu2 %v4277_v29 }
 0x3be   : > { %v1437_v40 = vpack.c.bf16 %v1388_v27, %v1386_v6 }
 0x3c0   : > { %1538 = vmatmul.bf16.gmra.mxu1 %v1437_v40 }
 0x3c1   : > { %v4637_v25 = vpop.f32.mrf.mxu3 }
 0x3c3   : > { %v1390_v44 = vpop.f32.mrf.mxu0 }
 0x3c4   : > { %v1391_v10 = vadd.f32 %v1390_v44, %v4555_v18  ;;  %v1674_v4 = vpop.f32.mrf.mxu2 }
 0x3c6   : > { %1787 = vmatmul.bf16.gmra.mxu3 %v5179_v35 }
 0x3c9   : > { %v1748_v9 = vpop.f32.mrf.mxu3 }
 0x3ca   : > { %v1749_v63 = vadd.f32 %v1748_v9, %v1659_v37 }
 0x3cb   : > { %v1392_v47 = vpop.f32.mrf.mxu0 }
 0x3cc   : > { %v1393_v3 = vadd.f32 %v1392_v47, %v4557_v55  ;;  %v1676_v51 = vpop.f32.mrf.mxu2  ;;  %1733 = vmatmul.bf16.gmra.mxu2 %v4291_v56 }
 0x3ce   : > { %v1438_v36 = vpack.c.bf16 %v1393_v3, %v1391_v10 }
 0x3d0   : > { %1543 = vmatmul.bf16.gmra.mxu1 %v1438_v36 }
 0x3d1   : > { %v1750_v23 = vpop.f32.mrf.mxu3 }
 0x3d2   : > { %v1751_v6 = vadd.f32 %v1750_v23, %v1661_v41 }
 0x3d3   : > { %v1395_v27 = vpop.f32.mrf.mxu0 }
 0x3d4   : > { %v1828_v40 = vpack.c.bf16 %v1751_v6, %v1749_v63  ;;  %v1396_v18 = vadd.f32 %v1395_v27, %v4561_v28  ;;  %v1679_v44 = vpop.f32.mrf.mxu2 }
 0x3d6   : > { %1792 = vmatmul.bf16.gmra.mxu3 %v5180_v49  ;;  %1901 = vmatmul.bf16.vlgmr.msra.gmra.mxu0 %v1828_v40 }
 0x3d9   : > { %v1753_v35 = vpop.f32.mrf.mxu3 }
 0x3da   : > { %v1754_v37 = vadd.f32 %v1753_v35, %v1664_v50 }
 0x3db   : > { %v1397_v29 = vpop.f32.mrf.mxu0 }
 0x3dc   : > { %v1398_v55 = vadd.f32 %v1397_v29, %v4563_v5  ;;  %v1681_v23 = vpop.f32.mrf.mxu2 }
 0x3de   : > { %v1439_v10 = vpack.c.bf16 %v1398_v55, %v1396_v18 }
 0x3e0   : > { %1548 = vmatmul.bf16.gmra.mxu1 %v1439_v10  ;;  %v4651_v10 = vpop.f32.mrf.mxu1 }
 0x3e1   : > { %v1755_v3 = vpop.f32.mrf.mxu3 }
 0x3e2   : > { %v1756_v41 = vadd.f32 %v1755_v3, %v1666_v19 }
 0x3e3   : > { %v1400_v9 = vpop.f32.mrf.mxu0 }
 0x3e4   : > { %v1829_v47 = vpack.c.bf16 %v1756_v41, %v1754_v37  ;;  %v1401_v6 = vadd.f32 %v1400_v9, %v4567_v53  ;;  %v1684_v5 = vpop.f32.mrf.mxu2 }
 0x3e6   : > { %1797 = vmatmul.bf16.gmra.mxu3 %v5181_v15  ;;  %1906 = vmatmul.bf16.gmra.mxu0 %v1829_v47 }
 0x3e9   : > { %v1758_v36 = vpop.f32.mrf.mxu3 }
 0x3ea   : > { %v1759_v40 = vadd.f32 %v1758_v36, %v1669_v38  ;;  %v4655_v36 = vpop.f32.mrf.mxu1 }
 0x3eb   : > { %v1402_v63 = vpop.f32.mrf.mxu0 }
 0x3ec   : > { %v1403_v28 = vadd.f32 %v1402_v63, %v4571_v42  ;;  %v1686_v55 = vpop.f32.mrf.mxu2 }
 0x3ee   : > { %v1440_v27 = vpack.c.bf16 %v1403_v28, %v1401_v6 }
 0x3f0   : > { %1553 = vmatmul.bf16.gmra.mxu1 %v1440_v27 }
 0x3f1   : > { %v1760_v29 = vpop.f32.mrf.mxu3 }
 0x3f2   : > { %v1761_v18 = vadd.f32 %v1760_v29, %v1671_v46  ;;  %v4660_v29 = vpop.f32.mrf.mxu1 }
 0x3f3   : > { %v1405_v35 = vpop.f32.mrf.mxu0 }
 0x3f4   : > { %v1830_v50 = vpack.c.bf16 %v1761_v18, %v1759_v40  ;;  %v1406_v53 = vadd.f32 %v1405_v35, %v4575_v20  ;;  %v1689_v47 = vpop.f32.mrf.mxu2 }
 0x3f6   : > { %1802 = vmatmul.bf16.gmra.mxu3 %v5182_v26  ;;  %1911 = vmatmul.bf16.gmra.mxu0 %v1830_v50 }
 0x3f9   : > { %v1763_v19 = vpop.f32.mrf.mxu3 }
 0x3fa   : > { %v1764_v9 = vadd.f32 %v1763_v19, %v1674_v4 }
 0x3fb   : > { %v1407_v3 = vpop.f32.mrf.mxu0 }
 0x3fc   : > { %v1408_v42 = vadd.f32 %v1407_v3, %v4579_v43  ;;  %v1691_v43 = vpop.f32.mrf.mxu2  ;;  %v4663_v3 = vpop.f32.mrf.mxu1 }
 0x3fe   : > { %v1441_v37 = vpack.c.bf16 %v1408_v42, %v1406_v53 }
 0x400   : > { %1558 = vmatmul.bf16.gmra.mxu1 %v1441_v37 }
 0x401   : > { %v1765_v41 = vpop.f32.mrf.mxu3 }
 0x402   : > { %v1766_v38 = vadd.f32 %v1765_v41, %v1676_v51 }
 0x403   : > { %v1410_v46 = vpop.f32.mrf.mxu0 }
 0x404   : > { %v1831_v63 = vpack.c.bf16 %v1766_v38, %v1764_v9  ;;  %v1411_v27 = vadd.f32 %v1410_v46, %v4583_v12  ;;  %v1694_v19 = vpop.f32.mrf.mxu2 }
 0x406   : > { %1807 = vmatmul.bf16.gmra.mxu3 %v5183_v24  ;;  %1916 = vmatmul.bf16.gmra.mxu0 %v1831_v63 }
 0x409   : > { %v1768_v6 = vpop.f32.mrf.mxu3 }
 0x40a   : > { %v1769_v4 = vadd.f32 %v1768_v6, %v1679_v44  ;;  %v4667_v44 = vpop.f32.mrf.mxu1 }
 0x40b   : > { %v1412_v28 = vpop.f32.mrf.mxu0 }
 0x40c   : > { %v1413_v20 = vadd.f32 %v1412_v28, %v4587_v57  ;;  %v1696_v9 = vpop.f32.mrf.mxu2 }
 0x40e   : > { %v1442_v40 = vpack.c.bf16 %v1413_v20, %v1411_v27 }
 0x410   : > { %1563 = vmatmul.bf16.gmra.mxu1 %v1442_v40 }
 0x411   : > { %v1770_v51 = vpop.f32.mrf.mxu3 }
 0x412   : > { %v1771_v18 = vadd.f32 %v1770_v51, %v1681_v23  ;;  %v4670_v20 = vpop.f32.mrf.mxu1 }
 0x413   : > { %v1415_v35 = vpop.f32.mrf.mxu0 }
 0x414   : > { %v1832_v50 = vpack.c.bf16 %v1771_v18, %v1769_v4  ;;  %v1416_v57 = vadd.f32 %v1415_v35, %v4594_v16  ;;  %v1699_v27 = vpop.f32.mrf.mxu2 }
 0x416   : > { %1812 = vmatmul.bf16.gmra.mxu3 %v5184_v48  ;;  %1921 = vmatmul.bf16.gmra.mxu0 %v1832_v50 }
 0x419   : > { %v1773_v53 = vpop.f32.mrf.mxu3 }
 0x41a   : > { %v1774_v23 = vadd.f32 %v1773_v53, %v1684_v5  ;;  %v4674_v50 = vpop.f32.mrf.mxu1 }
 0x41b   : > { %v1417_v12 = vpop.f32.mrf.mxu0 }
 0x41c   : > { %v1418_v42 = vadd.f32 %v1417_v12, %v4604_v32  ;;  %v1701_v35 = vpop.f32.mrf.mxu2 }
 0x41e   : > { %v1443_v37 = vpack.c.bf16 %v1418_v42, %v1416_v57 }
 0x420   : > { %1568 = vmatmul.bf16.gmra.mxu1 %v1443_v37 }
 0x421   : > { %v1775_v41 = vpop.f32.mrf.mxu3 }
 0x422   : > { %v1776_v38 = vadd.f32 %v1775_v41, %v1686_v55  ;;  %v4679_v37 = vpop.f32.mrf.mxu1 }
 0x423   : > { %v1420_v46 = vpop.f32.mrf.mxu0 }
 0x424   : > { %v1833_v63 = vpack.c.bf16 %v1776_v38, %v1774_v23  ;;  %v1421_v16 = vadd.f32 %v1420_v46, %v4614_v11  ;;  %v1704_v42 = vpop.f32.mrf.mxu2  ;;  %v1234_v38 = vld [vmem:[%s5127_s2 + $0x110] sm:$0x1] }
 0x426   : > { %1817 = vmatmul.bf16.gmra.mxu3 %v5185_v58  ;;  %1926 = vmatmul.bf16.gmra.mxu0 %v1833_v63  ;;  %v1235_v63 = vunpack.c.l.bf16 %v1234_v38 }
 0x429   : > { %v1778_v6 = vpop.f32.mrf.mxu3 }
 0x42a   : > { %v1779_v4 = vadd.f32 %v1778_v6, %v1689_v47 }
 0x42b   : > { %v1422_v28 = vpop.f32.mrf.mxu0 }
 0x42c   : > { %v1423_v32 = vadd.f32 %v1422_v28, %v4625_v33  ;;  %v4687_v28 = vperm.slane %v1235_v63, 0 }
 0x42e   : > { %v1444_v40 = vpack.c.bf16 %v1423_v32, %v1421_v16  ;;  %v1510_v38 = vadd.f32 %v4660_v29, %v4687_v28 }
 0x430   : > { %1573 = vmatmul.bf16.gmra.mxu1 %v1444_v40 }
 0x431   : > { %v1780_v51 = vpop.f32.mrf.mxu3 }
 0x432   : > { %v1781_v5 = vadd.f32 %v1780_v51, %v1691_v43 }
 0x433   : > { %v1425_v55 = vpop.f32.mrf.mxu0 }
 0x434   : > { %v1834_v18 = vpack.c.bf16 %v1781_v5, %v1779_v4  ;;  %v1426_v57 = vadd.f32 %v1425_v55, %v4632_v0  ;;  %v1632_v0 = vld [vmem:[%s5127_s2 + $0x88] sm:$0x1] }
 0x435   : > { %v1633_v6 = vunpack.c.l.bf16 %v1632_v0 }
 0x436   : > { %1822 = vmatmul.bf16.gmra.mxu3 %v5186_v61  ;;  %1931 = vmatmul.bf16.gmra.mxu0 %v1834_v18 }
 0x437   : > { %v4689_v16 = vperm.slane %v1633_v6, 0 }
 0x439   : > { %v1783_v53 = vpop.f32.mrf.mxu3 }
 0x43a   : > { %v1784_v43 = vadd.f32 %v1783_v53, %v1694_v19 }
 0x43b   : > { %v1427_v12 = vpop.f32.mrf.mxu0 }
 0x43c   : > { %v1428_v11 = vadd.f32 %v1427_v12, %v4637_v25  ;;  %v1706_v25 = vpop.f32.mrf.mxu2 }
 0x43e   : > { %v1445_v33 = vpack.c.bf16 %v1428_v11, %v1426_v57  ;;  %v1507_v11 = vadd.f32 %v4655_v36, %v4687_v28 }
 0x440   : > { %1578 = vmatmul.bf16.gmra.mxu1 %v1445_v33 }
 0x441   : > { %v1785_v47 = vpop.f32.mrf.mxu3 }
 0x442   : > { %v1786_v41 = vadd.f32 %v1785_v47, %v1696_v9  ;;  %v1505_v9 = vadd.f32 %v4651_v10, %v4687_v28 }
 0x444   : > { %v1835_v23 = vpack.c.bf16 %v1786_v41, %v1784_v43  ;;  %v1709_v4 = vpop.f32.mrf.mxu2  ;;  %v1584_v18 = vmax.f32 %v1505_v9, 0.0  ;;  %v4701_v41 = vpop.f32.mrf.mxu1  ;;  %v1586_v9 = vmax.f32 %v1510_v38, 0.0 }
 0x446   : > { %1936 = vmatmul.bf16.gmra.mxu0 %v1835_v23 }
 0x449   : > { %v1788_v46 = vpop.f32.mrf.mxu3 }
 0x44a   : > { %v1789_v32 = vadd.f32 %v1788_v46, %v1699_v27  ;;  %v1585_v27 = vmax.f32 %v1507_v11, 0.0 }
 0x44c   : > { %v1711_v10 = vpop.f32.mrf.mxu2  ;;  %v4712_v29 = vpop.f32.mrf.mxu1 }
 0x451   : > { %v1790_v19 = vpop.f32.mrf.mxu3 }
 0x452   : > { %v1791_v40 = vadd.f32 %v1790_v19, %v1701_v35 }
 0x453   : > { %v1902_v51 = vpop.f32.mrf.mxu0 }
 0x454   : > { %v1836_v5 = vpack.c.bf16 %v1791_v40, %v1789_v32  ;;  %v1903_v55 = vadd.f32 %v1902_v51, %v4689_v16  ;;  %v1714_v40 = vpop.f32.mrf.mxu2 }
 0x456   : > { %v1982_v53 = vmax.f32 %v1903_v55, 0.0  ;;  %1941 = vmatmul.bf16.gmra.mxu0 %v1836_v5  ;;  %v1512_v55 = vadd.f32 %v4663_v3, %v4687_v28 }
 0x458   : > { %v4694_v12 = vadd.f32 %v1982_v53, %v1584_v18  ;;  %v1587_v18 = vmax.f32 %v1512_v55, 0.0 }
 0x459   : > { %v1793_v57 = vpop.f32.mrf.mxu3 }
 0x45a   : > { %v1794_v46 = vadd.f32 %v1793_v57, %v1704_v42 }
 0x45b   : > { %v1904_v33 = vpop.f32.mrf.mxu0 }
 0x45c   : > { %v1905_v47 = vadd.f32 %v1904_v33, %v4689_v16  ;;  %v1716_v33 = vpop.f32.mrf.mxu2 }
 0x45e   : > { %v1983_v35 = vmax.f32 %v1905_v47, 0.0  ;;  %v1515_v47 = vadd.f32 %v4667_v44, %v4687_v28  ;;  %v1517_v44 = vadd.f32 %v4670_v20, %v4687_v28 }
 0x460   : > { %v4699_v43 = vadd.f32 %v1983_v35, %v1585_v27 }
 0x461   : > { %v1795_v23 = vpop.f32.mrf.mxu3 }
 0x462   : > { %v1796_v0 = vadd.f32 %v1795_v23, %v1706_v25 }
 0x463   : > { %v1907_v36 = vpop.f32.mrf.mxu0 }
 0x464   : > { %v1837_v6 = vpack.c.bf16 %v1796_v0, %v1794_v46  ;;  %v1908_v19 = vadd.f32 %v1907_v36, %v4689_v16  ;;  %v4722_v0 = vpop.f32.mrf.mxu1  ;;  %v1588_v36 = vmax.f32 %v1515_v47, 0.0 }
 0x466   : > { %v1984_v32 = vmax.f32 %v1908_v19, 0.0  ;;  %1946 = vmatmul.bf16.gmra.mxu0 %v1837_v6 }
 0x468   : > { %v4708_v51 = vadd.f32 %v1984_v32, %v1586_v9 }
 0x469   : > { %v1798_v5 = vpop.f32.mrf.mxu3 }
 0x46a   : > { %v1799_v27 = vadd.f32 %v1798_v5, %v1709_v4  ;;  %v1589_v5 = vmax.f32 %v1517_v44, 0.0 }
 0x46b   : > { %v1909_v42 = vpop.f32.mrf.mxu0 }
 0x46c   : > { %v1910_v25 = vadd.f32 %v1909_v42, %v4689_v16  ;;  %v4729_v42 = vpop.f32.mrf.mxu1 }
 0x46e   : > { %v1985_v53 = vmax.f32 %v1910_v25, 0.0 }
 0x470   : > { %v4715_v57 = vadd.f32 %v1985_v53, %v1587_v18  ;;  %v1520_v53 = vadd.f32 %v4674_v50, %v4687_v28  ;;  %v1522_v50 = vadd.f32 %v4679_v37, %v4687_v28 }
 0x471   : > { %v1800_v11 = vpop.f32.mrf.mxu3 }
 0x472   : > { %v1801_v35 = vadd.f32 %v1800_v11, %v1711_v10  ;;  %v1719_v10 = vpop.f32.mrf.mxu2 }
 0x473   : > { %v1912_v3 = vpop.f32.mrf.mxu0 }
 0x474   : > { %v1838_v38 = vpack.c.bf16 %v1801_v35, %v1799_v27  ;;  %v1913_v46 = vadd.f32 %v1912_v3, %v4689_v16  ;;  %v4740_v44 = vpop.f32.mrf.mxu1 }
 0x476   : > { %v1986_v6 = vmax.f32 %v1913_v46, 0.0  ;;  %1951 = vmatmul.bf16.gmra.mxu0 %v1838_v38  ;;  %v1590_v46 = vmax.f32 %v1520_v53, 0.0  ;;  %v1525_v53 = vadd.f32 %v4701_v41, %v4687_v28 }
 0x478   : > { %v4724_v19 = vadd.f32 %v1986_v6, %v1588_v36 }
 0x479   : > { %v1803_v9 = vpop.f32.mrf.mxu3 }
 0x47a   : > { %v1804_v11 = vadd.f32 %v1803_v9, %v1714_v40  ;;  %v1721_v38 = vpop.f32.mrf.mxu2  ;;  %v1591_v9 = vmax.f32 %v1522_v50, 0.0 }
 0x47b   : > { %v1914_v4 = vpop.f32.mrf.mxu0 }
 0x47c   : > { %v1915_v32 = vadd.f32 %v1914_v4, %v4689_v16 }
 0x47e   : > { %v1987_v55 = vmax.f32 %v1915_v32, 0.0 }
 0x480   : > { %v4731_v25 = vadd.f32 %v1987_v55, %v1589_v5 }
 0x481   : > { %v1805_v18 = vpop.f32.mrf.mxu3 }
 0x482   : > { %v1806_v47 = vadd.f32 %v1805_v18, %v1716_v33  ;;  %v1724_v5 = vpop.f32.mrf.mxu2 }
 0x483   : > { %v1917_v20 = vpop.f32.mrf.mxu0 }
 0x484   : > { %v1839_v35 = vpack.c.bf16 %v1806_v47, %v1804_v11  ;;  %v1918_v3 = vadd.f32 %v1917_v20, %v4689_v16 }
 0x486   : > { %v1988_v36 = vmax.f32 %v1918_v3, 0.0  ;;  %1956 = vmatmul.bf16.gmra.mxu0 %v1839_v35  ;;  %v1536_v35 = vpop.f32.mrf.mxu1 }
 0x488   : > { %v4738_v6 = vadd.f32 %v1988_v36, %v1590_v46  ;;  %v1592_v36 = vmax.f32 %v1525_v53, 0.0 }
 0x489   : > { %v1808_v4 = vpop.f32.mrf.mxu3 }
 0x48a   : > { %v1809_v11 = vadd.f32 %v1808_v4, %v1719_v10 }
 0x48b   : > { %v1919_v40 = vpop.f32.mrf.mxu0 }
 0x48c   : > { %v1920_v33 = vadd.f32 %v1919_v40, %v4689_v16 }
 0x48e   : > { %v1989_v32 = vmax.f32 %v1920_v33, 0.0  ;;  %v1726_v33 = vpop.f32.mrf.mxu2  ;;  %v1539_v63 = vpop.f32.mrf.mxu1 }
 0x490   : > { %v4745_v55 = vadd.f32 %v1989_v32, %v1591_v9 }
 0x491   : > { %v1810_v18 = vpop.f32.mrf.mxu3 }
 0x492   : > { %v1811_v47 = vadd.f32 %v1810_v18, %v1721_v38 }
 0x493   : > { %v1922_v3 = vpop.f32.mrf.mxu0 }
 0x494   : > { %v1840_v37 = vpack.c.bf16 %v1811_v47, %v1809_v11  ;;  %v1923_v46 = vadd.f32 %v1922_v3, %v4689_v16 }
 0x496   : > { %v1990_v50 = vmax.f32 %v1923_v46, 0.0  ;;  %1961 = vmatmul.bf16.gmra.mxu0 %v1840_v37  ;;  %v1729_v4 = vpop.f32.mrf.mxu2  ;;  %v1541_v27 = vpop.f32.mrf.mxu1 }
 0x498   : > { %v4752_v40 = vadd.f32 %v1990_v50, %v1592_v36 }
 0x499   : > { %v1813_v9 = vpop.f32.mrf.mxu3 }
 0x49a   : > { %v1814_v10 = vadd.f32 %v1813_v9, %v1724_v5 }
 0x49b   : > { %v1924_v32 = vpop.f32.mrf.mxu0 }
 0x49e   : > { %v1731_v3 = vpop.f32.mrf.mxu2  ;;  %v1544_v53 = vpop.f32.mrf.mxu1 }
 0x4a1   : > { %v1815_v41 = vpop.f32.mrf.mxu3 }
 0x4a2   : > { %v1816_v38 = vadd.f32 %v1815_v41, %v1726_v33 }
 0x4a3   : > { %v1927_v18 = vpop.f32.mrf.mxu0 }
 0x4a4   : > { %v1841_v23 = vpack.c.bf16 %v1816_v38, %v1814_v10 }
 0x4a6   : > { %1966 = vmatmul.bf16.gmra.mxu0 %v1841_v23  ;;  %v1734_v61 = vpop.f32.mrf.mxu2  ;;  %v4754_v48 = vpop.f32.mrf.mxu1 }
 0x4a9   : > { %v1818_v11 = vpop.f32.mrf.mxu3 }
 0x4aa   : > { %v1819_v37 = vadd.f32 %v1818_v11, %v1729_v4  ;;  %v1540_v4 = vadd.f32 %v1539_v63, %v4687_v28  ;;  %v1542_v11 = vadd.f32 %v1541_v27, %v4687_v28  ;;  %v1532_v27 = vadd.f32 %v4729_v42, %v4687_v28 }
 0x4ab   : > { %v1929_v47 = vpop.f32.mrf.mxu0  ;;  %v1527_v42 = vadd.f32 %v4712_v29, %v4687_v28 }
 0x4ac   : > { %v1595_v15 = vmax.f32 %v1532_v27, 0.0 }
 0x4ae   : > { %v1736_v33 = vpop.f32.mrf.mxu2  ;;  %v1549_v24 = vpop.f32.mrf.mxu1 }
 0x4b1   : > { %v1820_v46 = vpop.f32.mrf.mxu3 }
 0x4b2   : > { %v1821_v36 = vadd.f32 %v1820_v46, %v1731_v3  ;;  %v1537_v3 = vadd.f32 %v1536_v35, %v4687_v28 }
 0x4b3   : > { %v1932_v50 = vpop.f32.mrf.mxu0 }
 0x4b4   : > { %v1842_v20 = vpack.c.bf16 %v1821_v36, %v1819_v37  ;;  %v1933_v37 = vadd.f32 %v1932_v50, %v4689_v16  ;;  %v1928_v50 = vadd.f32 %v1927_v18, %v4689_v16 }
 0x4b6   : > { %1971 = vmatmul.bf16.gmra.mxu0 %v1842_v20  ;;  %v4768_v35 = vpop.f32.mrf.mxu1  ;;  %v1992_v18 = vmax.f32 %v1928_v50, 0.0 }
 0x4b9   : > { %v1823_v58 = vpop.f32.mrf.mxu3 }
 0x4ba   : > { %v1824_v41 = vadd.f32 %v1823_v58, %v1734_v61  ;;  %v1535_v61 = vadd.f32 %v4740_v44, %v4687_v28  ;;  %v1530_v44 = vadd.f32 %v4722_v0, %v4687_v28 }
 0x4bb   : > { %v1934_v5 = vpop.f32.mrf.mxu0 }
 0x4bc   : > { %v1935_v20 = vadd.f32 %v1934_v5, %v4689_v16  ;;  %v1597_v5 = vmax.f32 %v1537_v3, 0.0 }
 0x4be   : > { %v1995_v63 = vmax.f32 %v1935_v20, 0.0 }
 0x4c1   : > { %v1825_v9 = vpop.f32.mrf.mxu3 }
 0x4c2   : > { %v1826_v23 = vadd.f32 %v1825_v9, %v1736_v33  ;;  %v1598_v33 = vmax.f32 %v1540_v4, 0.0  ;;  %v1599_v9 = vmax.f32 %v1542_v11, 0.0  ;;  %v1596_v4 = vmax.f32 %v1535_v61, 0.0 }
 0x4c3   : > { %v1937_v10 = vpop.f32.mrf.mxu0  ;;  %v1545_v11 = vadd.f32 %v1544_v53, %v4687_v28 }
 0x4c4   : > { %v1843_v38 = vpack.c.bf16 %v1826_v23, %v1824_v41  ;;  %v1938_v26 = vadd.f32 %v1937_v10, %v4689_v16  ;;  %v1930_v41 = vadd.f32 %v1929_v47, %v4689_v16  ;;  %v1925_v47 = vadd.f32 %v1924_v32, %v4689_v16 }
 0x4c5   : > { %v1600_v0 = vmax.f32 %v1545_v11, 0.0  ;;  %v1593_v32 = vmax.f32 %v1527_v42, 0.0  ;;  %v5190_v42 = vpack.c.bf16 %v4699_v43, %v4694_v12 }
 0x4c6   : > { %1976 = vmatmul.bf16.gmra.mxu0 %v1843_v38  ;;  %v1996_v36 = vmax.f32 %v1938_v26, 0.0  ;;  %v1994_v26 = vmax.f32 %v1933_v37, 0.0  ;;  %v1993_v20 = vmax.f32 %v1930_v41, 0.0  ;;  %v1991_v61 = vmax.f32 %v1925_v47, 0.0 }
 0x4c8   : > { %v2028_v10 = vadd.f32 %v1996_v36, %v1598_v33  ;;  %v2026_v37 = vadd.f32 %v1994_v26, %v1596_v4  ;;  %v1594_v33 = vmax.f32 %v1530_v44, 0.0  ;;  %v2023_v29 = vadd.f32 %v1991_v61, %v1593_v32 }
 0x4c9   : > { %v1550_v26 = vadd.f32 %v1549_v24, %v4687_v28  ;;  %v5187_v4 = vpack.c.bf16 %v4745_v55, %v4738_v6  ;;  %v5189_v24 = vpack.c.bf16 %v4715_v57, %v4708_v51 }
 0x4ca   : > { %v2024_v41 = vadd.f32 %v1992_v18, %v1594_v33  ;;  %v2068_v50 = vpack.c.bf16 %v2023_v29, %v4752_v40 }
 0x4cb   : > { %v1939_v46 = vpop.f32.mrf.mxu0  ;;  %v1602_v11 = vmax.f32 %v1550_v26, 0.0 }
 0x4cc   : > { %v1940_v58 = vadd.f32 %v1939_v46, %v4689_v16  ;;  %v2027_v46 = vadd.f32 %v1995_v63, %v1597_v5  ;;  %v1554_v5 = vpop.f32.mrf.mxu1 }
 0x4cd   : > { %v1555_v6 = vadd.f32 %v1554_v5, %v4687_v28 }
 0x4ce   : > { %v1997_v23 = vmax.f32 %v1940_v58, 0.0 }
 0x4d0   : > { %v2029_v38 = vadd.f32 %v1997_v23, %v1599_v9  ;;  %v2025_v9 = vadd.f32 %v1993_v20, %v1595_v15  ;;  %v2070_v23 = vpack.c.bf16 %v2027_v46, %v2026_v37  ;;  %v5188_v46 = vpack.c.bf16 %v4731_v25, %v4724_v19 }
 0x4d1   : > { %v1604_v19 = vmax.f32 %v1555_v6, 0.0 }
 0x4d2   : > { %v2071_v58 = vpack.c.bf16 %v2029_v38, %v2028_v10  ;;  %v2069_v10 = vpack.c.bf16 %v2025_v9, %v2024_v41 }
 0x4d3   : > { %v1942_v3 = vpop.f32.mrf.mxu0 }
 0x4d4   : > { %v1943_v36 = vadd.f32 %v1942_v3, %v4689_v16  ;;  %2080 = vmatpush.bf16.msra.mxu1 %v2071_v58  ;;  %v4784_v38 = vpop.f32.mrf.mxu1 }
 0x4d6   : > { %v1998_v53 = vmax.f32 %v1943_v36, 0.0 }
 0x4d8   : > { %v4778_v63 = vadd.f32 %v1998_v53, %v1600_v0  ;;  %2081 = vmatpush.bf16.msra.mxu1 %v2070_v23 }
 0x4db   : > { %v4780_v27 = vpop.f32.mrf.mxu0 }
 0x4dc   : > { %2082 = vmatpush.bf16.msra.mxu1 %v2069_v10  ;;  %v1559_v58 = vpop.f32.mrf.mxu1 }
 0x4dd   : > { %v1560_v36 = vadd.f32 %v1559_v58, %v4687_v28 }
 0x4df   : > { %v1606_v33 = vmax.f32 %v1560_v36, 0.0 }
 0x4e0   : > { %2083 = vmatpush.bf16.msra.mxu1 %v2068_v50 }
 0x4e3   : > { %v1947_v15 = vpop.f32.mrf.mxu0 }
 0x4e4   : > { %v1948_v44 = vadd.f32 %v1947_v15, %v4689_v16  ;;  %2084 = vmatpush.bf16.msra.mxu1 %v5187_v4  ;;  %v4806_v18 = vpop.f32.mrf.mxu1 }
 0x4e6   : > { %v2000_v47 = vmax.f32 %v1948_v44, 0.0 }
 0x4e8   : > { %v4790_v20 = vadd.f32 %v2000_v47, %v1602_v11  ;;  %2085 = vmatpush.bf16.msra.mxu1 %v5188_v46 }
 0x4eb   : > { %v4795_v40 = vpop.f32.mrf.mxu0 }
 0x4ec   : > { %2086 = vmatpush.bf16.msra.mxu1 %v5189_v24  ;;  %v1564_v57 = vpop.f32.mrf.mxu1 }
 0x4ed   : > { %v1565_v53 = vadd.f32 %v1564_v57, %v4687_v28 }
 0x4ef   : > { %v1608_v5 = vmax.f32 %v1565_v53, 0.0 }
 0x4f0   : > { %2087 = vmatpush.bf16.msra.mxu1 %v5190_v42 }
 0x4f3   : > { %v1952_v55 = vpop.f32.mrf.mxu0  ;;  %2088 = vmatmul.bf16.vlgmr.msra.gmra.mxu1 %v4113_v52 }
 0x4f4   : > { %v1953_v3 = vadd.f32 %v1952_v55, %v4689_v16  ;;  %v1566_v61 = vpop.f32.mrf.mxu1 }
 0x4f6   : > { %v2002_v25 = vmax.f32 %v1953_v3, 0.0 }
 0x4f8   : > { %v4808_v37 = vadd.f32 %v2002_v25, %v1604_v19 }
 0x4fb   : > { %v4810_v51 = vpop.f32.mrf.mxu0 }
 0x4fc   : > { %v1569_v41 = vpop.f32.mrf.mxu1 }
 0x503   : > { %v1957_v12 = vpop.f32.mrf.mxu0  ;;  %2093 = vmatmul.bf16.gmra.mxu1 %v4123_v59 }
 0x504   : > { %v1958_v43 = vadd.f32 %v1957_v12, %v4689_v16  ;;  %v1571_v50 = vpop.f32.mrf.mxu1 }
 0x506   : > { %v2004_v52 = vmax.f32 %v1958_v43, 0.0 }
 0x508   : > { %v4815_v0 = vadd.f32 %v2004_v52, %v1606_v33  ;;  %v1572_v52 = vadd.f32 %v1571_v50, %v4687_v28 }
 0x50b   : > { %v1959_v9 = vpop.f32.mrf.mxu0 }
 0x50c   : > { %v1574_v15 = vpop.f32.mrf.mxu1 }
 0x50d   : > { %v1575_v57 = vadd.f32 %v1574_v15, %v4687_v28 }
 0x513   : > { %v1962_v23 = vpop.f32.mrf.mxu0  ;;  %2098 = vmatmul.bf16.gmra.mxu1 %v4133_v1 }
 0x514   : > { %v1963_v32 = vadd.f32 %v1962_v23, %v4689_v16  ;;  %v1576_v4 = vpop.f32.mrf.mxu1 }
 0x515   : > { %v1577_v55 = vadd.f32 %v1576_v4, %v4687_v28  ;;  %v1570_v4 = vadd.f32 %v1569_v41, %v4687_v28 }
 0x516   : > { %v2006_v29 = vmax.f32 %v1963_v32, 0.0 }
 0x517   : > { %v1613_v53 = vmax.f32 %v1577_v55, 0.0 }
 0x518   : > { %v4820_v10 = vadd.f32 %v2006_v29, %v1608_v5 }
 0x51b   : > { %v1964_v59 = vpop.f32.mrf.mxu0 }
 0x51c   : > { %v1579_v1 = vpop.f32.mrf.mxu1 }
 0x51d   : > { %v1580_v42 = vadd.f32 %v1579_v1, %v4687_v28 }
 0x523   : > { %v1967_v26 = vpop.f32.mrf.mxu0  ;;  %2103 = vmatmul.bf16.gmra.mxu1 %v4143_v7 }
 0x524   : > { %v1581_v24 = vpop.f32.mrf.mxu1  ;;  %v1968_v23 = vadd.f32 %v1967_v26, %v4689_v16  ;;  %v1610_v26 = vmax.f32 %v1570_v4, 0.0 }
 0x525   : > { %v1582_v6 = vadd.f32 %v1581_v24, %v4687_v28  ;;  %v1611_v24 = vmax.f32 %v1572_v52, 0.0 }
 0x526   : > { %v2008_v50 = vmax.f32 %v1968_v23, 0.0 }
 0x527   : > { %v1615_v36 = vmax.f32 %v1582_v6, 0.0 }
 0x52b   : > { %v1969_v44 = vpop.f32.mrf.mxu0 }
 0x52c   : > { %v1970_v12 = vadd.f32 %v1969_v44, %v4689_v16  ;;  %v1567_v44 = vadd.f32 %v1566_v61, %v4687_v28 }
 0x52e   : > { %v2009_v15 = vmax.f32 %v1970_v12, 0.0  ;;  %v1609_v55 = vmax.f32 %v1567_v44, 0.0  ;;  %v1552_v12 = vadd.f32 %v4768_v35, %v4687_v28 }
 0x533   : > { %v1972_v11 = vpop.f32.mrf.mxu0  ;;  %2108 = vmatmul.bf16.gmra.mxu1 %v4153_v13 }
 0x534   : > { %v1973_v19 = vadd.f32 %v1972_v11, %v4689_v16  ;;  %v1612_v11 = vmax.f32 %v1575_v57, 0.0 }
 0x536   : > { %v2010_v32 = vmax.f32 %v1973_v19, 0.0 }
 0x53b   : > { %v1974_v47 = vpop.f32.mrf.mxu0 }
 0x53c   : > { %v1975_v7 = vadd.f32 %v1974_v47, %v4689_v16  ;;  %v1965_v47 = vadd.f32 %v1964_v59, %v4689_v16  ;;  %v1562_v59 = vadd.f32 %v4806_v18, %v4687_v28 }
 0x53e   : > { %v2011_v43 = vmax.f32 %v1975_v7, 0.0  ;;  %v2007_v6 = vmax.f32 %v1965_v47, 0.0  ;;  %v2041_v7 = vadd.f32 %v2009_v15, %v1611_v24  ;;  %v1607_v57 = vmax.f32 %v1562_v59, 0.0 }
 0x540   : > { %v2043_v1 = vadd.f32 %v2011_v43, %v1613_v53  ;;  %v2039_v19 = vadd.f32 %v2007_v6, %v1609_v55  ;;  %v1603_v53 = vmax.f32 %v1552_v12, 0.0 }
 0x542   : > { %v2076_v18 = vpack.c.bf16 %v2039_v19, %v4820_v10  ;;  %v5197_v19 = vld [vmem:[#allocation13_spill] sm:$0xff] }
 0x543   : > { %v1977_v46 = vpop.f32.mrf.mxu0  ;;  %2113 = vmatmul.bf16.gmra.mxu1 %v4169_v21  ;;  %v1614_v21 = vmax.f32 %v1580_v42, 0.0  ;;  %v1960_v42 = vadd.f32 %v1959_v9, %v4689_v16  ;;  %v1950_v9 = vadd.f32 %v4795_v40, %v4689_v16  ;;  %v1547_v40 = vadd.f32 %v4754_v48, %v4687_v28  ;;  %v3612_v48 = vld [vmem:[%s5127_s2 + $0xd0] sm:$0xff] }
 0x544   : > { %v1978_v58 = vadd.f32 %v1977_v46, %v4689_v16 }
 0x545   : > { %v2005_v61 = vmax.f32 %v1960_v42, 0.0 }
 0x546   : > { %v2012_v13 = vmax.f32 %v1978_v58, 0.0  ;;  %v2042_v58 = vadd.f32 %v2010_v32, %v1612_v11  ;;  %v1601_v32 = vmax.f32 %v1547_v40, 0.0  ;;  %v5199_v40 = vld [vmem:[#allocation17_spill] sm:$0xff] }
 0x548   : > { %v2044_v5 = vadd.f32 %v2012_v13, %v1614_v21  ;;  %v2078_v41 = vpack.c.bf16 %v2043_v1, %v2042_v58 }
 0x54b   : > { %v1979_v3 = vpop.f32.mrf.mxu0 }
 0x54c   : > { %v1980_v25 = vadd.f32 %v1979_v3, %v4689_v16  ;;  %v2040_v3 = vadd.f32 %v2008_v50, %v1610_v26 }
 0x54e   : > { %v2013_v33 = vmax.f32 %v1980_v25, 0.0  ;;  %v2077_v13 = vpack.c.bf16 %v2041_v7, %v2040_v3  ;;  %v1557_v25 = vadd.f32 %v4784_v38, %v4687_v28  ;;  %v5196_v7 = vld [vmem:[#allocation12_spill] sm:$0xff] }
 0x550   : > { %v2045_v29 = vadd.f32 %v2013_v33, %v1615_v36  ;;  %v2037_v36 = vadd.f32 %v2005_v61, %v1607_v57  ;;  %v1605_v43 = vmax.f32 %v1557_v25, 0.0  ;;  %v2001_v33 = vmax.f32 %v1950_v9, 0.0 }
 0x552   : > { %v2079_v46 = vpack.c.bf16 %v2045_v29, %v2044_v5  ;;  %v2075_v38 = vpack.c.bf16 %v2037_v36, %v4815_v0  ;;  %v2033_v23 = vadd.f32 %v2001_v33, %v1603_v53  ;;  %v5195_v29 = vld [vmem:[#allocation18_spill] sm:$0xff] }
 0x553   : > { %2118 = vmatmul.bf16.gmra.mxu1 %v4188_v30  ;;  %v1955_v30 = vadd.f32 %v4810_v51, %v4689_v16  ;;  %v1945_v51 = vadd.f32 %v4780_v27, %v4689_v16 }
 0x554   : > { %2169 = vmatpush.bf16.msra.mxu2 %v2079_v46  ;;  %v2073_v16 = vpack.c.bf16 %v2033_v23, %v4790_v20 }
 0x555   : > { %v2003_v21 = vmax.f32 %v1955_v30, 0.0  ;;  %v1999_v10 = vmax.f32 %v1945_v51, 0.0 }
 0x557   : > { %v2035_v52 = vadd.f32 %v2003_v21, %v1605_v43  ;;  %v2031_v5 = vadd.f32 %v1999_v10, %v1601_v32 }
 0x558   : > { %2170 = vmatpush.bf16.msra.mxu2 %v2078_v41 }
 0x559   : > { %v2074_v35 = vpack.c.bf16 %v2035_v52, %v4808_v37  ;;  %v2072_v27 = vpack.c.bf16 %v2031_v5, %v4778_v63  ;;  %v5193_v63 = vld [vmem:[#allocation16_spill] sm:$0xff]  ;;  %v5194_v37 = vld [vmem:[#allocation10_spill] sm:$0xff] }
 0x55c   : > { %2171 = vmatpush.bf16.msra.mxu2 %v2077_v13 }
 0x560   : > { %2172 = vmatpush.bf16.msra.mxu2 %v2076_v18  ;;  %v5198_v18 = vld [vmem:[#allocation15_spill] sm:$0xff] }
 0x563   : > { %2123 = vmatmul.bf16.gmra.mxu1 %v4207_v39 }
 0x564   : > { %2173 = vmatpush.bf16.msra.mxu2 %v2075_v38 }
 0x568   : > { %2174 = vmatpush.bf16.msra.mxu2 %v2074_v35 }
 0x56c   : > { %2175 = vmatpush.bf16.msra.mxu2 %v2073_v16 }
 0x570   : > { %2176 = vmatpush.bf16.msra.mxu2 %v2072_v27  ;;  %v5200_v27 = vld [vmem:[#allocation19_spill] sm:$0xff] }
 0x573   : > { %2177 = vmatmul.bf16.vlgmr.msra.gmra.mxu2 %v4115_v54  ;;  %2128 = vmatmul.bf16.gmra.mxu1 %v4217_v45  ;;  %v3619_v54 = vld [vmem:[%s5127_s2 + $0x108] sm:$0xff] }
 0x574   : > { %2323 = vmatpush.bf16.msra.mxu3 %v3619_v54  ;;  %v5191_v45 = vld [vmem:[#allocation14_spill] sm:$0xff] }
 0x583   : > { %2182 = vmatmul.bf16.gmra.mxu2 %v4125_v60  ;;  %2133 = vmatmul.bf16.gmra.mxu1 %v4227_v62  ;;  %v3618_v60 = vld [vmem:[%s5127_s2 + $0x100] sm:$0xff] }
 0x584   : > { %2324 = vmatpush.bf16.msra.mxu3 %v3618_v60  ;;  %v3614_v62 = vld [vmem:[%s5127_s2 + $0xe0] sm:$0xff] }
 0x593   : > { %2187 = vmatmul.bf16.gmra.mxu2 %v4135_v2  ;;  %2138 = vmatmul.bf16.gmra.mxu1 %v4237_v17  ;;  %v3617_v2 = vld [vmem:[%s5127_s2 + $0xf8] sm:$0xff] }
 0x594   : > { %2325 = vmatpush.bf16.msra.mxu3 %v3617_v2  ;;  %v3613_v17 = vld [vmem:[%s5127_s2 + $0xd8] sm:$0xff] }
 0x5a3   : > { %2192 = vmatmul.bf16.gmra.mxu2 %v4145_v8  ;;  %2143 = vmatmul.bf16.gmra.mxu1 %v4247_v34  ;;  %v2089_v8 = vpop.f32.mrf.mxu1 }
 0x5ab   : > { %v2091_v39 = vpop.f32.mrf.mxu1 }
 0x5b3   : > { %2197 = vmatmul.bf16.gmra.mxu2 %v4155_v14  ;;  %v3616_v14 = vld [vmem:[%s5127_s2 + $0xf0] sm:$0xff]  ;;  %2148 = vmatmul.bf16.gmra.mxu1 %v5191_v45  ;;  %v2094_v34 = vpop.f32.mrf.mxu1  ;;  %v5201_v45 = vld [vmem:[#allocation20_spill] sm:$0xff] }
 0x5b4   : > { %2326 = vmatpush.bf16.msra.mxu3 %v3616_v14 }
 0x5bb   : > { %v2096_v28 = vpop.f32.mrf.mxu1 }
 0x5c3   : > { %2202 = vmatmul.bf16.gmra.mxu2 %v4171_v22  ;;  %v3615_v22 = vld [vmem:[%s5127_s2 + $0xe8] sm:$0xff]  ;;  %2153 = vmatmul.bf16.gmra.mxu1 %v5193_v63  ;;  %v2099_v20 = vpop.f32.mrf.mxu1 }
 0x5c4   : > { %2327 = vmatpush.bf16.msra.mxu3 %v3615_v22 }
 0x5c8   : > { %2328 = vmatpush.bf16.msra.mxu3 %v3614_v62 }
 0x5cb   : > { %v2101_v0 = vpop.f32.mrf.mxu1 }
 0x5cc   : > { %2329 = vmatpush.bf16.msra.mxu3 %v3613_v17 }
 0x5d0   : > { %2330 = vmatpush.bf16.msra.mxu3 %v3612_v48 }
 0x5d3   : > { %2207 = vmatmul.bf16.gmra.mxu2 %v4190_v31  ;;  %v5192_v31 = vld [vmem:[#allocation9_spill] sm:$0xff]  ;;  %2158 = vmatmul.bf16.gmra.mxu1 %v5195_v29  ;;  %v2104_v11 = vpop.f32.mrf.mxu1 }
 0x5db   : > { %v2106_v44 = vpop.f32.mrf.mxu1 }
 0x5e3   : > { %2212 = vmatmul.bf16.gmra.mxu2 %v5192_v31  ;;  %2163 = vmatmul.bf16.gmra.mxu1 %v4291_v56  ;;  %v2109_v50 = vpop.f32.mrf.mxu1 }
 0x5eb   : > { %v2111_v41 = vpop.f32.mrf.mxu1 }
 0x5f3   : > { %2217 = vmatmul.bf16.gmra.mxu2 %v5194_v37  ;;  %v2114_v55 = vpop.f32.mrf.mxu1 }
 0x5f6   : > { %v2178_v4 = vpop.f32.mrf.mxu2 }
 0x5f7   : > { %v2179_v15 = vadd.f32 %v2178_v4, %v2089_v8 }
 0x5fb   : > { %v2116_v56 = vpop.f32.mrf.mxu1 }
 0x5fe   : > { %v2180_v47 = vpop.f32.mrf.mxu2 }
 0x5ff   : > { %v2181_v1 = vadd.f32 %v2180_v47, %v2091_v39  ;;  %v2062_v47 = vld [vmem:[%s5127_s2 + $0x118] sm:$0x1] }
 0x601   : > { %v2258_v46 = vpack.c.bf16 %v2181_v1, %v2179_v15  ;;  %v2063_v15 = vunpack.c.l.bf16 %v2062_v47 }
 0x603   : > { %2222 = vmatmul.bf16.gmra.mxu2 %v5180_v49  ;;  %2331 = vmatmul.bf16.vlgmr.msra.gmra.mxu3 %v2258_v46  ;;  %v2119_v21 = vpop.f32.mrf.mxu1 }
 0x606   : > { %v2183_v24 = vpop.f32.mrf.mxu2 }
 0x607   : > { %v2184_v26 = vadd.f32 %v2183_v24, %v2094_v34 }
 0x60b   : > { %v2121_v43 = vpop.f32.mrf.mxu1 }
 0x60e   : > { %v2185_v58 = vpop.f32.mrf.mxu2 }
 0x60f   : > { %v2186_v42 = vadd.f32 %v2185_v58, %v2096_v28 }
 0x611   : > { %v2259_v6 = vpack.c.bf16 %v2186_v42, %v2184_v26 }
 0x613   : > { %2227 = vmatmul.bf16.gmra.mxu2 %v5196_v7  ;;  %2336 = vmatmul.bf16.gmra.mxu3 %v2259_v6  ;;  %v2124_v53 = vpop.f32.mrf.mxu1 }
 0x616   : > { %v2188_v59 = vpop.f32.mrf.mxu2 }
 0x617   : > { %v2189_v30 = vadd.f32 %v2188_v59, %v2099_v20 }
 0x61b   : > { %v2126_v23 = vpop.f32.mrf.mxu1 }
 0x61e   : > { %v2190_v3 = vpop.f32.mrf.mxu2 }
 0x61f   : > { %v2191_v61 = vadd.f32 %v2190_v3, %v2101_v0 }
 0x621   : > { %v2260_v49 = vpack.c.bf16 %v2191_v61, %v2189_v30 }
 0x623   : > { %2232 = vmatmul.bf16.gmra.mxu2 %v5197_v19  ;;  %2341 = vmatmul.bf16.gmra.mxu3 %v2260_v49  ;;  %v2129_v60 = vpop.f32.mrf.mxu1 }
 0x626   : > { %v2193_v13 = vpop.f32.mrf.mxu2 }
 0x627   : > { %v2194_v57 = vadd.f32 %v2193_v13, %v2104_v11 }
 0x62b   : > { %v2131_v39 = vpop.f32.mrf.mxu1 }
 0x62e   : > { %v2195_v25 = vpop.f32.mrf.mxu2 }
 0x62f   : > { %v2196_v9 = vadd.f32 %v2195_v25, %v2106_v44  ;;  %v4912_v44 = vperm.slane %v2063_v15, 0 }
 0x631   : > { %v2261_v36 = vpack.c.bf16 %v2196_v9, %v2194_v57 }
 0x633   : > { %2237 = vmatmul.bf16.gmra.mxu2 %v5198_v18  ;;  %2346 = vmatmul.bf16.gmra.mxu3 %v2261_v36  ;;  %v2134_v17 = vpop.f32.mrf.mxu1 }
 0x636   : > { %v2198_v12 = vpop.f32.mrf.mxu2 }
 0x637   : > { %v2199_v33 = vadd.f32 %v2198_v12, %v2109_v50 }
 0x63b   : > { %v2136_v63 = vpop.f32.mrf.mxu1 }
 0x63e   : > { %v2200_v51 = vpop.f32.mrf.mxu2 }
 0x63f   : > { %v2201_v52 = vadd.f32 %v2200_v51, %v2111_v41 }
 0x641   : > { %v2262_v38 = vpack.c.bf16 %v2201_v52, %v2199_v33 }
 0x643   : > { %2242 = vmatmul.bf16.gmra.mxu2 %v5199_v40  ;;  %2351 = vmatmul.bf16.gmra.mxu3 %v2262_v38  ;;  %v2139_v4 = vpop.f32.mrf.mxu1 }
 0x646   : > { %v2203_v10 = vpop.f32.mrf.mxu2 }
 0x647   : > { %v2204_v32 = vadd.f32 %v2203_v10, %v2114_v55 }
 0x64b   : > { %v2141_v24 = vpop.f32.mrf.mxu1 }
 0x64e   : > { %v2205_v35 = vpop.f32.mrf.mxu2 }
 0x64f   : > { %v2206_v5 = vadd.f32 %v2205_v35, %v2116_v56 }
 0x651   : > { %v2263_v16 = vpack.c.bf16 %v2206_v5, %v2204_v32 }
 0x653   : > { %2247 = vmatmul.bf16.gmra.mxu2 %v5200_v27  ;;  %2356 = vmatmul.bf16.gmra.mxu3 %v2263_v16  ;;  %v2144_v3 = vpop.f32.mrf.mxu1 }
 0x656   : > { %v2208_v54 = vpop.f32.mrf.mxu2 }
 0x657   : > { %v2209_v8 = vadd.f32 %v2208_v54, %v2119_v21 }
 0x65b   : > { %v2146_v56 = vpop.f32.mrf.mxu1 }
 0x65e   : > { %v2210_v2 = vpop.f32.mrf.mxu2 }
 0x65f   : > { %v2211_v14 = vadd.f32 %v2210_v2, %v2121_v43 }
 0x661   : > { %v2264_v22 = vpack.c.bf16 %v2211_v14, %v2209_v8 }
 0x663   : > { %2252 = vmatmul.bf16.gmra.mxu2 %v5201_v45  ;;  %2361 = vmatmul.bf16.gmra.mxu3 %v2264_v22  ;;  %v2149_v52 = vpop.f32.mrf.mxu1 }
 0x666   : > { %v2213_v62 = vpop.f32.mrf.mxu2 }
 0x667   : > { %v2214_v48 = vadd.f32 %v2213_v62, %v2124_v53 }
 0x66b   : > { %v2151_v27 = vpop.f32.mrf.mxu1 }
 0x66e   : > { %v2215_v34 = vpop.f32.mrf.mxu2 }
 0x66f   : > { %v2216_v31 = vadd.f32 %v2215_v34, %v2126_v23 }
 0x671   : > { %v2265_v28 = vpack.c.bf16 %v2216_v31, %v2214_v48 }
 0x673   : > { %2366 = vmatmul.bf16.gmra.mxu3 %v2265_v28  ;;  %v2154_v8 = vpop.f32.mrf.mxu1 }
 0x676   : > { %v2218_v20 = vpop.f32.mrf.mxu2 }
 0x677   : > { %v2219_v0 = vadd.f32 %v2218_v20, %v2129_v60 }
 0x67e   : > { %v2220_v37 = vpop.f32.mrf.mxu2 }
 0x67f   : > { %v2221_v29 = vadd.f32 %v2220_v37, %v2131_v39 }
 0x681   : > { %v2266_v11 = vpack.c.bf16 %v2221_v29, %v2219_v0 }
 0x683   : > { %2371 = vmatmul.bf16.gmra.mxu3 %v2266_v11 }
 0x686   : > { %v2223_v1 = vpop.f32.mrf.mxu2  ;;  %v2332_v46 = vpop.f32.mrf.mxu3 }
 0x687   : > { %v2333_v50 = vadd.f32 %v2332_v46, %v4912_v44  ;;  %v2224_v42 = vadd.f32 %v2223_v1, %v2134_v17 }
 0x689   : > { %v2412_v41 = vmax.f32 %v2333_v50, 0.0 }
 0x68e   : > { %v2225_v58 = vpop.f32.mrf.mxu2  ;;  %v2334_v26 = vpop.f32.mrf.mxu3 }
 0x68f   : > { %v2226_v6 = vadd.f32 %v2225_v58, %v2136_v63  ;;  %v2335_v7 = vadd.f32 %v2334_v26, %v4912_v44  ;;  %v2156_v63 = vpop.f32.mrf.mxu1 }
 0x691   : > { %v2267_v59 = vpack.c.bf16 %v2226_v6, %v2224_v42  ;;  %v2413_v55 = vmax.f32 %v2335_v7, 0.0 }
 0x693   : > { %2376 = vmatmul.bf16.gmra.mxu3 %v2267_v59  ;;  %v4916_v30 = vpack.c.bf16 %v2413_v55, %v2412_v41 }
 0x696   : > { %v2228_v61 = vpop.f32.mrf.mxu2  ;;  %v2337_v49 = vpop.f32.mrf.mxu3 }
 0x697   : > { %v2338_v19 = vadd.f32 %v2337_v49, %v4912_v44  ;;  %v2229_v57 = vadd.f32 %v2228_v61, %v2139_v4  ;;  %v2159_v11 = vpop.f32.mrf.mxu1 }
 0x699   : > { %v2414_v36 = vmax.f32 %v2338_v19, 0.0 }
 0x69e   : > { %v2230_v13 = vpop.f32.mrf.mxu2  ;;  %v2339_v25 = vpop.f32.mrf.mxu3 }
 0x69f   : > { %v2231_v9 = vadd.f32 %v2230_v13, %v2141_v24  ;;  %v2340_v21 = vadd.f32 %v2339_v25, %v4912_v44  ;;  %v2161_v24 = vpop.f32.mrf.mxu1 }
 0x6a1   : > { %v2268_v18 = vpack.c.bf16 %v2231_v9, %v2229_v57  ;;  %v2415_v12 = vmax.f32 %v2340_v21, 0.0 }
 0x6a3   : > { %2381 = vmatmul.bf16.gmra.mxu3 %v2268_v18  ;;  %v4920_v43 = vpack.c.bf16 %v2415_v12, %v2414_v36 }
 0x6a6   : > { %v2233_v51 = vpop.f32.mrf.mxu2  ;;  %v2342_v33 = vpop.f32.mrf.mxu3 }
 0x6a7   : > { %v2343_v38 = vadd.f32 %v2342_v33, %v4912_v44  ;;  %v2234_v10 = vadd.f32 %v2233_v51, %v2144_v3  ;;  %v2164_v7 = vpop.f32.mrf.mxu1 }
 0x6a9   : > { %v2416_v32 = vmax.f32 %v2343_v38, 0.0 }
 0x6ae   : > { %v2235_v40 = vpop.f32.mrf.mxu2  ;;  %v2344_v53 = vpop.f32.mrf.mxu3 }
 0x6af   : > { %v2236_v23 = vadd.f32 %v2235_v40, %v2146_v56  ;;  %v2345_v35 = vadd.f32 %v2344_v53, %v4912_v44  ;;  %v2166_v55 = vpop.f32.mrf.mxu1 }
 0x6b1   : > { %v2269_v5 = vpack.c.bf16 %v2236_v23, %v2234_v10  ;;  %v2417_v16 = vmax.f32 %v2345_v35, 0.0 }
 0x6b3   : > { %2386 = vmatmul.bf16.gmra.mxu3 %v2269_v5  ;;  %v4924_v54 = vpack.c.bf16 %v2417_v16, %v2416_v32 }
 0x6b6   : > { %v2238_v60 = vpop.f32.mrf.mxu2  ;;  %v2347_v2 = vpop.f32.mrf.mxu3 }
 0x6b7   : > { %v2348_v14 = vadd.f32 %v2347_v2, %v4912_v44  ;;  %v2239_v45 = vadd.f32 %v2238_v60, %v2149_v52 }
 0x6b9   : > { %v2418_v34 = vmax.f32 %v2348_v14, 0.0 }
 0x6be   : > { %v2240_v22 = vpop.f32.mrf.mxu2  ;;  %v2349_v39 = vpop.f32.mrf.mxu3 }
 0x6bf   : > { %v2241_v62 = vadd.f32 %v2240_v22, %v2151_v27  ;;  %v2350_v17 = vadd.f32 %v2349_v39, %v4912_v44 }
 0x6c1   : > { %v2270_v48 = vpack.c.bf16 %v2241_v62, %v2239_v45  ;;  %v2419_v31 = vmax.f32 %v2350_v17, 0.0 }
 0x6c3   : > { %2391 = vmatmul.bf16.gmra.mxu3 %v2270_v48  ;;  %v2447_v28 = vpack.c.bf16 %v2419_v31, %v2418_v34 }
 0x6c6   : > { %v2243_v20 = vpop.f32.mrf.mxu2  ;;  %v2352_v37 = vpop.f32.mrf.mxu3 }
 0x6c7   : > { %v2244_v4 = vadd.f32 %v2243_v20, %v2154_v8  ;;  %v2353_v32 = vadd.f32 %v2352_v37, %v4912_v44 }
 0x6c9   : > { %v2420_v60 = vmax.f32 %v2353_v32, 0.0 }
 0x6ce   : > { %v2245_v0 = vpop.f32.mrf.mxu2  ;;  %v2354_v29 = vpop.f32.mrf.mxu3 }
 0x6cf   : > { %v2246_v47 = vadd.f32 %v2245_v0, %v2156_v63  ;;  %v2355_v10 = vadd.f32 %v2354_v29, %v4912_v44  ;;  %v3395_v0 = vld [vmem:[%s3968_s6 + $0x100] sm:$0xf]  ;;  %v3557_v29 = vld [vmem:[%s3968_s6 + $0x104] sm:$0xf0] }
 0x6d1   : > { %v2271_v15 = vpack.c.bf16 %v2246_v47, %v2244_v4  ;;  %v2421_v16 = vmax.f32 %v2355_v10, 0.0  ;;  %v3561_v10 = vld [vmem:[%s3968_s6 + $0x124] sm:$0xf0] }
 0x6d3   : > { %2396 = vmatmul.bf16.gmra.mxu3 %v2271_v15  ;;  %v2448_v8 = vpack.c.bf16 %v2421_v16, %v2420_v60 }
 0x6d6   : > { %v2248_v1 = vpop.f32.mrf.mxu2  ;;  %v2357_v46 = vpop.f32.mrf.mxu3 }
 0x6d7   : > { %v2249_v26 = vadd.f32 %v2248_v1, %v2159_v11  ;;  %v2358_v38 = vadd.f32 %v2357_v46, %v4912_v44 }
 0x6d9   : > { %v2422_v5 = vmax.f32 %v2358_v38, 0.0 }
 0x6de   : > { %v2250_v50 = vpop.f32.mrf.mxu2  ;;  %v2359_v58 = vpop.f32.mrf.mxu3 }
 0x6df   : > { %v2251_v42 = vadd.f32 %v2250_v50, %v2161_v24  ;;  %v2360_v51 = vadd.f32 %v2359_v58, %v4912_v44 }
 0x6e1   : > { %v2272_v6 = vpack.c.bf16 %v2251_v42, %v2249_v26  ;;  %v2423_v23 = vmax.f32 %v2360_v51, 0.0  ;;  %v3403_v42 = vld [vmem:[%s3968_s6 + $0x110] sm:$0xf] }
 0x6e3   : > { %2401 = vmatmul.bf16.gmra.mxu3 %v2272_v6  ;;  %v2449_v27 = vpack.c.bf16 %v2423_v23, %v2422_v5  ;;  %v3559_v6 = vld [vmem:[%s3968_s6 + $0x114] sm:$0xf0] }
 0x6e6   : > { %v2253_v41 = vpop.f32.mrf.mxu2  ;;  %v2362_v59 = vpop.f32.mrf.mxu3 }
 0x6e7   : > { %v2254_v49 = vadd.f32 %v2253_v41, %v2164_v7  ;;  %v2363_v36 = vadd.f32 %v2362_v59, %v4912_v44 }
 0x6e9   : > { %v2424_v40 = vmax.f32 %v2363_v36, 0.0 }
 0x6ee   : > { %v2255_v3 = vpop.f32.mrf.mxu2  ;;  %v2364_v61 = vpop.f32.mrf.mxu3 }
 0x6ef   : > { %v2256_v19 = vadd.f32 %v2255_v3, %v2166_v55  ;;  %v2365_v9 = vadd.f32 %v2364_v61, %v4912_v44  ;;  %v3404_v55 = vor.u32 %v3559_v6, %v3403_v42  ;;  %v3571_v42 = vld [vmem:[%s3968_s6 + $0x174] sm:$0xf0]  ;;  %v3626_v6 = vld [vmem:[%s5127_s2 + $0x150] sm:$0xff] }
 0x6f1   : > { %v2273_v56 = vpack.c.bf16 %v2256_v19, %v2254_v49  ;;  %v2425_v33 = vmax.f32 %v2365_v9, 0.0 }
 0x6f3   : > { %2406 = vmatmul.bf16.gmra.mxu3 %v2273_v56  ;;  %v2450_v35 = vpack.c.bf16 %v2425_v33, %v2424_v40  ;;  %v3411_v40 = vld [vmem:[%s3968_s6 + $0x120] sm:$0xf] }
 0x6f4   : > { %v3412_v5 = vor.u32 %v3561_v10, %v3411_v40 }
 0x6f6   : > { %v2367_v13 = vpop.f32.mrf.mxu3 }
 0x6f7   : > { %v2368_v25 = vadd.f32 %v2367_v13, %v4912_v44 }
 0x6f9   : > { %v2426_v18 = vmax.f32 %v2368_v25, 0.0 }
 0x6fe   : > { %v2369_v57 = vpop.f32.mrf.mxu3 }
 0x6ff   : > { %v2370_v21 = vadd.f32 %v2369_v57, %v4912_v44 }
 0x701   : > { %v2427_v12 = vmax.f32 %v2370_v21, 0.0 }
 0x703   : > { %v2451_v52 = vpack.c.bf16 %v2427_v12, %v2426_v18 }
 0x705   : > { %2540 = vmatpush.bf16.msrb.mxu0 %v2451_v52 }
 0x706   : > { %v4934_v53 = vpop.f32.mrf.mxu3 }
 0x707   : > { %v2373_v16 = vadd.f32 %v4934_v53, %v4912_v44  ;;  %v3563_v53 = vld [vmem:[%s3968_s6 + $0x134] sm:$0xf0] }
 0x709   : > { %2541 = vmatpush.bf16.msrb.mxu0 %v2450_v35 }
 0x70d   : > { %2542 = vmatpush.bf16.msrb.mxu0 %v2449_v27 }
 0x70e   : > { %v4938_v2 = vpop.f32.mrf.mxu3 }
 0x70f   : > { %v2375_v23 = vadd.f32 %v4938_v2, %v4912_v44  ;;  %v3556_v2 = vld [vmem:[%s3968_s6 + $0x104] sm:$0xf] }
 0x711   : > { %2543 = vmatpush.bf16.msrb.mxu0 %v2448_v8  ;;  %v2429_v60 = vmax.f32 %v2375_v23, 0.0 }
 0x715   : > { %2544 = vmatpush.bf16.msrb.mxu0 %v2447_v28 }
 0x716   : > { %v2377_v14 = vpop.f32.mrf.mxu3 }
 0x717   : > { %v2378_v52 = vadd.f32 %v2377_v14, %v4912_v44  ;;  %v2428_v14 = vmax.f32 %v2373_v16, 0.0 }
 0x719   : > { %2545 = vmatpush.bf16.msrb.mxu0 %v4924_v54  ;;  %v3396_v54 = vor.u32 %v3557_v29, %v3395_v0  ;;  %v2430_v27 = vmax.f32 %v2378_v52, 0.0  ;;  %v3435_v29 = vld [vmem:[%s3968_s6 + $0x150] sm:$0xf] }
 0x71d   : > { %2546 = vmatpush.bf16.msrb.mxu0 %v4920_v43 }
 0x71e   : > { %v2379_v22 = vpop.f32.mrf.mxu3 }
 0x71f   : > { %v2380_v12 = vadd.f32 %v2379_v22, %v4912_v44  ;;  %v3397_v22 = vld [vmem:[%s3968_s6 + $0x108] sm:$0xf0] }
 0x721   : > { %2547 = vmatpush.bf16.msrb.mxu0 %v4916_v30  ;;  %v2431_v35 = vmax.f32 %v2380_v12, 0.0 }
 0x723   : > { %v2453_v8 = vpack.c.bf16 %v2431_v35, %v2430_v27 }
 0x724   : > { %2548 = vmatmul.bf16.vlgmr.msrb.gmra.mxu0 %v3396_v54  ;;  %v3567_v54 = vld [vmem:[%s3968_s6 + $0x154] sm:$0xf0] }
 0x726   : > { %v2382_v39 = vpop.f32.mrf.mxu3 }
 0x727   : > { %v2383_v36 = vadd.f32 %v2382_v39, %v4912_v44  ;;  %v2452_v39 = vpack.c.bf16 %v2429_v60, %v2428_v14 }
 0x729   : > { %v2432_v38 = vmax.f32 %v2383_v36, 0.0  ;;  %v3570_v36 = vld [vmem:[%s3968_s6 + $0x174] sm:$0xf] }
 0x72e   : > { %v2384_v45 = vpop.f32.mrf.mxu3 }
 0x72f   : > { %v2385_v57 = vadd.f32 %v2384_v45, %v4912_v44  ;;  %v3400_v45 = vor.u32 %v3556_v2, %v3397_v22 }
 0x731   : > { %v2433_v51 = vmax.f32 %v2385_v57, 0.0 }
 0x733   : > { %v2454_v32 = vpack.c.bf16 %v2433_v51, %v2432_v38 }
 0x734   : > { %2553 = vmatmul.bf16.gmra.mxu0 %v3404_v55 }
 0x736   : > { %v2387_v62 = vpop.f32.mrf.mxu3 }
 0x737   : > { %v2388_v13 = vadd.f32 %v2387_v62, %v4912_v44 }
 0x739   : > { %v2434_v18 = vmax.f32 %v2388_v13, 0.0 }
 0x73e   : > { %v2389_v17 = vpop.f32.mrf.mxu3 }
 0x73f   : > { %v2390_v49 = vadd.f32 %v2389_v17, %v4912_v44  ;;  %v3558_v17 = vld [vmem:[%s3968_s6 + $0x114] sm:$0xf] }
 0x741   : > { %v2435_v9 = vmax.f32 %v2390_v49, 0.0  ;;  %v3623_v49 = vld [vmem:[%s5127_s2 + $0x138] sm:$0xff] }
 0x743   : > { %v2455_v33 = vpack.c.bf16 %v2435_v9, %v2434_v18  ;;  %v3621_v9 = vld [vmem:[%s5127_s2 + $0x128] sm:$0xff]  ;;  %v3453_v18 = vld [vmem:[%s3968_s6 + $0x178] sm:$0xf0] }
 0x744   : > { %2558 = vmatmul.bf16.gmra.mxu0 %v3412_v5  ;;  %v3456_v51 = vor.u32 %v3570_v36, %v3453_v18  ;;  %v3628_v18 = vld [vmem:[%s5127_s2 + $0x168] sm:$0xff] }
 0x746   : > { %v2392_v34 = vpop.f32.mrf.mxu3 }
 0x747   : > { %v2393_v3 = vadd.f32 %v2392_v34, %v4912_v44  ;;  %v3405_v34 = vld [vmem:[%s3968_s6 + $0x118] sm:$0xf0] }
 0x749   : > { %v2436_v25 = vmax.f32 %v2393_v3, 0.0  ;;  %v3625_v3 = vld [vmem:[%s5127_s2 + $0x148] sm:$0xff] }
 0x74e   : > { %v2394_v48 = vpop.f32.mrf.mxu3 }
 0x74f   : > { %v2395_v7 = vadd.f32 %v2394_v48, %v4912_v44  ;;  %v3408_v48 = vor.u32 %v3558_v17, %v3405_v34 }
 0x751   : > { %v2437_v19 = vmax.f32 %v2395_v7, 0.0 }
 0x753   : > { %v2456_v21 = vpack.c.bf16 %v2437_v19, %v2436_v25  ;;  %v3568_v19 = vld [vmem:[%s3968_s6 + $0x164] sm:$0xf]  ;;  %v3622_v25 = vld [vmem:[%s5127_s2 + $0x130] sm:$0xff] }
 0x756   : > { %v2397_v31 = vpop.f32.mrf.mxu3 }
 0x757   : > { %v2398_v58 = vadd.f32 %v2397_v31, %v4912_v44  ;;  %v3427_v31 = vld [vmem:[%s3968_s6 + $0x140] sm:$0xf] }
 0x759   : > { %v2438_v61 = vmax.f32 %v2398_v58, 0.0  ;;  %v3627_v58 = vld [vmem:[%s5127_s2 + $0x158] sm:$0xff] }
 0x75a   : > { %2713 = vmatpush.bf16.msrb.mxu2 %v3627_v58  ;;  %v3634_v58 = vld [vmem:[%s5127_s2 + $0x198] sm:$0xff] }
 0x75e   : > { %v2399_v63 = vpop.f32.mrf.mxu3  ;;  %2714 = vmatpush.bf16.msrb.mxu2 %v3626_v6 }
 0x75f   : > { %v2400_v46 = vadd.f32 %v2399_v63, %v4912_v44  ;;  %v3565_v63 = vld [vmem:[%s3968_s6 + $0x144] sm:$0xf0] }
 0x761   : > { %v2439_v41 = vmax.f32 %v2400_v46, 0.0  ;;  %v3564_v46 = vld [vmem:[%s3968_s6 + $0x144] sm:$0xf] }
 0x762   : > { %2715 = vmatpush.bf16.msrb.mxu2 %v3625_v3 }
 0x763   : > { %v2457_v56 = vpack.c.bf16 %v2439_v41, %v2438_v61  ;;  %v3566_v41 = vld [vmem:[%s3968_s6 + $0x154] sm:$0xf]  ;;  %v3624_v61 = vld [vmem:[%s5127_s2 + $0x140] sm:$0xff] }
 0x766   : > { %v2402_v20 = vpop.f32.mrf.mxu3  ;;  %2716 = vmatpush.bf16.msrb.mxu2 %v3624_v61 }
 0x767   : > { %v2403_v47 = vadd.f32 %v2402_v20, %v4912_v44  ;;  %v3428_v20 = vor.u32 %v3565_v63, %v3427_v31 }
 0x769   : > { %v2440_v26 = vmax.f32 %v2403_v47, 0.0  ;;  %v3443_v47 = vld [vmem:[%s3968_s6 + $0x160] sm:$0xf] }
 0x76a   : > { %2717 = vmatpush.bf16.msrb.mxu2 %v3623_v49 }
 0x76e   : > { %v2404_v28 = vpop.f32.mrf.mxu3  ;;  %2718 = vmatpush.bf16.msrb.mxu2 %v3622_v25 }
 0x76f   : > { %v2405_v4 = vadd.f32 %v2404_v28, %v4912_v44  ;;  %v3560_v28 = vld [vmem:[%s3968_s6 + $0x124] sm:$0xf] }
 0x771   : > { %v2441_v24 = vmax.f32 %v2405_v4, 0.0  ;;  %v3421_v4 = vld [vmem:[%s3968_s6 + $0x138] sm:$0xf0] }
 0x772   : > { %2719 = vmatpush.bf16.msrb.mxu2 %v3621_v9 }
 0x773   : > { %v2458_v59 = vpack.c.bf16 %v2441_v24, %v2440_v26  ;;  %v3429_v24 = vld [vmem:[%s3968_s6 + $0x148] sm:$0xf0]  ;;  %v3451_v26 = vld [vmem:[%s3968_s6 + $0x170] sm:$0xf] }
 0x774   : > { %v3452_v7 = vor.u32 %v3571_v42, %v3451_v26  ;;  %v3633_v42 = vld [vmem:[%s5127_s2 + $0x190] sm:$0xff] }
 0x776   : > { %v2407_v37 = vpop.f32.mrf.mxu3 }
 0x777   : > { %v2408_v43 = vadd.f32 %v2407_v37, %v4912_v44  ;;  %v3413_v37 = vld [vmem:[%s3968_s6 + $0x128] sm:$0xf0] }
 0x778   : > { %v3416_v0 = vor.u32 %v3560_v28, %v3413_v37 }
 0x779   : > { %v2442_v15 = vmax.f32 %v2408_v43, 0.0  ;;  %v3436_v43 = vor.u32 %v3567_v54, %v3435_v29 }
 0x77e   : > { %v2409_v30 = vpop.f32.mrf.mxu3 }
 0x77f   : > { %v2410_v11 = vadd.f32 %v2409_v30, %v4912_v44  ;;  %v3419_v44 = vld [vmem:[%s3968_s6 + $0x130] sm:$0xf]  ;;  %v3562_v30 = vld [vmem:[%s3968_s6 + $0x134] sm:$0xf] }
 0x780   : > { %v3420_v62 = vor.u32 %v3563_v53, %v3419_v44 }
 0x781   : > { %v2443_v1 = vmax.f32 %v2410_v11, 0.0  ;;  %v3424_v11 = vor.u32 %v3562_v30, %v3421_v4 }
 0x782   : > { %2563 = vmatmul.bf16.gmra.mxu0 %v3420_v62 }
 0x783   : > { %v2459_v50 = vpack.c.bf16 %v2443_v1, %v2442_v15  ;;  %v3569_v15 = vld [vmem:[%s3968_s6 + $0x164] sm:$0xf0] }
 0x784   : > { %v3444_v1 = vor.u32 %v3569_v15, %v3443_v47 }
 0x785   : > { %2589 = vmatpush.bf16.msrb.mxu1 %v2459_v50  ;;  %v3432_v50 = vor.u32 %v3564_v46, %v3429_v24 }
 0x789   : > { %2590 = vmatpush.bf16.msrb.mxu1 %v2458_v59  ;;  %v3437_v59 = vld [vmem:[%s3968_s6 + $0x158] sm:$0xf0] }
 0x78a   : > { %v3440_v55 = vor.u32 %v3566_v41, %v3437_v59 }
 0x78d   : > { %2591 = vmatpush.bf16.msrb.mxu1 %v2457_v56  ;;  %v3445_v56 = vld [vmem:[%s3968_s6 + $0x168] sm:$0xf0] }
 0x78e   : > { %v3448_v13 = vor.u32 %v3568_v19, %v3445_v56  ;;  %v3631_v19 = vld [vmem:[%s5127_s2 + $0x180] sm:$0xff]  ;;  %v3630_v56 = vld [vmem:[%s5127_s2 + $0x178] sm:$0xff] }
 0x791   : > { %2592 = vmatpush.bf16.msrb.mxu1 %v2456_v21  ;;  %v3620_v21 = vld [vmem:[%s5127_s2 + $0x120] sm:$0xff] }
 0x792   : > { %2568 = vmatmul.bf16.gmra.mxu0 %v3428_v20  ;;  %2720 = vmatpush.bf16.msrb.mxu2 %v3620_v21 }
 0x795   : > { %2593 = vmatpush.bf16.msrb.mxu1 %v2455_v33 }
 0x799   : > { %2594 = vmatpush.bf16.msrb.mxu1 %v2454_v32 }
 0x79d   : > { %2595 = vmatpush.bf16.msrb.mxu1 %v2453_v8 }
 0x7a1   : > { %2596 = vmatpush.bf16.msrb.mxu1 %v2452_v39  ;;  %v2549_v57 = vpop.f32.mrf.mxu0 }
 0x7a2   : > { %2573 = vmatmul.bf16.gmra.mxu0 %v3436_v43 }
 0x7a4   : > { %2597 = vmatmul.bf16.vlgmr.msrb.gmra.mxu1 %v3400_v45 }
 0x7a9   : > { %v2551_v12 = vpop.f32.mrf.mxu0 }
 0x7b1   : > { %v2554_v33 = vpop.f32.mrf.mxu0 }
 0x7b2   : > { %2578 = vmatmul.bf16.gmra.mxu0 %v3444_v1 }
 0x7b4   : > { %2602 = vmatmul.bf16.gmra.mxu1 %v3408_v48 }
 0x7b9   : > { %v2556_v38 = vpop.f32.mrf.mxu0 }
 0x7c1   : > { %v2559_v35 = vpop.f32.mrf.mxu0 }
 0x7c2   : > { %2583 = vmatmul.bf16.gmra.mxu0 %v3452_v7  ;;  %v3632_v7 = vld [vmem:[%s5127_s2 + $0x188] sm:$0xff] }
 0x7c4   : > { %2607 = vmatmul.bf16.gmra.mxu1 %v3416_v0 }
 0x7c9   : > { %v2561_v16 = vpop.f32.mrf.mxu0 }
 0x7d4   : > { %2612 = vmatmul.bf16.gmra.mxu1 %v3424_v11 }
 0x7e4   : > { %2617 = vmatmul.bf16.gmra.mxu1 %v3432_v50  ;;  %v3635_v50 = vld [vmem:[%s5127_s2 + $0x1a0] sm:$0xff] }
 0x7e5   : > { %2869 = vmatpush.bf16.msrb.mxu3 %v3635_v50 }
 0x7e9   : > { %2870 = vmatpush.bf16.msrb.mxu3 %v3634_v58 }
 0x7ed   : > { %2871 = vmatpush.bf16.msrb.mxu3 %v3633_v42 }
 0x7f1   : > { %2872 = vmatpush.bf16.msrb.mxu3 %v3632_v7 }
 0x7f4   : > { %2622 = vmatmul.bf16.gmra.mxu1 %v3440_v55 }
 0x7f5   : > { %2873 = vmatpush.bf16.msrb.mxu3 %v3631_v19 }
 0x7f9   : > { %2874 = vmatpush.bf16.msrb.mxu3 %v3630_v56 }
 0x7ff   : > { %v2564_v2 = vpop.f32.mrf.mxu0 }
 0x804   : > { %2627 = vmatmul.bf16.gmra.mxu1 %v3448_v13 }
 0x807   : > { %v2566_v45 = vpop.f32.mrf.mxu0 }
 0x80f   : > { %v2569_v34 = vpop.f32.mrf.mxu0 }
 0x814   : > { %2632 = vmatmul.bf16.gmra.mxu1 %v3456_v51 }
 0x817   : > { %v2571_v28 = vpop.f32.mrf.mxu0 }
 0x81f   : > { %v2574_v0 = vpop.f32.mrf.mxu0 }
 0x821   : > { %v2598_v52 = vpop.f32.mrf.mxu1 }
 0x822   : > { %v2599_v10 = vadd.f32 %v2598_v52, %v2549_v57  ;;  %v3629_v57 = vld [vmem:[%s5127_s2 + $0x170] sm:$0xff] }
 0x823   : > { %2875 = vmatpush.bf16.msrb.mxu3 %v3629_v57 }
 0x827   : > { %v2576_v11 = vpop.f32.mrf.mxu0  ;;  %2876 = vmatpush.bf16.msrb.mxu3 %v3628_v18 }
 0x829   : > { %v2600_v40 = vpop.f32.mrf.mxu1 }
 0x82a   : > { %v2601_v23 = vadd.f32 %v2600_v40, %v2551_v12  ;;  %v2662_v12 = vld [vmem:[%s5127_s2 + $0x160] sm:$0x1] }
 0x82b   : > { %v2663_v51 = vunpack.c.l.bf16 %v2662_v12 }
 0x82c   : > { %v2654_v32 = vpack.c.bf16 %v2601_v23, %v2599_v10 }
 0x82d   : > { %v5044_v52 = vperm.slane %v2663_v51, 0 }
 0x82e   : > { %2721 = vmatmul.bf16.vlgmr.msrb.gmra.mxu2 %v2654_v32 }
 0x82f   : > { %v2579_v46 = vpop.f32.mrf.mxu0 }
 0x831   : > { %v2603_v5 = vpop.f32.mrf.mxu1 }
 0x832   : > { %v2604_v60 = vadd.f32 %v2603_v5, %v2554_v33 }
 0x837   : > { %v2581_v6 = vpop.f32.mrf.mxu0 }
 0x839   : > { %v2605_v27 = vpop.f32.mrf.mxu1 }
 0x83a   : > { %v2606_v8 = vadd.f32 %v2605_v27, %v2556_v38 }
 0x83c   : > { %v2655_v14 = vpack.c.bf16 %v2606_v8, %v2604_v60 }
 0x83e   : > { %2726 = vmatmul.bf16.gmra.mxu2 %v2655_v14 }
 0x83f   : > { %v2584_v61 = vpop.f32.mrf.mxu0 }
 0x841   : > { %v2608_v22 = vpop.f32.mrf.mxu1 }
 0x842   : > { %v2609_v44 = vadd.f32 %v2608_v22, %v2559_v35 }
 0x847   : > { %v2586_v13 = vpop.f32.mrf.mxu0 }
 0x849   : > { %v2610_v39 = vpop.f32.mrf.mxu1 }
 0x84a   : > { %v2611_v53 = vadd.f32 %v2610_v39, %v2561_v16 }
 0x84c   : > { %v2656_v62 = vpack.c.bf16 %v2611_v53, %v2609_v44 }
 0x84e   : > { %2731 = vmatmul.bf16.gmra.mxu2 %v2656_v62 }
 0x851   : > { %v2613_v17 = vpop.f32.mrf.mxu1 }
 0x852   : > { %v2614_v31 = vadd.f32 %v2613_v17, %v2564_v2 }
 0x859   : > { %v2615_v48 = vpop.f32.mrf.mxu1 }
 0x85a   : > { %v2616_v63 = vadd.f32 %v2615_v48, %v2566_v45 }
 0x85c   : > { %v2657_v20 = vpack.c.bf16 %v2616_v63, %v2614_v31 }
 0x85e   : > { %2736 = vmatmul.bf16.gmra.mxu2 %v2657_v20 }
 0x861   : > { %v2618_v37 = vpop.f32.mrf.mxu1 }
 0x862   : > { %v2619_v54 = vadd.f32 %v2618_v37, %v2569_v34 }
 0x869   : > { %v2620_v29 = vpop.f32.mrf.mxu1 }
 0x86a   : > { %v2621_v43 = vadd.f32 %v2620_v29, %v2571_v28 }
 0x86c   : > { %v2658_v30 = vpack.c.bf16 %v2621_v43, %v2619_v54 }
 0x86e   : > { %2741 = vmatmul.bf16.gmra.mxu2 %v2658_v30 }
 0x871   : > { %v2623_v4 = vpop.f32.mrf.mxu1 }
 0x872   : > { %v2624_v15 = vadd.f32 %v2623_v4, %v2574_v0 }
 0x879   : > { %v2625_v47 = vpop.f32.mrf.mxu1 }
 0x87a   : > { %v2626_v1 = vadd.f32 %v2625_v47, %v2576_v11 }
 0x87c   : > { %v2659_v24 = vpack.c.bf16 %v2626_v1, %v2624_v15 }
 0x87e   : > { %2746 = vmatmul.bf16.gmra.mxu2 %v2659_v24 }
 0x881   : > { %v2628_v26 = vpop.f32.mrf.mxu1 }
 0x882   : > { %v2629_v59 = vadd.f32 %v2628_v26, %v2579_v46 }
 0x889   : > { %v2630_v41 = vpop.f32.mrf.mxu1 }
 0x88a   : > { %v2631_v55 = vadd.f32 %v2630_v41, %v2581_v6 }
 0x88c   : > { %v2660_v3 = vpack.c.bf16 %v2631_v55, %v2629_v59 }
 0x88e   : > { %2751 = vmatmul.bf16.gmra.mxu2 %v2660_v3 }
 0x891   : > { %v2633_v49 = vpop.f32.mrf.mxu1 }
 0x892   : > { %v2634_v9 = vadd.f32 %v2633_v49, %v2584_v61 }
 0x899   : > { %v2635_v25 = vpop.f32.mrf.mxu1 }
 0x89a   : > { %v2636_v21 = vadd.f32 %v2635_v25, %v2586_v13 }
 0x89c   : > { %v2661_v36 = vpack.c.bf16 %v2636_v21, %v2634_v9 }
 0x89e   : > { %2756 = vmatmul.bf16.gmra.mxu2 %v2661_v36 }
 0x8b1   : > { %v2722_v33 = vpop.f32.mrf.mxu2 }
 0x8b2   : > { %v2723_v38 = vadd.f32 %v2722_v33, %v5044_v52 }
 0x8b4   : > { %v2762_v10 = vmul.f32 0.01, %v2723_v38 }
 0x8b6   : > { %v2778_v32 = vmax.f32 %v2723_v38, %v2762_v10 }
 0x8b9   : > { %v2724_v40 = vpop.f32.mrf.mxu2 }
 0x8ba   : > { %v2725_v23 = vadd.f32 %v2724_v40, %v5044_v52 }
 0x8bc   : > { %v2763_v35 = vmul.f32 0.01, %v2725_v23 }
 0x8be   : > { %v2779_v5 = vmax.f32 %v2725_v23, %v2763_v35 }
 0x8c0   : > { %v2810_v16 = vpack.c.bf16 %v2779_v5, %v2778_v32 }
 0x8c1   : > { %v2727_v27 = vpop.f32.mrf.mxu2 }
 0x8c2   : > { %2877 = vmatmul.bf16.vlgmr.msrb.gmra.mxu3 %v2810_v16  ;;  %v2728_v60 = vadd.f32 %v2727_v27, %v5044_v52  ;;  %v2818_v27 = vld [vmem:[%s5127_s2 + $0x1a8] sm:$0x1] }
 0x8c4   : > { %v2764_v14 = vmul.f32 0.01, %v2728_v60 }
 0x8c6   : > { %v2780_v39 = vmax.f32 %v2728_v60, %v2764_v14  ;;  %v2819_v60 = vunpack.c.l.bf16 %v2818_v27 }
 0x8c8   : > { %v5065_v14 = vperm.slane %v2819_v60, 0 }
 0x8c9   : > { %v2729_v8 = vpop.f32.mrf.mxu2 }
 0x8ca   : > { %v2730_v2 = vadd.f32 %v2729_v8, %v5044_v52 }
 0x8cc   : > { %v2765_v22 = vmul.f32 0.01, %v2730_v2 }
 0x8ce   : > { %v2781_v45 = vmax.f32 %v2730_v2, %v2765_v22 }
 0x8d0   : > { %v2811_v44 = vpack.c.bf16 %v2781_v45, %v2780_v39 }
 0x8d1   : > { %v2732_v53 = vpop.f32.mrf.mxu2 }
 0x8d2   : > { %2882 = vmatmul.bf16.gmra.mxu3 %v2811_v44  ;;  %v2733_v62 = vadd.f32 %v2732_v53, %v5044_v52 }
 0x8d4   : > { %v2766_v34 = vmul.f32 0.01, %v2733_v62 }
 0x8d6   : > { %v2782_v63 = vmax.f32 %v2733_v62, %v2766_v34 }
 0x8d9   : > { %v2734_v17 = vpop.f32.mrf.mxu2 }
 0x8da   : > { %v2735_v48 = vadd.f32 %v2734_v17, %v5044_v52 }
 0x8dc   : > { %v2767_v31 = vmul.f32 0.01, %v2735_v48 }
 0x8de   : > { %v2783_v20 = vmax.f32 %v2735_v48, %v2767_v31 }
 0x8e0   : > { %v2812_v28 = vpack.c.bf16 %v2783_v20, %v2782_v63 }
 0x8e1   : > { %v2737_v37 = vpop.f32.mrf.mxu2 }
 0x8e2   : > { %2887 = vmatmul.bf16.gmra.mxu3 %v2812_v28  ;;  %v2738_v0 = vadd.f32 %v2737_v37, %v5044_v52 }
 0x8e4   : > { %v2768_v54 = vmul.f32 0.01, %v2738_v0 }
 0x8e6   : > { %v2784_v4 = vmax.f32 %v2738_v0, %v2768_v54 }
 0x8e9   : > { %v2739_v29 = vpop.f32.mrf.mxu2 }
 0x8ea   : > { %v2740_v43 = vadd.f32 %v2739_v29, %v5044_v52 }
 0x8ec   : > { %v2769_v30 = vmul.f32 0.01, %v2740_v43 }
 0x8ee   : > { %v2785_v11 = vmax.f32 %v2740_v43, %v2769_v30 }
 0x8f0   : > { %v2813_v47 = vpack.c.bf16 %v2785_v11, %v2784_v4 }
 0x8f1   : > { %v2742_v15 = vpop.f32.mrf.mxu2 }
 0x8f2   : > { %2892 = vmatmul.bf16.gmra.mxu3 %v2813_v47  ;;  %v2743_v1 = vadd.f32 %v2742_v15, %v5044_v52 }
 0x8f4   : > { %v2770_v24 = vmul.f32 0.01, %v2743_v1 }
 0x8f6   : > { %v2786_v26 = vmax.f32 %v2743_v1, %v2770_v24 }
 0x8f9   : > { %v2744_v46 = vpop.f32.mrf.mxu2 }
 0x8fa   : > { %v2745_v50 = vadd.f32 %v2744_v46, %v5044_v52 }
 0x8fc   : > { %v2771_v58 = vmul.f32 0.01, %v2745_v50 }
 0x8fe   : > { %v2787_v42 = vmax.f32 %v2745_v50, %v2771_v58 }
 0x900   : > { %v2814_v6 = vpack.c.bf16 %v2787_v42, %v2786_v26 }
 0x901   : > { %v2747_v7 = vpop.f32.mrf.mxu2 }
 0x902   : > { %2897 = vmatmul.bf16.gmra.mxu3 %v2814_v6  ;;  %v2748_v41 = vadd.f32 %v2747_v7, %v5044_v52 }
 0x904   : > { %v2772_v55 = vmul.f32 0.01, %v2748_v41 }
 0x906   : > { %v2788_v49 = vmax.f32 %v2748_v41, %v2772_v55 }
 0x909   : > { %v2749_v59 = vpop.f32.mrf.mxu2 }
 0x90a   : > { %v2750_v3 = vadd.f32 %v2749_v59, %v5044_v52 }
 0x90c   : > { %v2773_v61 = vmul.f32 0.01, %v2750_v3 }
 0x90e   : > { %v2789_v19 = vmax.f32 %v2750_v3, %v2773_v61 }
 0x910   : > { %v2815_v56 = vpack.c.bf16 %v2789_v19, %v2788_v49 }
 0x911   : > { %v2752_v13 = vpop.f32.mrf.mxu2 }
 0x912   : > { %2902 = vmatmul.bf16.gmra.mxu3 %v2815_v56  ;;  %v2753_v25 = vadd.f32 %v2752_v13, %v5044_v52 }
 0x914   : > { %v2774_v9 = vmul.f32 0.01, %v2753_v25 }
 0x916   : > { %v2790_v18 = vmax.f32 %v2753_v25, %v2774_v9 }
 0x919   : > { %v2754_v57 = vpop.f32.mrf.mxu2 }
 0x91a   : > { %v2755_v21 = vadd.f32 %v2754_v57, %v5044_v52 }
 0x91c   : > { %v2775_v36 = vmul.f32 0.01, %v2755_v21 }
 0x91e   : > { %v2791_v12 = vmax.f32 %v2755_v21, %v2775_v36 }
 0x920   : > { %v2816_v51 = vpack.c.bf16 %v2791_v12, %v2790_v18 }
 0x921   : > { %v2757_v33 = vpop.f32.mrf.mxu2 }
 0x922   : > { %2907 = vmatmul.bf16.gmra.mxu3 %v2816_v51  ;;  %v2758_v38 = vadd.f32 %v2757_v33, %v5044_v52 }
 0x924   : > { %v2776_v10 = vmul.f32 0.01, %v2758_v38 }
 0x926   : > { %v2792_v32 = vmax.f32 %v2758_v38, %v2776_v10 }
 0x929   : > { %v2759_v40 = vpop.f32.mrf.mxu2 }
 0x92a   : > { %v2760_v23 = vadd.f32 %v2759_v40, %v5044_v52 }
 0x92c   : > { %v2777_v35 = vmul.f32 0.01, %v2760_v23 }
 0x92e   : > { %v2793_v5 = vmax.f32 %v2760_v23, %v2777_v35 }
 0x930   : > { %v2817_v16 = vpack.c.bf16 %v2793_v5, %v2792_v32 }
 0x932   : > { %2912 = vmatmul.bf16.gmra.mxu3 %v2817_v16 }
 0x945   : > { %v2878_v8 = vpop.f32.mrf.mxu3 }
 0x946   : > { %v2879_v2 = vadd.f32 %v2878_v8, %v5065_v14 }
 0x948   : > { %v2918_v39 = vmul.f32 0.01, %v2879_v2 }
 0x94a   : > { %v2934_v44 = vmax.f32 %v2879_v2, %v2918_v39 }
 0x94d   : > { %v2880_v22 = vpop.f32.mrf.mxu3 }
 0x94e   : > { %v2881_v45 = vadd.f32 %v2880_v22, %v5065_v14 }
 0x950   : > { %v2919_v52 = vmul.f32 0.01, %v2881_v45 }
 0x952   : > { %v2935_v53 = vmax.f32 %v2881_v45, %v2919_v52 }
 0x954   : > { %v5069_v62 = vpack.c.bf16 %v2935_v53, %v2934_v44 }
 0x955   : > { %v2883_v17 = vpop.f32.mrf.mxu3 }
 0x956   : > { %v2884_v34 = vadd.f32 %v2883_v17, %v5065_v14 }
 0x958   : > { %v2920_v31 = vmul.f32 0.01, %v2884_v34 }
 0x95a   : > { %v2936_v28 = vmax.f32 %v2884_v34, %v2920_v31  ;;  %v2959_v34 = vld [vmem:[%s5127_s2 + $0x1b8] sm:$0x1] }
 0x95d   : > { %v2885_v48 = vpop.f32.mrf.mxu3 }
 0x95e   : > { %v2886_v63 = vadd.f32 %v2885_v48, %v5065_v14  ;;  %v2960_v48 = vunpack.c.l.bf16 %v2959_v34 }
 0x960   : > { %v2921_v20 = vmul.f32 0.01, %v2886_v63 }
 0x962   : > { %v2937_v37 = vmax.f32 %v2886_v63, %v2921_v20 }
 0x964   : > { %v2952_v0 = vpack.c.bf16 %v2937_v37, %v2936_v28 }
 0x965   : > { %v2888_v29 = vpop.f32.mrf.mxu3 }
 0x966   : > { %v2889_v54 = vadd.f32 %v2888_v29, %v5065_v14 }
 0x968   : > { %v2922_v30 = vmul.f32 0.01, %v2889_v54 }
 0x96a   : > { %v2938_v47 = vmax.f32 %v2889_v54, %v2922_v30 }
 0x96d   : > { %v2890_v43 = vpop.f32.mrf.mxu3 }
 0x96e   : > { %v2891_v4 = vadd.f32 %v2890_v43, %v5065_v14 }
 0x970   : > { %v2923_v11 = vmul.f32 0.01, %v2891_v4 }
 0x972   : > { %v2939_v15 = vmax.f32 %v2891_v4, %v2923_v11 }
 0x974   : > { %v2953_v1 = vpack.c.bf16 %v2939_v15, %v2938_v47 }
 0x975   : > { %v2893_v46 = vpop.f32.mrf.mxu3 }
 0x976   : > { %v2894_v24 = vadd.f32 %v2893_v46, %v5065_v14 }
 0x978   : > { %v2924_v58 = vmul.f32 0.01, %v2894_v24 }
 0x97a   : > { %v2940_v6 = vmax.f32 %v2894_v24, %v2924_v58 }
 0x97d   : > { %v2895_v50 = vpop.f32.mrf.mxu3 }
 0x97e   : > { %v2896_v26 = vadd.f32 %v2895_v50, %v5065_v14 }
 0x980   : > { %v2925_v42 = vmul.f32 0.01, %v2896_v26 }
 0x982   : > { %v2941_v7 = vmax.f32 %v2896_v26, %v2925_v42 }
 0x984   : > { %v2954_v41 = vpack.c.bf16 %v2941_v7, %v2940_v6 }
 0x985   : > { %v2898_v59 = vpop.f32.mrf.mxu3 }
 0x986   : > { %v2899_v55 = vadd.f32 %v2898_v59, %v5065_v14 }
 0x988   : > { %v2926_v61 = vmul.f32 0.01, %v2899_v55 }
 0x98a   : > { %v2942_v56 = vmax.f32 %v2899_v55, %v2926_v61 }
 0x98d   : > { %v2900_v3 = vpop.f32.mrf.mxu3 }
 0x98e   : > { %v2901_v49 = vadd.f32 %v2900_v3, %v5065_v14 }
 0x990   : > { %v2927_v19 = vmul.f32 0.01, %v2901_v49 }
 0x992   : > { %v2943_v13 = vmax.f32 %v2901_v49, %v2927_v19 }
 0x994   : > { %v2955_v25 = vpack.c.bf16 %v2943_v13, %v2942_v56 }
 0x995   : > { %v2903_v57 = vpop.f32.mrf.mxu3 }
 0x996   : > { %v2904_v2 = vadd.f32 %v2903_v57, %v5065_v14 }
 0x998   : > { %v2928_v52 = vmul.f32 0.01, %v2904_v2 }
 0x99a   : > { %v2944_v53 = vmax.f32 %v2904_v2, %v2928_v52 }
 0x99d   : > { %v2905_v9 = vpop.f32.mrf.mxu3 }
 0x99e   : > { %v2906_v60 = vadd.f32 %v2905_v9, %v5065_v14 }
 0x9a0   : > { %v2929_v39 = vmul.f32 0.01, %v2906_v60 }
 0x9a2   : > { %v2945_v44 = vmax.f32 %v2906_v60, %v2929_v39 }
 0x9a4   : > { %v2956_v17 = vpack.c.bf16 %v2945_v44, %v2944_v53 }
 0x9a5   : > { %v2908_v21 = vpop.f32.mrf.mxu3 }
 0x9a6   : > { %v2909_v23 = vadd.f32 %v2908_v21, %v5065_v14 }
 0x9a8   : > { %v2930_v27 = vmul.f32 0.01, %v2909_v23 }
 0x9aa   : > { %v2946_v22 = vmax.f32 %v2909_v23, %v2930_v27 }
 0x9ad   : > { %v2910_v36 = vpop.f32.mrf.mxu3 }
 0x9ae   : > { %v2911_v40 = vadd.f32 %v2910_v36, %v5065_v14 }
 0x9b0   : > { %v2931_v5 = vmul.f32 0.01, %v2911_v40 }
 0x9b2   : > { %v2947_v8 = vmax.f32 %v2911_v40, %v2931_v5 }
 0x9b4   : > { %v2957_v45 = vpack.c.bf16 %v2947_v8, %v2946_v22 }
 0x9b5   : > { %v2913_v18 = vpop.f32.mrf.mxu3 }
 0x9b6   : > { %v2914_v12 = vadd.f32 %v2913_v18, %v5065_v14 }
 0x9b8   : > { %v2932_v33 = vmul.f32 0.01, %v2914_v12 }
 0x9ba   : > { %v2948_v35 = vmax.f32 %v2914_v12, %v2932_v33 }
 0x9bd   : > { %v2915_v51 = vpop.f32.mrf.mxu3 }
 0x9be   : > { %v2916_v38 = vadd.f32 %v2915_v51, %v5065_v14  ;;  %v2950_v14 = vld [vmem:[%s5127_s2 + $0x1b0] sm:$0x1] }
 0x9c0   : > { %v2933_v10 = vmul.f32 0.01, %v2916_v38 }
 0x9c2   : > { %v2949_v32 = vmax.f32 %v2916_v38, %v2933_v10 }
 0x9c4   : > { %v2958_v16 = vpack.c.bf16 %v2949_v32, %v2948_v35 }
 0x9c6   : > { %2961 = vmatpush.bf16.xpose.msra.mxu0 %v2958_v16 }
 0x9ce   : > { %2962 = vmatpush.bf16.xpose.msra.mxu0 %v2957_v45 }
 0x9d6   : > { %2963 = vmatpush.bf16.xpose.msra.mxu0 %v2956_v17 }
 0x9de   : > { %2964 = vmatpush.bf16.xpose.msra.mxu0 %v2955_v25 }
 0x9e6   : > { %2965 = vmatpush.bf16.xpose.msra.mxu0 %v2954_v41 }
 0x9ee   : > { %2966 = vmatpush.bf16.xpose.msra.mxu0 %v2953_v1 }
 0x9f6   : > { %2967 = vmatpush.bf16.xpose.msra.mxu0 %v2952_v0 }
 0x9fe   : > { %2968 = vmatpush.bf16.xpose.msra.mxu0 %v5069_v62 }
 0xa05   : > { %2969 = vmatmul.bf16.vlgmr.msra.gmra.mxu0 %v2950_v14 }
 0xa82   : > { %v2970_v31 = vpop.f32.mrf.mxu0 }
 0xa83   : > { %v2971_v62 = vadd.f32 %v2970_v31, %v2960_v48 }
 0xa85   : > { %2974 = vst [vmem:[%s204_s11] sm:$0x1] %v2971_v62 }
 0xa86   : > { %3825 = shalt.err (!%p3822_p5)
}
 0xa87   : > { %3721 = dma.vmem_to_hbm [thread:$0]  (%p3934_p10), %s2987_s9, 16, %s2989_s17, %s2976_s19  }
 0xa8a   : > { %v2972_v63 = vpop.f32.mrf.mxu0 }
 0xa8b PF: > { %p3732_p7 = scmp.ge.s32.totalorder %s3864_s15, 2  ;;  %s3000_s28 = sand.u32 1, %s3852_s12  }
 0xa8c   : > { %s3001_s30 = scalar_lea.sflag [#allocation5], %s3000_s28 }
 0xa8d   : > { %p3728_p8 = pnand %p3732_p7, %p3938_p11 }
 0xa8f   : > { %p3729_p9 = pneg %p3728_p8 }
 0xa91   : > { %3847 = dma.done.wait (%p3729_p9), %s3001_s30, 16  }
 0xa92   : > { %3849 = vsyncadd (%p3729_p9), %s3001_s30, 4294967280  ;;  %p16_p13 = scmp.ge.s32.totalorder %s3914_s18, 6   ;;  %s5202_s12 = smov %s3856_s13 }
 0xa93   : > { %s5203_s13 = smov %s3860_s14  ;;  %s5204_s14 = smov %s3926_s21 }
 0xa94   : > { %s5205_s15 = smov %s3914_s18  ;;  %18 = sbr.rel (!%p16_p13) target bundleno = 5 (0x5), region = 80 }
 0xa99   :  { %3006 = vsyncpa [#allocation4], 1 }
 0xa9a   :  { %3008 = vsyncpa [#allocation4 + $0x1], 1 }
 0xa9b   :  { %3009 = vsyncpa [#allocation5], 1 }
 0xa9c   :  { %3011 = vsyncpa [#allocation5 + $0x1], 1 }

</bundles_post_ra>
